<compile_context>
chip_gen: v6e
topology: v6e:2x2x1
jax: 0.10.0
libtpu: 0.0.40
codegen_flags: <defaults>
</compile_context>

<pallas_src>
import functools

import numpy as np
import jax
import jax.numpy as jnp
from jax.experimental import pallas as pl
from jax.experimental.pallas import tpu as pltpu

CFG = dict(
    input_dim=32,
    map_skip_dim=16,
    reshape_channel=4,
    res_dim=16,
    res_num=2,
    spatial_y=16,
    spatial_x=16,
    upsample_dims=[16, 8, 1],
    temperature=0.8,
)
SY8 = CFG['spatial_y'] // 8
SX8 = CFG['spatial_x'] // 8
HW8 = SY8 * SX8


def _r16(x):
    return ((x + 15) // 16) * 16


def _layout(nb):
    """Static row/col offsets of the packed constant blobs.  Shared by
    pack_params and the kernel; every section start is tile aligned (16 rows)
    so all in-kernel ref slices are cheap."""
    n8 = nb * HW8
    rd = CFG['res_dim']
    lay = dict(
        n8=n8,
        # wconv blob (bf16): one row section per 3x3 conv, tap-major columns.
        r0c1=0, r0c2=16, r1c1=32, r1c2=48, wu0=64, wu1=80, wu2=96,
        wconv_rows=96 + _r16(nb),
        wconv_cols=max(9 * rd, nb * 9 * CFG['upsample_dims'][1]),
        # wmix blob (f32): projection fc + scatter constants + 1x1 conv1.
        mx_proj=0, mx_rep=16, mx_smask=24, mx_w1a=40, mx_w1b=56,
        wmix_rows=72, wmix_cols=max(CFG['input_dim'], n8, rd),
        # bias blob (f32): one column per bias vector (channels on sublanes).
        b_proj=0, b_conv1=1, b_res=(2, 3, 4, 5), b_up=(6, 7, 8),
        # boundary-mask blob (f32): one 8-row section per resolution.
        m_res=0, m_u0=8, m_u1=16, m_u2=24,
        masks_cols=nb * CFG['spatial_y'] * CFG['spatial_x'],
        # nearest-2x one-hot matrices (bf16).
        u0_row=0,
    )
    lay['u1_row'] = _r16(n8)
    lay['u2_row'] = lay['u1_row'] + _r16(n8 * 4)
    lay['up_rows'] = lay['u2_row'] + _r16(n8 * 16)
    return lay


# ------------------------- host-side constant builders -------------------------

def _boundary_masks(height, width, nbatch):
    """(8, nbatch*H*W) f32 masks, one row per non-center 3x3 tap (t order,
    center skipped), zeroing lanes whose tap falls outside the image."""
    n = nbatch * height * width
    cols = np.arange(n)
    sp = cols % (height * width)
    yy = sp // width
    xx = sp % width
    rows = []
    for t in range(9):
        dy, dx = t // 3 - 1, t % 3 - 1
        if dy == 0 and dx == 0:
            continue
        ok = ((yy + dy >= 0) & (yy + dy < height) &
              (xx + dx >= 0) & (xx + dx < width))
        rows.append(ok.astype(np.float32))
    return np.stack(rows, axis=0)


def _nearest2x_matrix_np(h_in, w_in, nbatch):
    """(N_in, N_out) one-hot so that (x @ U) is nearest-neighbour 2x upsampling
    of a b-major (C, N) activation (lane order b*H*W + y*W + x)."""
    h_out, w_out = 2 * h_in, 2 * w_in
    n_in = nbatch * h_in * w_in
    n_out = nbatch * h_out * w_out
    u = np.zeros((n_in, n_out), np.float32)
    col = np.arange(n_out)
    b = col // (h_out * w_out)
    rem = col % (h_out * w_out)
    src = b * (h_in * w_in) + ((rem // w_out) // 2) * w_in + (rem % w_out) // 2
    u[src, col] = 1.0
    return u


# --------------------------------- the kernel ---------------------------------

def _location_head_kernel(embT_ref, ms_ref, wmix_ref, bias_ref, wconv_ref,
                          masks_ref, upmats_ref, logits_ref, p_ref,
                          *, nb, temperature):
    f32, bf16 = jnp.float32, jnp.bfloat16
    cfg = CFG
    rd, msd, rc = cfg['res_dim'], cfg['map_skip_dim'], cfg['reshape_channel']
    lay = _layout(nb)
    n8 = lay['n8']

    def conv3x3(x, w_bf16, b_col, mask_blk, height, width, act, residual=None):
        """'same' 3x3 conv on a (Cin, nb*H*W) activation.  The 9 taps are static
        lane rolls (masked by precomputed boundary rows) stacked along K and fed
        to ONE bf16 MXU matmul; bias/residual/relu stay f32."""
        parts = []
        mi = 0
        for t in range(9):
            dy, dx = t // 3 - 1, t % 3 - 1
            if dy == 0 and dx == 0:
                parts.append(x)
            else:
                delta = dy * width + dx
                parts.append(jnp.roll(x, -delta, axis=1) * mask_blk[mi:mi + 1, :])
                mi += 1
        patches = jnp.concatenate(parts, axis=0).astype(bf16)      # (9*Cin, N)
        out = jnp.dot(w_bf16, patches, preferred_element_type=f32) + b_col
        if residual is not None:
            out = out + residual
        return jnp.maximum(out, 0.0) if act else out

    # ---- project_embed + reshape + cat + 1x1 conv1 (exact f32, 4 small dots) --
    embT = embT_ref[...]                                            # (input_dim, nb)
    proj_b = bias_ref[0:rc * HW8, lay['b_proj']:lay['b_proj'] + 1]
    P = jnp.dot(wmix_ref[lay['mx_proj']:lay['mx_proj'] + rc * HW8, 0:cfg['input_dim']],
                embT, preferred_element_type=f32) + proj_b          # (rc*hw8, nb)
    Pr = jnp.maximum(P, 0.0)
    # Pr[r=c*hw8+s, b] scattered to pixel columns n=b*hw8+s via precomputed
    # Rep (batch one-hot) and SMask (sub-pixel match mask).
    pr_scat = (jnp.dot(Pr, wmix_ref[lay['mx_rep']:lay['mx_rep'] + nb, 0:n8],
                       preferred_element_type=f32)
               * wmix_ref[lay['mx_smask']:lay['mx_smask'] + rc * HW8, 0:n8])
    ms_last = ms_ref[0:msd, :]                                      # map_skip[-1]
    ms_prev = ms_ref[msd:2 * msd, :]                                # map_skip[-2]
    x = (jnp.dot(wmix_ref[lay['mx_w1a']:lay['mx_w1a'] + rd, 0:rc * HW8], pr_scat,
                 preferred_element_type=f32)
         + jnp.dot(wmix_ref[lay['mx_w1b']:lay['mx_w1b'] + rd, 0:msd],
                   jnp.maximum(ms_last, 0.0), preferred_element_type=f32)
         + bias_ref[0:rd, lay['b_conv1']:lay['b_conv1'] + 1])
    x = jnp.maximum(x, 0.0)                                         # (res_dim, n8)

    # ---- residual tower at (sy/8, sx/8); masks hoisted & reused -------------
    m_res = masks_ref[lay['m_res']:lay['m_res'] + 8, 0:n8]
    res_rows = ((lay['r0c1'], lay['r0c2']), (lay['r1c1'], lay['r1c2']))
    skips = (ms_last, ms_prev)
    for i in range(cfg['res_num']):
        x = x + skips[i]
        residual = x
        bc1, bc2 = lay['b_res'][2 * i], lay['b_res'][2 * i + 1]
        h = conv3x3(x, wconv_ref[res_rows[i][0]:res_rows[i][0] + rd, 0:9 * rd],
                    bias_ref[0:rd, bc1:bc1 + 1], m_res, SY8, SX8, act=True)
        x = conv3x3(h, wconv_ref[res_rows[i][1]:res_rows[i][1] + rd, 0:9 * rd],
                    bias_ref[0:rd, bc2:bc2 + 1], m_res, SY8, SX8, act=True,
                    residual=residual)

    # ---- upsample stages 0/1: precomputed nearest-2x one-hot matmul + conv ----
    ud = cfg['upsample_dims']
    stages = (
        (lay['u0_row'], n8, lay['wu0'], ud[0], rd,
         lay['m_u0'], lay['b_up'][0], 2 * SY8, 2 * SX8),
        (lay['u1_row'], n8 * 4, lay['wu1'], ud[1], ud[0],
         lay['m_u1'], lay['b_up'][1], 4 * SY8, 4 * SX8),
    )
    for (urow, nin, wrow, cout, cin, mrow, bcol, ho, wo) in stages:
        nout = nb * ho * wo
        up = upmats_ref[urow:urow + nin, 0:nout]                    # bf16 one-hot
        x = jnp.dot(x.astype(bf16), up, preferred_element_type=f32)
        x = conv3x3(x, wconv_ref[wrow:wrow + cout, 0:9 * cin],
                    bias_ref[0:cout, bcol:bcol + 1],
                    masks_ref[mrow:mrow + 8, 0:nout], ho, wo, act=True)

    # ---- final stage: nearest-2x + Cout=1 conv (no act) + /T + softmax.
    #      Block-diagonal weight -> logits land directly as a lane-dense
    #      (nb, H*W) block; exact-divide softmax on both rows at once. ----
    hf, wf = 8 * SY8, 8 * SX8
    hw = hf * wf
    cin_f = ud[1]
    nout = nb * hw
    up2 = upmats_ref[lay['u2_row']:lay['u2_row'] + n8 * 16, 0:nout]
    x = jnp.dot(x.astype(bf16), up2, preferred_element_type=f32)    # (cin_f, nb*hw)
    m_f = masks_ref[lay['m_u2']:lay['m_u2'] + 8, 0:hw]   # per-image mask (periodic)
    parts = []
    for b in range(nb):
        xb = x[:, b * hw:(b + 1) * hw]
        mi = 0
        for t in range(9):
            dy, dx = t // 3 - 1, t % 3 - 1
            if dy == 0 and dx == 0:
                parts.append(xb)
            else:
                delta = dy * wf + dx
                parts.append(jnp.roll(xb, -delta, axis=1) * m_f[mi:mi + 1, :])
                mi += 1
    patches = jnp.concatenate(parts, axis=0).astype(bf16)           # (nb*9*cin_f, hw)
    w_last = wconv_ref[lay['wu2']:lay['wu2'] + nb, 0:nb * 9 * cin_f]
    logits = (jnp.dot(w_last, patches, preferred_element_type=f32)
              + bias_ref[0:1, lay['b_up'][2]:lay['b_up'][2] + 1])    # (nb, hw)
    logits = logits * (1.0 / temperature)

    mmax = jnp.max(logits, axis=-1, keepdims=True)
    e = jnp.exp(logits - mmax)
    denom = jnp.sum(e, axis=-1, keepdims=True)
    logits_ref[...] = logits
    p_ref[...] = e / denom                                           # exact normalization


# ------------------------------ wrapper / driver ------------------------------

@jax.jit
def location_head_forward(packed, embedding, map_skip, sample_key):
    """Single fused pallas_call. Returns (logits/T, softmax probs, location)."""
    cfg = CFG
    B = embedding.shape[0]
    n_out = cfg['spatial_y'] * cfg['spatial_x'] * cfg['upsample_dims'][-1]

    # Layout-only glue (tiny, fused by XLA into input prep): NCHW -> (C, B*H*W).
    def to_cn(m):
        b_, c, h, w = m.shape
        return jnp.transpose(m, (1, 0, 2, 3)).reshape(c, b_ * h * w)

    embT = embedding.T
    ms = jnp.concatenate([to_cn(map_skip[-1]), to_cn(map_skip[-2])], axis=0)

    operands = [embT, ms, packed['wmix'], packed['bias'], packed['wconv'],
                packed['masks'], packed['upmats']]

    kernel = functools.partial(_location_head_kernel, nb=B,
                               temperature=float(cfg['temperature']))

    # NOTE(v7x): on a 2-TensorCore chip this could use grid=(B,) with
    # dimension_semantics=("parallel",) to engage the second core; kept as a
    # single grid step since the kernel is latency-bound and the two steps
    # would serialize on single-core v5e/v6e.
    logits, p = pl.pallas_call(
        kernel,
        grid=(1,),
        in_specs=[pl.BlockSpec(op.shape, lambda i: (0, 0)) for op in operands],
        out_specs=(pl.BlockSpec((B, n_out), lambda i: (0, 0)),
                   pl.BlockSpec((B, n_out), lambda i: (0, 0))),
        out_shape=(jax.ShapeDtypeStruct((B, n_out), jnp.float32),
                   jax.ShapeDtypeStruct((B, n_out), jnp.float32)),
        compiler_params=pltpu.CompilerParams(
            dimension_semantics=("arbitrary",)),
    )(*operands)

    # TODO(synk): torch.multinomial sampling has no clean Pallas equivalent;
    # jax.random.categorical over the tempered logits samples the same distribution.
    location = jax.random.categorical(sample_key, logits, axis=-1)
    return logits, p, location


# -------------------------------- parameters ----------------------------------

def init_params(key):
    cfg = CFG
    proj_out = HW8 * cfg['reshape_channel']
    ks = iter(jax.random.split(key, 32))
    scale = 0.1

    def w(shape):
        return scale * jax.random.normal(next(ks), shape, dtype=jnp.float32)

    params = {
        'proj_w': w((cfg['input_dim'], proj_out)),   # fc: proj = emb @ W + b
        'proj_b': w((proj_out,)),
        # 1x1 conv weight == torch weight[:, :, 0, 0]:
        'conv1_w': w((cfg['res_dim'], cfg['reshape_channel'] + cfg['map_skip_dim'])),
        'conv1_b': w((cfg['res_dim'],)),
        'res': [],
        'up': [],
    }
    d = cfg['res_dim']
    for _ in range(cfg['res_num']):
        params['res'].append({'w1': w((d, d, 3, 3)), 'b1': w((d,)),   # torch OIHW
                              'w2': w((d, d, 3, 3)), 'b2': w((d,))})
    dims = [d] + list(cfg['upsample_dims'])
    for i in range(len(cfg['upsample_dims'])):
        params['up'].append({'w': w((dims[i + 1], dims[i], 3, 3)),
                             'b': w((dims[i + 1],))})
    return params


def pack_params(params, batch):
    """One-time host-side repack of torch-layout weights + all the constant
    scatter / mask / upsample matrices into 5 lane-dense blobs."""
    cfg = CFG
    nb = batch
    lay = _layout(nb)
    rd, rc, msd = cfg['res_dim'], cfg['reshape_channel'], cfg['map_skip_dim']
    n8 = nb * HW8

    def conv_flat(wt):  # torch (Cout, Cin, 3, 3) -> (Cout, 9*Cin), tap-major
        wt = np.asarray(wt)
        co, ci = wt.shape[:2]
        return wt.transpose(0, 2, 3, 1).reshape(co, 9 * ci)

    # ---- wconv blob (bf16): one row section per 3x3 conv ----
    wconv = np.zeros((lay['wconv_rows'], lay['wconv_cols']), np.float32)
    wconv[lay['r0c1']:lay['r0c1'] + rd, :9 * rd] = conv_flat(params['res'][0]['w1'])
    wconv[lay['r0c2']:lay['r0c2'] + rd, :9 * rd] = conv_flat(params['res'][0]['w2'])
    wconv[lay['r1c1']:lay['r1c1'] + rd, :9 * rd] = conv_flat(params['res'][1]['w1'])
    wconv[lay['r1c2']:lay['r1c2'] + rd, :9 * rd] = conv_flat(params['res'][1]['w2'])
    u0 = conv_flat(params['up'][0]['w'])
    wconv[lay['wu0']:lay['wu0'] + u0.shape[0], :u0.shape[1]] = u0
    u1 = conv_flat(params['up'][1]['w'])
    wconv[lay['wu1']:lay['wu1'] + u1.shape[0], :u1.shape[1]] = u1
    u2 = conv_flat(params['up'][2]['w'])                        # (1, 9*cin_f)
    for b in range(nb):                                         # block-diagonal
        wconv[lay['wu2'] + b, b * u2.shape[1]:(b + 1) * u2.shape[1]] = u2[0]

    # ---- wmix blob (f32): projection fc, scatter constants, 1x1 conv1 ----
    wmix = np.zeros((lay['wmix_rows'], lay['wmix_cols']), np.float32)
    wmix[lay['mx_proj']:lay['mx_proj'] + rc * HW8, :cfg['input_dim']] = \
        np.asarray(params['proj_w']).T
    cols = np.arange(n8)
    rep = np.zeros((nb, n8), np.float32)
    rep[cols // HW8, cols] = 1.0
    wmix[lay['mx_rep']:lay['mx_rep'] + nb, :n8] = rep
    r_idx = np.arange(rc * HW8)
    smask = (r_idx[:, None] % HW8 == cols[None, :] % HW8).astype(np.float32)
    wmix[lay['mx_smask']:lay['mx_smask'] + rc * HW8, :n8] = smask
    c1 = np.asarray(params['conv1_w'])
    wmix[lay['mx_w1a']:lay['mx_w1a'] + rd, :rc * HW8] = np.repeat(c1[:, :rc], HW8, axis=1)
    wmix[lay['mx_w1b']:lay['mx_w1b'] + rd, :msd] = c1[:, rc:]

    # ---- bias blob (f32): one column per bias vector ----
    bias = np.zeros((16, 16), np.float32)
    bias[:rc * HW8, lay['b_proj']] = np.asarray(params['proj_b'])
    bias[:rd, lay['b_conv1']] = np.asarray(params['conv1_b'])
    bias[:rd, lay['b_res'][0]] = np.asarray(params['res'][0]['b1'])
    bias[:rd, lay['b_res'][1]] = np.asarray(params['res'][0]['b2'])
    bias[:rd, lay['b_res'][2]] = np.asarray(params['res'][1]['b1'])
    bias[:rd, lay['b_res'][3]] = np.asarray(params['res'][1]['b2'])
    for i in range(3):
        bi = np.asarray(params['up'][i]['b'])
        bias[:bi.shape[0], lay['b_up'][i]] = bi

    # ---- boundary-mask blob (f32) ----
    masks = np.zeros((32, lay['masks_cols']), np.float32)
    masks[lay['m_res']:lay['m_res'] + 8, :nb * HW8] = _boundary_masks(SY8, SX8, nb)
    masks[lay['m_u0']:lay['m_u0'] + 8, :nb * HW8 * 4] = _boundary_masks(2 * SY8, 2 * SX8, nb)
    masks[lay['m_u1']:lay['m_u1'] + 8, :nb * HW8 * 16] = _boundary_masks(4 * SY8, 4 * SX8, nb)
    masks[lay['m_u2']:lay['m_u2'] + 8, :nb * HW8 * 64] = _boundary_masks(8 * SY8, 8 * SX8, nb)

    # ---- nearest-2x one-hot matrices (bf16; 0/1 exact in bf16) ----
    upm = np.zeros((lay['up_rows'], lay['masks_cols']), np.float32)
    u = _nearest2x_matrix_np(SY8, SX8, nb)
    upm[lay['u0_row']:lay['u0_row'] + u.shape[0], :u.shape[1]] = u
    u = _nearest2x_matrix_np(2 * SY8, 2 * SX8, nb)
    upm[lay['u1_row']:lay['u1_row'] + u.shape[0], :u.shape[1]] = u
    u = _nearest2x_matrix_np(4 * SY8, 4 * SX8, nb)
    upm[lay['u2_row']:lay['u2_row'] + u.shape[0], :u.shape[1]] = u

    return {
        'wmix': jnp.asarray(wmix, jnp.float32),
        'bias': jnp.asarray(bias, jnp.float32),
        'wconv': jnp.asarray(wconv, jnp.bfloat16),
        'masks': jnp.asarray(masks, jnp.float32),
        'upmats': jnp.asarray(upm, jnp.bfloat16),
    }


# --------------------------- plain-JAX reference ------------------------------

def location_head_reference(params, embedding, map_skip):
    """Straightforward XLA replica of the torch forward (for verification)."""
    cfg = CFG
    hi = jax.lax.Precision.HIGHEST
    relu = jax.nn.relu
    B = embedding.shape[0]

    def conv_nchw(x, w, b, padding):
        y = jax.lax.conv_general_dilated(
            x, w, window_strides=(1, 1),
            padding=[(padding, padding), (padding, padding)],
            dimension_numbers=('NCHW', 'OIHW', 'NCHW'), precision=hi)
        return y + b.reshape(1, -1, 1, 1)

    proj = relu(jnp.dot(embedding, params['proj_w'], precision=hi) + params['proj_b'])
    reshape_embedding = proj.reshape(B, cfg['reshape_channel'], SY8, SX8)
    cat_feature = jnp.concatenate([reshape_embedding, map_skip[-1]], axis=1)
    x1 = relu(cat_feature)
    x = relu(conv_nchw(x1, params['conv1_w'][:, :, None, None], params['conv1_b'], 0))
    for i in range(cfg['res_num']):
        x = x + map_skip[len(map_skip) - i - 1]
        residual = x
        h = relu(conv_nchw(x, params['res'][i]['w1'], params['res'][i]['b1'], 1))
        x = relu(conv_nchw(h, params['res'][i]['w2'], params['res'][i]['b2'], 1)
                 + residual)
    for i in range(len(cfg['upsample_dims'])):
        x = jnp.repeat(jnp.repeat(x, 2, axis=2), 2, axis=3)   # nearest 2x
        x = conv_nchw(x, params['up'][i]['w'], params['up'][i]['b'], 1)
        if i != len(cfg['upsample_dims']) - 1:
            x = relu(x)
    logits = x.reshape(B, -1) / cfg['temperature']
    p = jax.nn.softmax(logits, axis=-1)
    return logits, p


# ----------------------------------- main --------------------------------------

if __name__ == "__main__":
    key = jax.random.PRNGKey(0)
    k_params, k_emb, k_skip, k_sample = jax.random.split(key, 4)

    params = init_params(k_params)

    B = 2
    packed = pack_params(params, batch=B)

    embedding = jax.random.normal(k_emb, (B, CFG['input_dim']), dtype=jnp.float32)
    skip_keys = jax.random.split(k_skip, CFG['res_num'] + 1)
    # map_skip in torch NCHW layout: (B, map_skip_dim, sy//8, sx//8)
    map_skip = [
        jax.random.normal(kk, (B, CFG['map_skip_dim'], SY8, SX8), dtype=jnp.float32)
        for kk in skip_keys
    ]

    logits, p, location = location_head_forward(packed, embedding, map_skip, k_sample)
    jax.block_until_ready((logits, p, location))

    n_out = CFG['spatial_y'] * CFG['spatial_x'] * CFG['upsample_dims'][-1]
    assert logits.shape == (B, n_out)
    assert p.shape == logits.shape
    assert location.shape == (B,)

    # Correctness check against the plain-JAX f32 reference.  Tolerances allow
    # for the bf16 cast of the MXU operands (weights / patches / upsample
    # matrices); accumulation and all elementwise math stay f32.
    ref_logits, ref_p = location_head_reference(params, embedding, map_skip)
    err_l = float(jnp.max(jnp.abs(logits - ref_logits)))
    err_p = float(jnp.max(jnp.abs(p - ref_p)))
    assert jnp.allclose(logits, ref_logits, rtol=5e-2, atol=8e-2), err_l
    assert jnp.allclose(p, ref_p, rtol=5e-2, atol=5e-3), err_p
    assert bool(jnp.all(jnp.isfinite(p)))
    assert bool(jnp.all(jnp.abs(jnp.sum(p, axis=-1) - 1.0) < 1e-3))

    print("KERNEL_OK")
</pallas_src>

<mosaic_0001>
module attributes {stable_mosaic.version = 11 : i64} {
  func.func @_location_head_kernel(%arg0: i32, %arg1: memref<32x2xf32, #tpu.memory_space<vmem>>, %arg2: memref<32x8xf32, #tpu.memory_space<vmem>>, %arg3: memref<72x32xf32, #tpu.memory_space<vmem>>, %arg4: memref<16x16xf32, #tpu.memory_space<vmem>>, %arg5: memref<112x144xbf16, #tpu.memory_space<vmem>>, %arg6: memref<32x512xf32, #tpu.memory_space<vmem>>, %arg7: memref<176x512xbf16, #tpu.memory_space<vmem>>, %arg8: memref<2x256xf32, #tpu.memory_space<vmem>>, %arg9: memref<2x256xf32, #tpu.memory_space<vmem>>) attributes {dimension_semantics = [#tpu.dimension_semantics<arbitrary>], iteration_bounds = array<i64: 1>, scalar_prefetch = 0 : i64, scratch_operands = 0 : i64, tpu.core_type = #tpu.core_type<tc>, window_params = [{pipeline_mode = #tpu.pipeline_mode<synchronous>, transform_indices = @transform_0, window_bounds = array<i64: 32, 2>}, {pipeline_mode = #tpu.pipeline_mode<synchronous>, transform_indices = @transform_1, window_bounds = array<i64: 32, 8>}, {pipeline_mode = #tpu.pipeline_mode<synchronous>, transform_indices = @transform_2, window_bounds = array<i64: 72, 32>}, {pipeline_mode = #tpu.pipeline_mode<synchronous>, transform_indices = @transform_3, window_bounds = array<i64: 16, 16>}, {pipeline_mode = #tpu.pipeline_mode<synchronous>, transform_indices = @transform_4, window_bounds = array<i64: 112, 144>}, {pipeline_mode = #tpu.pipeline_mode<synchronous>, transform_indices = @transform_5, window_bounds = array<i64: 32, 512>}, {pipeline_mode = #tpu.pipeline_mode<synchronous>, transform_indices = @transform_6, window_bounds = array<i64: 176, 512>}, {pipeline_mode = #tpu.pipeline_mode<synchronous>, transform_indices = @transform_7, window_bounds = array<i64: 2, 256>}, {pipeline_mode = #tpu.pipeline_mode<synchronous>, transform_indices = @transform_8, window_bounds = array<i64: 2, 256>}]} {
    %c0 = arith.constant 0 : index
    %c0_0 = arith.constant 0 : index
    %0 = vector.load %arg1[%c0, %c0_0] : memref<32x2xf32, #tpu.memory_space<vmem>>, vector<32x2xf32>
    %c0_1 = arith.constant 0 : index
    %c0_2 = arith.constant 0 : index
    %1 = vector.load %arg4[%c0_1, %c0_2] : memref<16x16xf32, #tpu.memory_space<vmem>>, vector<16x1xf32>
    %c0_3 = arith.constant 0 : index
    %c0_4 = arith.constant 0 : index
    %2 = vector.load %arg3[%c0_3, %c0_4] : memref<72x32xf32, #tpu.memory_space<vmem>>, vector<16x32xf32>
    %cst = arith.constant dense<0.000000e+00> : vector<16x2xf32>
    %3 = tpu.matmul %2, %0, %cst {dimension_numbers = #tpu.dot_dimension_numbers<[1], [0], [0], [1], [0, 0, 1, 1], [], []>} : vector<16x32xf32>, vector<32x2xf32>, vector<16x2xf32> -> vector<16x2xf32>
    %4 = vector.broadcast %1 : vector<16x1xf32> to vector<16x2xf32>
    %5 = arith.addf %3, %4 : vector<16x2xf32>
    %cst_5 = arith.constant 0.000000e+00 : f32
    %6 = vector.broadcast %cst_5 : f32 to vector<16x2xf32>
    %7 = arith.maximumf %5, %6 : vector<16x2xf32>
    %c16 = arith.constant 16 : index
    %c0_6 = arith.constant 0 : index
    %8 = vector.load %arg3[%c16, %c0_6] : memref<72x32xf32, #tpu.memory_space<vmem>>, vector<2x8xf32>
    %cst_7 = arith.constant dense<0.000000e+00> : vector<16x8xf32>
    %9 = tpu.matmul %7, %8, %cst_7 {dimension_numbers = #tpu.dot_dimension_numbers<[1], [0], [0], [1], [0, 0, 1, 1], [], []>} : vector<16x2xf32>, vector<2x8xf32>, vector<16x8xf32> -> vector<16x8xf32>
    %c24 = arith.constant 24 : index
    %c0_8 = arith.constant 0 : index
    %10 = vector.load %arg3[%c24, %c0_8] : memref<72x32xf32, #tpu.memory_space<vmem>>, vector<16x8xf32>
    %11 = arith.mulf %9, %10 : vector<16x8xf32>
    %c0_9 = arith.constant 0 : index
    %c0_10 = arith.constant 0 : index
    %12 = vector.load %arg2[%c0_9, %c0_10] : memref<32x8xf32, #tpu.memory_space<vmem>>, vector<16x8xf32>
    %c16_11 = arith.constant 16 : index
    %c0_12 = arith.constant 0 : index
    %13 = vector.load %arg2[%c16_11, %c0_12] : memref<32x8xf32, #tpu.memory_space<vmem>>, vector<16x8xf32>
    %c40 = arith.constant 40 : index
    %c0_13 = arith.constant 0 : index
    %14 = vector.load %arg3[%c40, %c0_13] : memref<72x32xf32, #tpu.memory_space<vmem>>, vector<16x16xf32>
    %cst_14 = arith.constant dense<0.000000e+00> : vector<16x8xf32>
    %15 = tpu.matmul %14, %11, %cst_14 {dimension_numbers = #tpu.dot_dimension_numbers<[1], [0], [0], [1], [0, 0, 1, 1], [], []>} : vector<16x16xf32>, vector<16x8xf32>, vector<16x8xf32> -> vector<16x8xf32>
    %c56 = arith.constant 56 : index
    %c0_15 = arith.constant 0 : index
    %16 = vector.load %arg3[%c56, %c0_15] : memref<72x32xf32, #tpu.memory_space<vmem>>, vector<16x16xf32>
    %cst_16 = arith.constant 0.000000e+00 : f32
    %17 = vector.broadcast %cst_16 : f32 to vector<16x8xf32>
    %18 = arith.maximumf %12, %17 : vector<16x8xf32>
    %cst_17 = arith.constant dense<0.000000e+00> : vector<16x8xf32>
    %19 = tpu.matmul %16, %18, %cst_17 {dimension_numbers = #tpu.dot_dimension_numbers<[1], [0], [0], [1], [0, 0, 1, 1], [], []>} : vector<16x16xf32>, vector<16x8xf32>, vector<16x8xf32> -> vector<16x8xf32>
    %20 = arith.addf %15, %19 : vector<16x8xf32>
    %c0_18 = arith.constant 0 : index
    %c1 = arith.constant 1 : index
    %21 = vector.load %arg4[%c0_18, %c1] : memref<16x16xf32, #tpu.memory_space<vmem>>, vector<16x1xf32>
    %22 = vector.broadcast %21 : vector<16x1xf32> to vector<16x8xf32>
    %23 = arith.addf %20, %22 : vector<16x8xf32>
    %cst_19 = arith.constant 0.000000e+00 : f32
    %24 = vector.broadcast %cst_19 : f32 to vector<16x8xf32>
    %25 = arith.maximumf %23, %24 : vector<16x8xf32>
    %c0_20 = arith.constant 0 : index
    %c0_21 = arith.constant 0 : index
    %26 = vector.load %arg6[%c0_20, %c0_21] : memref<32x512xf32, #tpu.memory_space<vmem>>, vector<8x8xf32>
    %27 = arith.addf %25, %12 : vector<16x8xf32>
    %c0_22 = arith.constant 0 : index
    %c0_23 = arith.constant 0 : index
    %28 = vector.load %arg5[%c0_22, %c0_23] : memref<112x144xbf16, #tpu.memory_space<vmem>>, vector<16x144xbf16>
    %c0_24 = arith.constant 0 : index
    %c2 = arith.constant 2 : index
    %29 = vector.load %arg4[%c0_24, %c2] : memref<16x16xf32, #tpu.memory_space<vmem>>, vector<16x1xf32>
    %30 = vector.extract_strided_slice %27 {offsets = [0, 5], sizes = [16, 3], strides = [1, 1]} : vector<16x8xf32> to vector<16x3xf32>
    %31 = vector.extract_strided_slice %27 {offsets = [0, 0], sizes = [16, 5], strides = [1, 1]} : vector<16x8xf32> to vector<16x5xf32>
    %32 = tpu.concatenate %30, %31 in 1 : vector<16x3xf32>, vector<16x5xf32> -> vector<16x8xf32>
    %33 = vector.extract_strided_slice %26 {offsets = [0, 0], sizes = [1, 8], strides = [1, 1]} : vector<8x8xf32> to vector<1x8xf32>
    %34 = vector.broadcast %33 : vector<1x8xf32> to vector<16x8xf32>
    %35 = arith.mulf %32, %34 : vector<16x8xf32>
    %36 = vector.extract_strided_slice %27 {offsets = [0, 6], sizes = [16, 2], strides = [1, 1]} : vector<16x8xf32> to vector<16x2xf32>
    %37 = vector.extract_strided_slice %27 {offsets = [0, 0], sizes = [16, 6], strides = [1, 1]} : vector<16x8xf32> to vector<16x6xf32>
    %38 = tpu.concatenate %36, %37 in 1 : vector<16x2xf32>, vector<16x6xf32> -> vector<16x8xf32>
    %39 = vector.extract_strided_slice %26 {offsets = [1, 0], sizes = [1, 8], strides = [1, 1]} : vector<8x8xf32> to vector<1x8xf32>
    %40 = vector.broadcast %39 : vector<1x8xf32> to vector<16x8xf32>
    %41 = arith.mulf %38, %40 : vector<16x8xf32>
    %42 = vector.extract_strided_slice %27 {offsets = [0, 7], sizes = [16, 1], strides = [1, 1]} : vector<16x8xf32> to vector<16x1xf32>
    %43 = vector.extract_strided_slice %27 {offsets = [0, 0], sizes = [16, 7], strides = [1, 1]} : vector<16x8xf32> to vector<16x7xf32>
    %44 = tpu.concatenate %42, %43 in 1 : vector<16x1xf32>, vector<16x7xf32> -> vector<16x8xf32>
    %45 = vector.extract_strided_slice %26 {offsets = [2, 0], sizes = [1, 8], strides = [1, 1]} : vector<8x8xf32> to vector<1x8xf32>
    %46 = vector.broadcast %45 : vector<1x8xf32> to vector<16x8xf32>
    %47 = arith.mulf %44, %46 : vector<16x8xf32>
    %48 = vector.extract_strided_slice %27 {offsets = [0, 7], sizes = [16, 1], strides = [1, 1]} : vector<16x8xf32> to vector<16x1xf32>
    %49 = vector.extract_strided_slice %27 {offsets = [0, 0], sizes = [16, 7], strides = [1, 1]} : vector<16x8xf32> to vector<16x7xf32>
    %50 = tpu.concatenate %48, %49 in 1 : vector<16x1xf32>, vector<16x7xf32> -> vector<16x8xf32>
    %51 = vector.extract_strided_slice %26 {offsets = [3, 0], sizes = [1, 8], strides = [1, 1]} : vector<8x8xf32> to vector<1x8xf32>
    %52 = vector.broadcast %51 : vector<1x8xf32> to vector<16x8xf32>
    %53 = arith.mulf %50, %52 : vector<16x8xf32>
    %54 = vector.extract_strided_slice %27 {offsets = [0, 1], sizes = [16, 7], strides = [1, 1]} : vector<16x8xf32> to vector<16x7xf32>
    %55 = vector.extract_strided_slice %27 {offsets = [0, 0], sizes = [16, 1], strides = [1, 1]} : vector<16x8xf32> to vector<16x1xf32>
    %56 = tpu.concatenate %54, %55 in 1 : vector<16x7xf32>, vector<16x1xf32> -> vector<16x8xf32>
    %57 = vector.extract_strided_slice %26 {offsets = [4, 0], sizes = [1, 8], strides = [1, 1]} : vector<8x8xf32> to vector<1x8xf32>
    %58 = vector.broadcast %57 : vector<1x8xf32> to vector<16x8xf32>
    %59 = arith.mulf %56, %58 : vector<16x8xf32>
    %60 = vector.extract_strided_slice %27 {offsets = [0, 1], sizes = [16, 7], strides = [1, 1]} : vector<16x8xf32> to vector<16x7xf32>
    %61 = vector.extract_strided_slice %27 {offsets = [0, 0], sizes = [16, 1], strides = [1, 1]} : vector<16x8xf32> to vector<16x1xf32>
    %62 = tpu.concatenate %60, %61 in 1 : vector<16x7xf32>, vector<16x1xf32> -> vector<16x8xf32>
    %63 = vector.extract_strided_slice %26 {offsets = [5, 0], sizes = [1, 8], strides = [1, 1]} : vector<8x8xf32> to vector<1x8xf32>
    %64 = vector.broadcast %63 : vector<1x8xf32> to vector<16x8xf32>
    %65 = arith.mulf %62, %64 : vector<16x8xf32>
    %66 = vector.extract_strided_slice %27 {offsets = [0, 2], sizes = [16, 6], strides = [1, 1]} : vector<16x8xf32> to vector<16x6xf32>
    %67 = vector.extract_strided_slice %27 {offsets = [0, 0], sizes = [16, 2], strides = [1, 1]} : vector<16x8xf32> to vector<16x2xf32>
    %68 = tpu.concatenate %66, %67 in 1 : vector<16x6xf32>, vector<16x2xf32> -> vector<16x8xf32>
    %69 = vector.extract_strided_slice %26 {offsets = [6, 0], sizes = [1, 8], strides = [1, 1]} : vector<8x8xf32> to vector<1x8xf32>
    %70 = vector.broadcast %69 : vector<1x8xf32> to vector<16x8xf32>
    %71 = arith.mulf %68, %70 : vector<16x8xf32>
    %72 = vector.extract_strided_slice %27 {offsets = [0, 3], sizes = [16, 5], strides = [1, 1]} : vector<16x8xf32> to vector<16x5xf32>
    %73 = vector.extract_strided_slice %27 {offsets = [0, 0], sizes = [16, 3], strides = [1, 1]} : vector<16x8xf32> to vector<16x3xf32>
    %74 = tpu.concatenate %72, %73 in 1 : vector<16x5xf32>, vector<16x3xf32> -> vector<16x8xf32>
    %75 = vector.extract_strided_slice %26 {offsets = [7, 0], sizes = [1, 8], strides = [1, 1]} : vector<8x8xf32> to vector<1x8xf32>
    %76 = vector.broadcast %75 : vector<1x8xf32> to vector<16x8xf32>
    %77 = arith.mulf %74, %76 : vector<16x8xf32>
    %78 = tpu.concatenate %35, %41, %47, %53, %27, %59, %65, %71, %77 in 0 : vector<16x8xf32>, vector<16x8xf32>, vector<16x8xf32>, vector<16x8xf32>, vector<16x8xf32>, vector<16x8xf32>, vector<16x8xf32>, vector<16x8xf32>, vector<16x8xf32> -> vector<144x8xf32>
    %79 = arith.truncf %78 : vector<144x8xf32> to vector<144x8xbf16>
    %cst_25 = arith.constant dense<0.000000e+00> : vector<16x8xf32>
    %80 = tpu.matmul %28, %79, %cst_25 {dimension_numbers = #tpu.dot_dimension_numbers<[1], [0], [0], [1], [0, 0, 1, 1], [], []>} : vector<16x144xbf16>, vector<144x8xbf16>, vector<16x8xf32> -> vector<16x8xf32>
    %81 = vector.broadcast %29 : vector<16x1xf32> to vector<16x8xf32>
    %82 = arith.addf %80, %81 : vector<16x8xf32>
    %cst_26 = arith.constant 0.000000e+00 : f32
    %83 = vector.broadcast %cst_26 : f32 to vector<16x8xf32>
    %84 = arith.maximumf %82, %83 : vector<16x8xf32>
    %c16_27 = arith.constant 16 : index
    %c0_28 = arith.constant 0 : index
    %85 = vector.load %arg5[%c16_27, %c0_28] : memref<112x144xbf16, #tpu.memory_space<vmem>>, vector<16x144xbf16>
    %c0_29 = arith.constant 0 : index
    %c3 = arith.constant 3 : index
    %86 = vector.load %arg4[%c0_29, %c3] : memref<16x16xf32, #tpu.memory_space<vmem>>, vector<16x1xf32>
    %87 = vector.extract_strided_slice %84 {offsets = [0, 5], sizes = [16, 3], strides = [1, 1]} : vector<16x8xf32> to vector<16x3xf32>
    %88 = vector.extract_strided_slice %84 {offsets = [0, 0], sizes = [16, 5], strides = [1, 1]} : vector<16x8xf32> to vector<16x5xf32>
    %89 = tpu.concatenate %87, %88 in 1 : vector<16x3xf32>, vector<16x5xf32> -> vector<16x8xf32>
    %90 = vector.extract_strided_slice %26 {offsets = [0, 0], sizes = [1, 8], strides = [1, 1]} : vector<8x8xf32> to vector<1x8xf32>
    %91 = vector.broadcast %90 : vector<1x8xf32> to vector<16x8xf32>
    %92 = arith.mulf %89, %91 : vector<16x8xf32>
    %93 = vector.extract_strided_slice %84 {offsets = [0, 6], sizes = [16, 2], strides = [1, 1]} : vector<16x8xf32> to vector<16x2xf32>
    %94 = vector.extract_strided_slice %84 {offsets = [0, 0], sizes = [16, 6], strides = [1, 1]} : vector<16x8xf32> to vector<16x6xf32>
    %95 = tpu.concatenate %93, %94 in 1 : vector<16x2xf32>, vector<16x6xf32> -> vector<16x8xf32>
    %96 = vector.extract_strided_slice %26 {offsets = [1, 0], sizes = [1, 8], strides = [1, 1]} : vector<8x8xf32> to vector<1x8xf32>
    %97 = vector.broadcast %96 : vector<1x8xf32> to vector<16x8xf32>
    %98 = arith.mulf %95, %97 : vector<16x8xf32>
    %99 = vector.extract_strided_slice %84 {offsets = [0, 7], sizes = [16, 1], strides = [1, 1]} : vector<16x8xf32> to vector<16x1xf32>
    %100 = vector.extract_strided_slice %84 {offsets = [0, 0], sizes = [16, 7], strides = [1, 1]} : vector<16x8xf32> to vector<16x7xf32>
    %101 = tpu.concatenate %99, %100 in 1 : vector<16x1xf32>, vector<16x7xf32> -> vector<16x8xf32>
    %102 = vector.extract_strided_slice %26 {offsets = [2, 0], sizes = [1, 8], strides = [1, 1]} : vector<8x8xf32> to vector<1x8xf32>
    %103 = vector.broadcast %102 : vector<1x8xf32> to vector<16x8xf32>
    %104 = arith.mulf %101, %103 : vector<16x8xf32>
    %105 = vector.extract_strided_slice %84 {offsets = [0, 7], sizes = [16, 1], strides = [1, 1]} : vector<16x8xf32> to vector<16x1xf32>
    %106 = vector.extract_strided_slice %84 {offsets = [0, 0], sizes = [16, 7], strides = [1, 1]} : vector<16x8xf32> to vector<16x7xf32>
    %107 = tpu.concatenate %105, %106 in 1 : vector<16x1xf32>, vector<16x7xf32> -> vector<16x8xf32>
    %108 = vector.extract_strided_slice %26 {offsets = [3, 0], sizes = [1, 8], strides = [1, 1]} : vector<8x8xf32> to vector<1x8xf32>
    %109 = vector.broadcast %108 : vector<1x8xf32> to vector<16x8xf32>
    %110 = arith.mulf %107, %109 : vector<16x8xf32>
    %111 = vector.extract_strided_slice %84 {offsets = [0, 1], sizes = [16, 7], strides = [1, 1]} : vector<16x8xf32> to vector<16x7xf32>
    %112 = vector.extract_strided_slice %84 {offsets = [0, 0], sizes = [16, 1], strides = [1, 1]} : vector<16x8xf32> to vector<16x1xf32>
    %113 = tpu.concatenate %111, %112 in 1 : vector<16x7xf32>, vector<16x1xf32> -> vector<16x8xf32>
    %114 = vector.extract_strided_slice %26 {offsets = [4, 0], sizes = [1, 8], strides = [1, 1]} : vector<8x8xf32> to vector<1x8xf32>
    %115 = vector.broadcast %114 : vector<1x8xf32> to vector<16x8xf32>
    %116 = arith.mulf %113, %115 : vector<16x8xf32>
    %117 = vector.extract_strided_slice %84 {offsets = [0, 1], sizes = [16, 7], strides = [1, 1]} : vector<16x8xf32> to vector<16x7xf32>
    %118 = vector.extract_strided_slice %84 {offsets = [0, 0], sizes = [16, 1], strides = [1, 1]} : vector<16x8xf32> to vector<16x1xf32>
    %119 = tpu.concatenate %117, %118 in 1 : vector<16x7xf32>, vector<16x1xf32> -> vector<16x8xf32>
    %120 = vector.extract_strided_slice %26 {offsets = [5, 0], sizes = [1, 8], strides = [1, 1]} : vector<8x8xf32> to vector<1x8xf32>
    %121 = vector.broadcast %120 : vector<1x8xf32> to vector<16x8xf32>
    %122 = arith.mulf %119, %121 : vector<16x8xf32>
    %123 = vector.extract_strided_slice %84 {offsets = [0, 2], sizes = [16, 6], strides = [1, 1]} : vector<16x8xf32> to vector<16x6xf32>
    %124 = vector.extract_strided_slice %84 {offsets = [0, 0], sizes = [16, 2], strides = [1, 1]} : vector<16x8xf32> to vector<16x2xf32>
    %125 = tpu.concatenate %123, %124 in 1 : vector<16x6xf32>, vector<16x2xf32> -> vector<16x8xf32>
    %126 = vector.extract_strided_slice %26 {offsets = [6, 0], sizes = [1, 8], strides = [1, 1]} : vector<8x8xf32> to vector<1x8xf32>
    %127 = vector.broadcast %126 : vector<1x8xf32> to vector<16x8xf32>
    %128 = arith.mulf %125, %127 : vector<16x8xf32>
    %129 = vector.extract_strided_slice %84 {offsets = [0, 3], sizes = [16, 5], strides = [1, 1]} : vector<16x8xf32> to vector<16x5xf32>
    %130 = vector.extract_strided_slice %84 {offsets = [0, 0], sizes = [16, 3], strides = [1, 1]} : vector<16x8xf32> to vector<16x3xf32>
    %131 = tpu.concatenate %129, %130 in 1 : vector<16x5xf32>, vector<16x3xf32> -> vector<16x8xf32>
    %132 = vector.extract_strided_slice %26 {offsets = [7, 0], sizes = [1, 8], strides = [1, 1]} : vector<8x8xf32> to vector<1x8xf32>
    %133 = vector.broadcast %132 : vector<1x8xf32> to vector<16x8xf32>
    %134 = arith.mulf %131, %133 : vector<16x8xf32>
    %135 = tpu.concatenate %92, %98, %104, %110, %84, %116, %122, %128, %134 in 0 : vector<16x8xf32>, vector<16x8xf32>, vector<16x8xf32>, vector<16x8xf32>, vector<16x8xf32>, vector<16x8xf32>, vector<16x8xf32>, vector<16x8xf32>, vector<16x8xf32> -> vector<144x8xf32>
    %136 = arith.truncf %135 : vector<144x8xf32> to vector<144x8xbf16>
    %cst_30 = arith.constant dense<0.000000e+00> : vector<16x8xf32>
    %137 = tpu.matmul %85, %136, %cst_30 {dimension_numbers = #tpu.dot_dimension_numbers<[1], [0], [0], [1], [0, 0, 1, 1], [], []>} : vector<16x144xbf16>, vector<144x8xbf16>, vector<16x8xf32> -> vector<16x8xf32>
    %138 = vector.broadcast %86 : vector<16x1xf32> to vector<16x8xf32>
    %139 = arith.addf %137, %138 : vector<16x8xf32>
    %140 = arith.addf %139, %27 : vector<16x8xf32>
    %cst_31 = arith.constant 0.000000e+00 : f32
    %141 = vector.broadcast %cst_31 : f32 to vector<16x8xf32>
    %142 = arith.maximumf %140, %141 : vector<16x8xf32>
    %143 = arith.addf %142, %13 : vector<16x8xf32>
    %c32 = arith.constant 32 : index
    %c0_32 = arith.constant 0 : index
    %144 = vector.load %arg5[%c32, %c0_32] : memref<112x144xbf16, #tpu.memory_space<vmem>>, vector<16x144xbf16>
    %c0_33 = arith.constant 0 : index
    %c4 = arith.constant 4 : index
    %145 = vector.load %arg4[%c0_33, %c4] : memref<16x16xf32, #tpu.memory_space<vmem>>, vector<16x1xf32>
    %146 = vector.extract_strided_slice %143 {offsets = [0, 5], sizes = [16, 3], strides = [1, 1]} : vector<16x8xf32> to vector<16x3xf32>
    %147 = vector.extract_strided_slice %143 {offsets = [0, 0], sizes = [16, 5], strides = [1, 1]} : vector<16x8xf32> to vector<16x5xf32>
    %148 = tpu.concatenate %146, %147 in 1 : vector<16x3xf32>, vector<16x5xf32> -> vector<16x8xf32>
    %149 = vector.extract_strided_slice %26 {offsets = [0, 0], sizes = [1, 8], strides = [1, 1]} : vector<8x8xf32> to vector<1x8xf32>
    %150 = vector.broadcast %149 : vector<1x8xf32> to vector<16x8xf32>
    %151 = arith.mulf %148, %150 : vector<16x8xf32>
    %152 = vector.extract_strided_slice %143 {offsets = [0, 6], sizes = [16, 2], strides = [1, 1]} : vector<16x8xf32> to vector<16x2xf32>
    %153 = vector.extract_strided_slice %143 {offsets = [0, 0], sizes = [16, 6], strides = [1, 1]} : vector<16x8xf32> to vector<16x6xf32>
    %154 = tpu.concatenate %152, %153 in 1 : vector<16x2xf32>, vector<16x6xf32> -> vector<16x8xf32>
    %155 = vector.extract_strided_slice %26 {offsets = [1, 0], sizes = [1, 8], strides = [1, 1]} : vector<8x8xf32> to vector<1x8xf32>
    %156 = vector.broadcast %155 : vector<1x8xf32> to vector<16x8xf32>
    %157 = arith.mulf %154, %156 : vector<16x8xf32>
    %158 = vector.extract_strided_slice %143 {offsets = [0, 7], sizes = [16, 1], strides = [1, 1]} : vector<16x8xf32> to vector<16x1xf32>
    %159 = vector.extract_strided_slice %143 {offsets = [0, 0], sizes = [16, 7], strides = [1, 1]} : vector<16x8xf32> to vector<16x7xf32>
    %160 = tpu.concatenate %158, %159 in 1 : vector<16x1xf32>, vector<16x7xf32> -> vector<16x8xf32>
    %161 = vector.extract_strided_slice %26 {offsets = [2, 0], sizes = [1, 8], strides = [1, 1]} : vector<8x8xf32> to vector<1x8xf32>
    %162 = vector.broadcast %161 : vector<1x8xf32> to vector<16x8xf32>
    %163 = arith.mulf %160, %162 : vector<16x8xf32>
    %164 = vector.extract_strided_slice %143 {offsets = [0, 7], sizes = [16, 1], strides = [1, 1]} : vector<16x8xf32> to vector<16x1xf32>
    %165 = vector.extract_strided_slice %143 {offsets = [0, 0], sizes = [16, 7], strides = [1, 1]} : vector<16x8xf32> to vector<16x7xf32>
    %166 = tpu.concatenate %164, %165 in 1 : vector<16x1xf32>, vector<16x7xf32> -> vector<16x8xf32>
    %167 = vector.extract_strided_slice %26 {offsets = [3, 0], sizes = [1, 8], strides = [1, 1]} : vector<8x8xf32> to vector<1x8xf32>
    %168 = vector.broadcast %167 : vector<1x8xf32> to vector<16x8xf32>
    %169 = arith.mulf %166, %168 : vector<16x8xf32>
    %170 = vector.extract_strided_slice %143 {offsets = [0, 1], sizes = [16, 7], strides = [1, 1]} : vector<16x8xf32> to vector<16x7xf32>
    %171 = vector.extract_strided_slice %143 {offsets = [0, 0], sizes = [16, 1], strides = [1, 1]} : vector<16x8xf32> to vector<16x1xf32>
    %172 = tpu.concatenate %170, %171 in 1 : vector<16x7xf32>, vector<16x1xf32> -> vector<16x8xf32>
    %173 = vector.extract_strided_slice %26 {offsets = [4, 0], sizes = [1, 8], strides = [1, 1]} : vector<8x8xf32> to vector<1x8xf32>
    %174 = vector.broadcast %173 : vector<1x8xf32> to vector<16x8xf32>
    %175 = arith.mulf %172, %174 : vector<16x8xf32>
    %176 = vector.extract_strided_slice %143 {offsets = [0, 1], sizes = [16, 7], strides = [1, 1]} : vector<16x8xf32> to vector<16x7xf32>
    %177 = vector.extract_strided_slice %143 {offsets = [0, 0], sizes = [16, 1], strides = [1, 1]} : vector<16x8xf32> to vector<16x1xf32>
    %178 = tpu.concatenate %176, %177 in 1 : vector<16x7xf32>, vector<16x1xf32> -> vector<16x8xf32>
    %179 = vector.extract_strided_slice %26 {offsets = [5, 0], sizes = [1, 8], strides = [1, 1]} : vector<8x8xf32> to vector<1x8xf32>
    %180 = vector.broadcast %179 : vector<1x8xf32> to vector<16x8xf32>
    %181 = arith.mulf %178, %180 : vector<16x8xf32>
    %182 = vector.extract_strided_slice %143 {offsets = [0, 2], sizes = [16, 6], strides = [1, 1]} : vector<16x8xf32> to vector<16x6xf32>
    %183 = vector.extract_strided_slice %143 {offsets = [0, 0], sizes = [16, 2], strides = [1, 1]} : vector<16x8xf32> to vector<16x2xf32>
    %184 = tpu.concatenate %182, %183 in 1 : vector<16x6xf32>, vector<16x2xf32> -> vector<16x8xf32>
    %185 = vector.extract_strided_slice %26 {offsets = [6, 0], sizes = [1, 8], strides = [1, 1]} : vector<8x8xf32> to vector<1x8xf32>
    %186 = vector.broadcast %185 : vector<1x8xf32> to vector<16x8xf32>
    %187 = arith.mulf %184, %186 : vector<16x8xf32>
    %188 = vector.extract_strided_slice %143 {offsets = [0, 3], sizes = [16, 5], strides = [1, 1]} : vector<16x8xf32> to vector<16x5xf32>
    %189 = vector.extract_strided_slice %143 {offsets = [0, 0], sizes = [16, 3], strides = [1, 1]} : vector<16x8xf32> to vector<16x3xf32>
    %190 = tpu.concatenate %188, %189 in 1 : vector<16x5xf32>, vector<16x3xf32> -> vector<16x8xf32>
    %191 = vector.extract_strided_slice %26 {offsets = [7, 0], sizes = [1, 8], strides = [1, 1]} : vector<8x8xf32> to vector<1x8xf32>
    %192 = vector.broadcast %191 : vector<1x8xf32> to vector<16x8xf32>
    %193 = arith.mulf %190, %192 : vector<16x8xf32>
    %194 = tpu.concatenate %151, %157, %163, %169, %143, %175, %181, %187, %193 in 0 : vector<16x8xf32>, vector<16x8xf32>, vector<16x8xf32>, vector<16x8xf32>, vector<16x8xf32>, vector<16x8xf32>, vector<16x8xf32>, vector<16x8xf32>, vector<16x8xf32> -> vector<144x8xf32>
    %195 = arith.truncf %194 : vector<144x8xf32> to vector<144x8xbf16>
    %cst_34 = arith.constant dense<0.000000e+00> : vector<16x8xf32>
    %196 = tpu.matmul %144, %195, %cst_34 {dimension_numbers = #tpu.dot_dimension_numbers<[1], [0], [0], [1], [0, 0, 1, 1], [], []>} : vector<16x144xbf16>, vector<144x8xbf16>, vector<16x8xf32> -> vector<16x8xf32>
    %197 = vector.broadcast %145 : vector<16x1xf32> to vector<16x8xf32>
    %198 = arith.addf %196, %197 : vector<16x8xf32>
    %cst_35 = arith.constant 0.000000e+00 : f32
    %199 = vector.broadcast %cst_35 : f32 to vector<16x8xf32>
    %200 = arith.maximumf %198, %199 : vector<16x8xf32>
    %c48 = arith.constant 48 : index
    %c0_36 = arith.constant 0 : index
    %201 = vector.load %arg5[%c48, %c0_36] : memref<112x144xbf16, #tpu.memory_space<vmem>>, vector<16x144xbf16>
    %c0_37 = arith.constant 0 : index
    %c5 = arith.constant 5 : index
    %202 = vector.load %arg4[%c0_37, %c5] : memref<16x16xf32, #tpu.memory_space<vmem>>, vector<16x1xf32>
    %203 = vector.extract_strided_slice %200 {offsets = [0, 5], sizes = [16, 3], strides = [1, 1]} : vector<16x8xf32> to vector<16x3xf32>
    %204 = vector.extract_strided_slice %200 {offsets = [0, 0], sizes = [16, 5], strides = [1, 1]} : vector<16x8xf32> to vector<16x5xf32>
    %205 = tpu.concatenate %203, %204 in 1 : vector<16x3xf32>, vector<16x5xf32> -> vector<16x8xf32>
    %206 = vector.extract_strided_slice %26 {offsets = [0, 0], sizes = [1, 8], strides = [1, 1]} : vector<8x8xf32> to vector<1x8xf32>
    %207 = vector.broadcast %206 : vector<1x8xf32> to vector<16x8xf32>
    %208 = arith.mulf %205, %207 : vector<16x8xf32>
    %209 = vector.extract_strided_slice %200 {offsets = [0, 6], sizes = [16, 2], strides = [1, 1]} : vector<16x8xf32> to vector<16x2xf32>
    %210 = vector.extract_strided_slice %200 {offsets = [0, 0], sizes = [16, 6], strides = [1, 1]} : vector<16x8xf32> to vector<16x6xf32>
    %211 = tpu.concatenate %209, %210 in 1 : vector<16x2xf32>, vector<16x6xf32> -> vector<16x8xf32>
    %212 = vector.extract_strided_slice %26 {offsets = [1, 0], sizes = [1, 8], strides = [1, 1]} : vector<8x8xf32> to vector<1x8xf32>
    %213 = vector.broadcast %212 : vector<1x8xf32> to vector<16x8xf32>
    %214 = arith.mulf %211, %213 : vector<16x8xf32>
    %215 = vector.extract_strided_slice %200 {offsets = [0, 7], sizes = [16, 1], strides = [1, 1]} : vector<16x8xf32> to vector<16x1xf32>
    %216 = vector.extract_strided_slice %200 {offsets = [0, 0], sizes = [16, 7], strides = [1, 1]} : vector<16x8xf32> to vector<16x7xf32>
    %217 = tpu.concatenate %215, %216 in 1 : vector<16x1xf32>, vector<16x7xf32> -> vector<16x8xf32>
    %218 = vector.extract_strided_slice %26 {offsets = [2, 0], sizes = [1, 8], strides = [1, 1]} : vector<8x8xf32> to vector<1x8xf32>
    %219 = vector.broadcast %218 : vector<1x8xf32> to vector<16x8xf32>
    %220 = arith.mulf %217, %219 : vector<16x8xf32>
    %221 = vector.extract_strided_slice %200 {offsets = [0, 7], sizes = [16, 1], strides = [1, 1]} : vector<16x8xf32> to vector<16x1xf32>
    %222 = vector.extract_strided_slice %200 {offsets = [0, 0], sizes = [16, 7], strides = [1, 1]} : vector<16x8xf32> to vector<16x7xf32>
    %223 = tpu.concatenate %221, %222 in 1 : vector<16x1xf32>, vector<16x7xf32> -> vector<16x8xf32>
    %224 = vector.extract_strided_slice %26 {offsets = [3, 0], sizes = [1, 8], strides = [1, 1]} : vector<8x8xf32> to vector<1x8xf32>
    %225 = vector.broadcast %224 : vector<1x8xf32> to vector<16x8xf32>
    %226 = arith.mulf %223, %225 : vector<16x8xf32>
    %227 = vector.extract_strided_slice %200 {offsets = [0, 1], sizes = [16, 7], strides = [1, 1]} : vector<16x8xf32> to vector<16x7xf32>
    %228 = vector.extract_strided_slice %200 {offsets = [0, 0], sizes = [16, 1], strides = [1, 1]} : vector<16x8xf32> to vector<16x1xf32>
    %229 = tpu.concatenate %227, %228 in 1 : vector<16x7xf32>, vector<16x1xf32> -> vector<16x8xf32>
    %230 = vector.extract_strided_slice %26 {offsets = [4, 0], sizes = [1, 8], strides = [1, 1]} : vector<8x8xf32> to vector<1x8xf32>
    %231 = vector.broadcast %230 : vector<1x8xf32> to vector<16x8xf32>
    %232 = arith.mulf %229, %231 : vector<16x8xf32>
    %233 = vector.extract_strided_slice %200 {offsets = [0, 1], sizes = [16, 7], strides = [1, 1]} : vector<16x8xf32> to vector<16x7xf32>
    %234 = vector.extract_strided_slice %200 {offsets = [0, 0], sizes = [16, 1], strides = [1, 1]} : vector<16x8xf32> to vector<16x1xf32>
    %235 = tpu.concatenate %233, %234 in 1 : vector<16x7xf32>, vector<16x1xf32> -> vector<16x8xf32>
    %236 = vector.extract_strided_slice %26 {offsets = [5, 0], sizes = [1, 8], strides = [1, 1]} : vector<8x8xf32> to vector<1x8xf32>
    %237 = vector.broadcast %236 : vector<1x8xf32> to vector<16x8xf32>
    %238 = arith.mulf %235, %237 : vector<16x8xf32>
    %239 = vector.extract_strided_slice %200 {offsets = [0, 2], sizes = [16, 6], strides = [1, 1]} : vector<16x8xf32> to vector<16x6xf32>
    %240 = vector.extract_strided_slice %200 {offsets = [0, 0], sizes = [16, 2], strides = [1, 1]} : vector<16x8xf32> to vector<16x2xf32>
    %241 = tpu.concatenate %239, %240 in 1 : vector<16x6xf32>, vector<16x2xf32> -> vector<16x8xf32>
    %242 = vector.extract_strided_slice %26 {offsets = [6, 0], sizes = [1, 8], strides = [1, 1]} : vector<8x8xf32> to vector<1x8xf32>
    %243 = vector.broadcast %242 : vector<1x8xf32> to vector<16x8xf32>
    %244 = arith.mulf %241, %243 : vector<16x8xf32>
    %245 = vector.extract_strided_slice %200 {offsets = [0, 3], sizes = [16, 5], strides = [1, 1]} : vector<16x8xf32> to vector<16x5xf32>
    %246 = vector.extract_strided_slice %200 {offsets = [0, 0], sizes = [16, 3], strides = [1, 1]} : vector<16x8xf32> to vector<16x3xf32>
    %247 = tpu.concatenate %245, %246 in 1 : vector<16x5xf32>, vector<16x3xf32> -> vector<16x8xf32>
    %248 = vector.extract_strided_slice %26 {offsets = [7, 0], sizes = [1, 8], strides = [1, 1]} : vector<8x8xf32> to vector<1x8xf32>
    %249 = vector.broadcast %248 : vector<1x8xf32> to vector<16x8xf32>
    %250 = arith.mulf %247, %249 : vector<16x8xf32>
    %251 = tpu.concatenate %208, %214, %220, %226, %200, %232, %238, %244, %250 in 0 : vector<16x8xf32>, vector<16x8xf32>, vector<16x8xf32>, vector<16x8xf32>, vector<16x8xf32>, vector<16x8xf32>, vector<16x8xf32>, vector<16x8xf32>, vector<16x8xf32> -> vector<144x8xf32>
    %252 = arith.truncf %251 : vector<144x8xf32> to vector<144x8xbf16>
    %cst_38 = arith.constant dense<0.000000e+00> : vector<16x8xf32>
    %253 = tpu.matmul %201, %252, %cst_38 {dimension_numbers = #tpu.dot_dimension_numbers<[1], [0], [0], [1], [0, 0, 1, 1], [], []>} : vector<16x144xbf16>, vector<144x8xbf16>, vector<16x8xf32> -> vector<16x8xf32>
    %254 = vector.broadcast %202 : vector<16x1xf32> to vector<16x8xf32>
    %255 = arith.addf %253, %254 : vector<16x8xf32>
    %256 = arith.addf %255, %143 : vector<16x8xf32>
    %cst_39 = arith.constant 0.000000e+00 : f32
    %257 = vector.broadcast %cst_39 : f32 to vector<16x8xf32>
    %258 = arith.maximumf %256, %257 : vector<16x8xf32>
    %c0_40 = arith.constant 0 : index
    %c0_41 = arith.constant 0 : index
    %259 = vector.load %arg7[%c0_40, %c0_41] : memref<176x512xbf16, #tpu.memory_space<vmem>>, vector<8x32xbf16>
    %260 = arith.truncf %258 : vector<16x8xf32> to vector<16x8xbf16>
    %cst_42 = arith.constant dense<0.000000e+00> : vector<16x32xf32>
    %261 = tpu.matmul %260, %259, %cst_42 {dimension_numbers = #tpu.dot_dimension_numbers<[1], [0], [0], [1], [0, 0, 1, 1], [], []>} : vector<16x8xbf16>, vector<8x32xbf16>, vector<16x32xf32> -> vector<16x32xf32>
    %c64 = arith.constant 64 : index
    %c0_43 = arith.constant 0 : index
    %262 = vector.load %arg5[%c64, %c0_43] : memref<112x144xbf16, #tpu.memory_space<vmem>>, vector<16x144xbf16>
    %c0_44 = arith.constant 0 : index
    %c6 = arith.constant 6 : index
    %263 = vector.load %arg4[%c0_44, %c6] : memref<16x16xf32, #tpu.memory_space<vmem>>, vector<16x1xf32>
    %c8 = arith.constant 8 : index
    %c0_45 = arith.constant 0 : index
    %264 = vector.load %arg6[%c8, %c0_45] : memref<32x512xf32, #tpu.memory_space<vmem>>, vector<8x32xf32>
    %265 = vector.extract_strided_slice %261 {offsets = [0, 27], sizes = [16, 5], strides = [1, 1]} : vector<16x32xf32> to vector<16x5xf32>
    %266 = vector.extract_strided_slice %261 {offsets = [0, 0], sizes = [16, 27], strides = [1, 1]} : vector<16x32xf32> to vector<16x27xf32>
    %267 = tpu.concatenate %265, %266 in 1 : vector<16x5xf32>, vector<16x27xf32> -> vector<16x32xf32>
    %268 = vector.extract_strided_slice %264 {offsets = [0, 0], sizes = [1, 32], strides = [1, 1]} : vector<8x32xf32> to vector<1x32xf32>
    %269 = vector.broadcast %268 : vector<1x32xf32> to vector<16x32xf32>
    %270 = arith.mulf %267, %269 : vector<16x32xf32>
    %271 = vector.extract_strided_slice %261 {offsets = [0, 28], sizes = [16, 4], strides = [1, 1]} : vector<16x32xf32> to vector<16x4xf32>
    %272 = vector.extract_strided_slice %261 {offsets = [0, 0], sizes = [16, 28], strides = [1, 1]} : vector<16x32xf32> to vector<16x28xf32>
    %273 = tpu.concatenate %271, %272 in 1 : vector<16x4xf32>, vector<16x28xf32> -> vector<16x32xf32>
    %274 = vector.extract_strided_slice %264 {offsets = [1, 0], sizes = [1, 32], strides = [1, 1]} : vector<8x32xf32> to vector<1x32xf32>
    %275 = vector.broadcast %274 : vector<1x32xf32> to vector<16x32xf32>
    %276 = arith.mulf %273, %275 : vector<16x32xf32>
    %277 = vector.extract_strided_slice %261 {offsets = [0, 29], sizes = [16, 3], strides = [1, 1]} : vector<16x32xf32> to vector<16x3xf32>
    %278 = vector.extract_strided_slice %261 {offsets = [0, 0], sizes = [16, 29], strides = [1, 1]} : vector<16x32xf32> to vector<16x29xf32>
    %279 = tpu.concatenate %277, %278 in 1 : vector<16x3xf32>, vector<16x29xf32> -> vector<16x32xf32>
    %280 = vector.extract_strided_slice %264 {offsets = [2, 0], sizes = [1, 32], strides = [1, 1]} : vector<8x32xf32> to vector<1x32xf32>
    %281 = vector.broadcast %280 : vector<1x32xf32> to vector<16x32xf32>
    %282 = arith.mulf %279, %281 : vector<16x32xf32>
    %283 = vector.extract_strided_slice %261 {offsets = [0, 31], sizes = [16, 1], strides = [1, 1]} : vector<16x32xf32> to vector<16x1xf32>
    %284 = vector.extract_strided_slice %261 {offsets = [0, 0], sizes = [16, 31], strides = [1, 1]} : vector<16x32xf32> to vector<16x31xf32>
    %285 = tpu.concatenate %283, %284 in 1 : vector<16x1xf32>, vector<16x31xf32> -> vector<16x32xf32>
    %286 = vector.extract_strided_slice %264 {offsets = [3, 0], sizes = [1, 32], strides = [1, 1]} : vector<8x32xf32> to vector<1x32xf32>
    %287 = vector.broadcast %286 : vector<1x32xf32> to vector<16x32xf32>
    %288 = arith.mulf %285, %287 : vector<16x32xf32>
    %289 = vector.extract_strided_slice %261 {offsets = [0, 1], sizes = [16, 31], strides = [1, 1]} : vector<16x32xf32> to vector<16x31xf32>
    %290 = vector.extract_strided_slice %261 {offsets = [0, 0], sizes = [16, 1], strides = [1, 1]} : vector<16x32xf32> to vector<16x1xf32>
    %291 = tpu.concatenate %289, %290 in 1 : vector<16x31xf32>, vector<16x1xf32> -> vector<16x32xf32>
    %292 = vector.extract_strided_slice %264 {offsets = [4, 0], sizes = [1, 32], strides = [1, 1]} : vector<8x32xf32> to vector<1x32xf32>
    %293 = vector.broadcast %292 : vector<1x32xf32> to vector<16x32xf32>
    %294 = arith.mulf %291, %293 : vector<16x32xf32>
    %295 = vector.extract_strided_slice %261 {offsets = [0, 3], sizes = [16, 29], strides = [1, 1]} : vector<16x32xf32> to vector<16x29xf32>
    %296 = vector.extract_strided_slice %261 {offsets = [0, 0], sizes = [16, 3], strides = [1, 1]} : vector<16x32xf32> to vector<16x3xf32>
    %297 = tpu.concatenate %295, %296 in 1 : vector<16x29xf32>, vector<16x3xf32> -> vector<16x32xf32>
    %298 = vector.extract_strided_slice %264 {offsets = [5, 0], sizes = [1, 32], strides = [1, 1]} : vector<8x32xf32> to vector<1x32xf32>
    %299 = vector.broadcast %298 : vector<1x32xf32> to vector<16x32xf32>
    %300 = arith.mulf %297, %299 : vector<16x32xf32>
    %301 = vector.extract_strided_slice %261 {offsets = [0, 4], sizes = [16, 28], strides = [1, 1]} : vector<16x32xf32> to vector<16x28xf32>
    %302 = vector.extract_strided_slice %261 {offsets = [0, 0], sizes = [16, 4], strides = [1, 1]} : vector<16x32xf32> to vector<16x4xf32>
    %303 = tpu.concatenate %301, %302 in 1 : vector<16x28xf32>, vector<16x4xf32> -> vector<16x32xf32>
    %304 = vector.extract_strided_slice %264 {offsets = [6, 0], sizes = [1, 32], strides = [1, 1]} : vector<8x32xf32> to vector<1x32xf32>
    %305 = vector.broadcast %304 : vector<1x32xf32> to vector<16x32xf32>
    %306 = arith.mulf %303, %305 : vector<16x32xf32>
    %307 = vector.extract_strided_slice %261 {offsets = [0, 5], sizes = [16, 27], strides = [1, 1]} : vector<16x32xf32> to vector<16x27xf32>
    %308 = vector.extract_strided_slice %261 {offsets = [0, 0], sizes = [16, 5], strides = [1, 1]} : vector<16x32xf32> to vector<16x5xf32>
    %309 = tpu.concatenate %307, %308 in 1 : vector<16x27xf32>, vector<16x5xf32> -> vector<16x32xf32>
    %310 = vector.extract_strided_slice %264 {offsets = [7, 0], sizes = [1, 32], strides = [1, 1]} : vector<8x32xf32> to vector<1x32xf32>
    %311 = vector.broadcast %310 : vector<1x32xf32> to vector<16x32xf32>
    %312 = arith.mulf %309, %311 : vector<16x32xf32>
    %313 = tpu.concatenate %270, %276, %282, %288, %261, %294, %300, %306, %312 in 0 : vector<16x32xf32>, vector<16x32xf32>, vector<16x32xf32>, vector<16x32xf32>, vector<16x32xf32>, vector<16x32xf32>, vector<16x32xf32>, vector<16x32xf32>, vector<16x32xf32> -> vector<144x32xf32>
    %314 = arith.truncf %313 : vector<144x32xf32> to vector<144x32xbf16>
    %cst_46 = arith.constant dense<0.000000e+00> : vector<16x32xf32>
    %315 = tpu.matmul %262, %314, %cst_46 {dimension_numbers = #tpu.dot_dimension_numbers<[1], [0], [0], [1], [0, 0, 1, 1], [], []>} : vector<16x144xbf16>, vector<144x32xbf16>, vector<16x32xf32> -> vector<16x32xf32>
    %316 = vector.broadcast %263 : vector<16x1xf32> to vector<16x32xf32>
    %317 = arith.addf %315, %316 : vector<16x32xf32>
    %cst_47 = arith.constant 0.000000e+00 : f32
    %318 = vector.broadcast %cst_47 : f32 to vector<16x32xf32>
    %319 = arith.maximumf %317, %318 : vector<16x32xf32>
    %c16_48 = arith.constant 16 : index
    %c0_49 = arith.constant 0 : index
    %320 = vector.load %arg7[%c16_48, %c0_49] : memref<176x512xbf16, #tpu.memory_space<vmem>>, vector<32x128xbf16>
    %321 = arith.truncf %319 : vector<16x32xf32> to vector<16x32xbf16>
    %cst_50 = arith.constant dense<0.000000e+00> : vector<16x128xf32>
    %322 = tpu.matmul %321, %320, %cst_50 {dimension_numbers = #tpu.dot_dimension_numbers<[1], [0], [0], [1], [0, 0, 1, 1], [], []>} : vector<16x32xbf16>, vector<32x128xbf16>, vector<16x128xf32> -> vector<16x128xf32>
    %c80 = arith.constant 80 : index
    %c0_51 = arith.constant 0 : index
    %323 = vector.load %arg5[%c80, %c0_51] : memref<112x144xbf16, #tpu.memory_space<vmem>>, vector<8x144xbf16>
    %c0_52 = arith.constant 0 : index
    %c7 = arith.constant 7 : index
    %324 = vector.load %arg4[%c0_52, %c7] : memref<16x16xf32, #tpu.memory_space<vmem>>, vector<8x1xf32>
    %c16_53 = arith.constant 16 : index
    %c0_54 = arith.constant 0 : index
    %325 = vector.load %arg6[%c16_53, %c0_54] : memref<32x512xf32, #tpu.memory_space<vmem>>, vector<8x128xf32>
    %326 = vector.extract_strided_slice %322 {offsets = [0, 119], sizes = [16, 9], strides = [1, 1]} : vector<16x128xf32> to vector<16x9xf32>
    %327 = vector.extract_strided_slice %322 {offsets = [0, 0], sizes = [16, 119], strides = [1, 1]} : vector<16x128xf32> to vector<16x119xf32>
    %328 = tpu.concatenate %326, %327 in 1 : vector<16x9xf32>, vector<16x119xf32> -> vector<16x128xf32>
    %329 = vector.extract_strided_slice %325 {offsets = [0, 0], sizes = [1, 128], strides = [1, 1]} : vector<8x128xf32> to vector<1x128xf32>
    %330 = vector.broadcast %329 : vector<1x128xf32> to vector<16x128xf32>
    %331 = arith.mulf %328, %330 : vector<16x128xf32>
    %332 = vector.extract_strided_slice %322 {offsets = [0, 120], sizes = [16, 8], strides = [1, 1]} : vector<16x128xf32> to vector<16x8xf32>
    %333 = vector.extract_strided_slice %322 {offsets = [0, 0], sizes = [16, 120], strides = [1, 1]} : vector<16x128xf32> to vector<16x120xf32>
    %334 = tpu.concatenate %332, %333 in 1 : vector<16x8xf32>, vector<16x120xf32> -> vector<16x128xf32>
    %335 = vector.extract_strided_slice %325 {offsets = [1, 0], sizes = [1, 128], strides = [1, 1]} : vector<8x128xf32> to vector<1x128xf32>
    %336 = vector.broadcast %335 : vector<1x128xf32> to vector<16x128xf32>
    %337 = arith.mulf %334, %336 : vector<16x128xf32>
    %338 = vector.extract_strided_slice %322 {offsets = [0, 121], sizes = [16, 7], strides = [1, 1]} : vector<16x128xf32> to vector<16x7xf32>
    %339 = vector.extract_strided_slice %322 {offsets = [0, 0], sizes = [16, 121], strides = [1, 1]} : vector<16x128xf32> to vector<16x121xf32>
    %340 = tpu.concatenate %338, %339 in 1 : vector<16x7xf32>, vector<16x121xf32> -> vector<16x128xf32>
    %341 = vector.extract_strided_slice %325 {offsets = [2, 0], sizes = [1, 128], strides = [1, 1]} : vector<8x128xf32> to vector<1x128xf32>
    %342 = vector.broadcast %341 : vector<1x128xf32> to vector<16x128xf32>
    %343 = arith.mulf %340, %342 : vector<16x128xf32>
    %344 = vector.extract_strided_slice %322 {offsets = [0, 127], sizes = [16, 1], strides = [1, 1]} : vector<16x128xf32> to vector<16x1xf32>
    %345 = vector.extract_strided_slice %322 {offsets = [0, 0], sizes = [16, 127], strides = [1, 1]} : vector<16x128xf32> to vector<16x127xf32>
    %346 = tpu.concatenate %344, %345 in 1 : vector<16x1xf32>, vector<16x127xf32> -> vector<16x128xf32>
    %347 = vector.extract_strided_slice %325 {offsets = [3, 0], sizes = [1, 128], strides = [1, 1]} : vector<8x128xf32> to vector<1x128xf32>
    %348 = vector.broadcast %347 : vector<1x128xf32> to vector<16x128xf32>
    %349 = arith.mulf %346, %348 : vector<16x128xf32>
    %350 = vector.extract_strided_slice %322 {offsets = [0, 1], sizes = [16, 127], strides = [1, 1]} : vector<16x128xf32> to vector<16x127xf32>
    %351 = vector.extract_strided_slice %322 {offsets = [0, 0], sizes = [16, 1], strides = [1, 1]} : vector<16x128xf32> to vector<16x1xf32>
    %352 = tpu.concatenate %350, %351 in 1 : vector<16x127xf32>, vector<16x1xf32> -> vector<16x128xf32>
    %353 = vector.extract_strided_slice %325 {offsets = [4, 0], sizes = [1, 128], strides = [1, 1]} : vector<8x128xf32> to vector<1x128xf32>
    %354 = vector.broadcast %353 : vector<1x128xf32> to vector<16x128xf32>
    %355 = arith.mulf %352, %354 : vector<16x128xf32>
    %356 = vector.extract_strided_slice %322 {offsets = [0, 7], sizes = [16, 121], strides = [1, 1]} : vector<16x128xf32> to vector<16x121xf32>
    %357 = vector.extract_strided_slice %322 {offsets = [0, 0], sizes = [16, 7], strides = [1, 1]} : vector<16x128xf32> to vector<16x7xf32>
    %358 = tpu.concatenate %356, %357 in 1 : vector<16x121xf32>, vector<16x7xf32> -> vector<16x128xf32>
    %359 = vector.extract_strided_slice %325 {offsets = [5, 0], sizes = [1, 128], strides = [1, 1]} : vector<8x128xf32> to vector<1x128xf32>
    %360 = vector.broadcast %359 : vector<1x128xf32> to vector<16x128xf32>
    %361 = arith.mulf %358, %360 : vector<16x128xf32>
    %362 = vector.extract_strided_slice %322 {offsets = [0, 8], sizes = [16, 120], strides = [1, 1]} : vector<16x128xf32> to vector<16x120xf32>
    %363 = vector.extract_strided_slice %322 {offsets = [0, 0], sizes = [16, 8], strides = [1, 1]} : vector<16x128xf32> to vector<16x8xf32>
    %364 = tpu.concatenate %362, %363 in 1 : vector<16x120xf32>, vector<16x8xf32> -> vector<16x128xf32>
    %365 = vector.extract_strided_slice %325 {offsets = [6, 0], sizes = [1, 128], strides = [1, 1]} : vector<8x128xf32> to vector<1x128xf32>
    %366 = vector.broadcast %365 : vector<1x128xf32> to vector<16x128xf32>
    %367 = arith.mulf %364, %366 : vector<16x128xf32>
    %368 = vector.extract_strided_slice %322 {offsets = [0, 9], sizes = [16, 119], strides = [1, 1]} : vector<16x128xf32> to vector<16x119xf32>
    %369 = vector.extract_strided_slice %322 {offsets = [0, 0], sizes = [16, 9], strides = [1, 1]} : vector<16x128xf32> to vector<16x9xf32>
    %370 = tpu.concatenate %368, %369 in 1 : vector<16x119xf32>, vector<16x9xf32> -> vector<16x128xf32>
    %371 = vector.extract_strided_slice %325 {offsets = [7, 0], sizes = [1, 128], strides = [1, 1]} : vector<8x128xf32> to vector<1x128xf32>
    %372 = vector.broadcast %371 : vector<1x128xf32> to vector<16x128xf32>
    %373 = arith.mulf %370, %372 : vector<16x128xf32>
    %374 = tpu.concatenate %331, %337, %343, %349, %322, %355, %361, %367, %373 in 0 : vector<16x128xf32>, vector<16x128xf32>, vector<16x128xf32>, vector<16x128xf32>, vector<16x128xf32>, vector<16x128xf32>, vector<16x128xf32>, vector<16x128xf32>, vector<16x128xf32> -> vector<144x128xf32>
    %375 = arith.truncf %374 : vector<144x128xf32> to vector<144x128xbf16>
    %cst_55 = arith.constant dense<0.000000e+00> : vector<8x128xf32>
    %376 = tpu.matmul %323, %375, %cst_55 {dimension_numbers = #tpu.dot_dimension_numbers<[1], [0], [0], [1], [0, 0, 1, 1], [], []>} : vector<8x144xbf16>, vector<144x128xbf16>, vector<8x128xf32> -> vector<8x128xf32>
    %377 = vector.broadcast %324 : vector<8x1xf32> to vector<8x128xf32>
    %378 = arith.addf %376, %377 : vector<8x128xf32>
    %cst_56 = arith.constant 0.000000e+00 : f32
    %379 = vector.broadcast %cst_56 : f32 to vector<8x128xf32>
    %380 = arith.maximumf %378, %379 : vector<8x128xf32>
    %c48_57 = arith.constant 48 : index
    %c0_58 = arith.constant 0 : index
    %381 = vector.load %arg7[%c48_57, %c0_58] : memref<176x512xbf16, #tpu.memory_space<vmem>>, vector<128x512xbf16>
    %382 = arith.truncf %380 : vector<8x128xf32> to vector<8x128xbf16>
    %cst_59 = arith.constant dense<0.000000e+00> : vector<8x512xf32>
    %383 = tpu.matmul %382, %381, %cst_59 {dimension_numbers = #tpu.dot_dimension_numbers<[1], [0], [0], [1], [0, 0, 1, 1], [], []>} : vector<8x128xbf16>, vector<128x512xbf16>, vector<8x512xf32> -> vector<8x512xf32>
    %c24_60 = arith.constant 24 : index
    %c0_61 = arith.constant 0 : index
    %384 = vector.load %arg6[%c24_60, %c0_61] : memref<32x512xf32, #tpu.memory_space<vmem>>, vector<8x256xf32>
    %385 = vector.extract_strided_slice %383 {offsets = [0, 0], sizes = [8, 256], strides = [1, 1]} : vector<8x512xf32> to vector<8x256xf32>
    %386 = vector.extract_strided_slice %385 {offsets = [0, 239], sizes = [8, 17], strides = [1, 1]} : vector<8x256xf32> to vector<8x17xf32>
    %387 = vector.extract_strided_slice %385 {offsets = [0, 0], sizes = [8, 239], strides = [1, 1]} : vector<8x256xf32> to vector<8x239xf32>
    %388 = tpu.concatenate %386, %387 in 1 : vector<8x17xf32>, vector<8x239xf32> -> vector<8x256xf32>
    %389 = vector.extract_strided_slice %384 {offsets = [0, 0], sizes = [1, 256], strides = [1, 1]} : vector<8x256xf32> to vector<1x256xf32>
    %390 = vector.broadcast %389 : vector<1x256xf32> to vector<8x256xf32>
    %391 = arith.mulf %388, %390 : vector<8x256xf32>
    %392 = vector.extract_strided_slice %385 {offsets = [0, 240], sizes = [8, 16], strides = [1, 1]} : vector<8x256xf32> to vector<8x16xf32>
    %393 = vector.extract_strided_slice %385 {offsets = [0, 0], sizes = [8, 240], strides = [1, 1]} : vector<8x256xf32> to vector<8x240xf32>
    %394 = tpu.concatenate %392, %393 in 1 : vector<8x16xf32>, vector<8x240xf32> -> vector<8x256xf32>
    %395 = vector.extract_strided_slice %384 {offsets = [1, 0], sizes = [1, 256], strides = [1, 1]} : vector<8x256xf32> to vector<1x256xf32>
    %396 = vector.broadcast %395 : vector<1x256xf32> to vector<8x256xf32>
    %397 = arith.mulf %394, %396 : vector<8x256xf32>
    %398 = vector.extract_strided_slice %385 {offsets = [0, 241], sizes = [8, 15], strides = [1, 1]} : vector<8x256xf32> to vector<8x15xf32>
    %399 = vector.extract_strided_slice %385 {offsets = [0, 0], sizes = [8, 241], strides = [1, 1]} : vector<8x256xf32> to vector<8x241xf32>
    %400 = tpu.concatenate %398, %399 in 1 : vector<8x15xf32>, vector<8x241xf32> -> vector<8x256xf32>
    %401 = vector.extract_strided_slice %384 {offsets = [2, 0], sizes = [1, 256], strides = [1, 1]} : vector<8x256xf32> to vector<1x256xf32>
    %402 = vector.broadcast %401 : vector<1x256xf32> to vector<8x256xf32>
    %403 = arith.mulf %400, %402 : vector<8x256xf32>
    %404 = vector.extract_strided_slice %385 {offsets = [0, 255], sizes = [8, 1], strides = [1, 1]} : vector<8x256xf32> to vector<8x1xf32>
    %405 = vector.extract_strided_slice %385 {offsets = [0, 0], sizes = [8, 255], strides = [1, 1]} : vector<8x256xf32> to vector<8x255xf32>
    %406 = tpu.concatenate %404, %405 in 1 : vector<8x1xf32>, vector<8x255xf32> -> vector<8x256xf32>
    %407 = vector.extract_strided_slice %384 {offsets = [3, 0], sizes = [1, 256], strides = [1, 1]} : vector<8x256xf32> to vector<1x256xf32>
    %408 = vector.broadcast %407 : vector<1x256xf32> to vector<8x256xf32>
    %409 = arith.mulf %406, %408 : vector<8x256xf32>
    %410 = vector.extract_strided_slice %385 {offsets = [0, 1], sizes = [8, 255], strides = [1, 1]} : vector<8x256xf32> to vector<8x255xf32>
    %411 = vector.extract_strided_slice %385 {offsets = [0, 0], sizes = [8, 1], strides = [1, 1]} : vector<8x256xf32> to vector<8x1xf32>
    %412 = tpu.concatenate %410, %411 in 1 : vector<8x255xf32>, vector<8x1xf32> -> vector<8x256xf32>
    %413 = vector.extract_strided_slice %384 {offsets = [4, 0], sizes = [1, 256], strides = [1, 1]} : vector<8x256xf32> to vector<1x256xf32>
    %414 = vector.broadcast %413 : vector<1x256xf32> to vector<8x256xf32>
    %415 = arith.mulf %412, %414 : vector<8x256xf32>
    %416 = vector.extract_strided_slice %385 {offsets = [0, 15], sizes = [8, 241], strides = [1, 1]} : vector<8x256xf32> to vector<8x241xf32>
    %417 = vector.extract_strided_slice %385 {offsets = [0, 0], sizes = [8, 15], strides = [1, 1]} : vector<8x256xf32> to vector<8x15xf32>
    %418 = tpu.concatenate %416, %417 in 1 : vector<8x241xf32>, vector<8x15xf32> -> vector<8x256xf32>
    %419 = vector.extract_strided_slice %384 {offsets = [5, 0], sizes = [1, 256], strides = [1, 1]} : vector<8x256xf32> to vector<1x256xf32>
    %420 = vector.broadcast %419 : vector<1x256xf32> to vector<8x256xf32>
    %421 = arith.mulf %418, %420 : vector<8x256xf32>
    %422 = vector.extract_strided_slice %385 {offsets = [0, 16], sizes = [8, 240], strides = [1, 1]} : vector<8x256xf32> to vector<8x240xf32>
    %423 = vector.extract_strided_slice %385 {offsets = [0, 0], sizes = [8, 16], strides = [1, 1]} : vector<8x256xf32> to vector<8x16xf32>
    %424 = tpu.concatenate %422, %423 in 1 : vector<8x240xf32>, vector<8x16xf32> -> vector<8x256xf32>
    %425 = vector.extract_strided_slice %384 {offsets = [6, 0], sizes = [1, 256], strides = [1, 1]} : vector<8x256xf32> to vector<1x256xf32>
    %426 = vector.broadcast %425 : vector<1x256xf32> to vector<8x256xf32>
    %427 = arith.mulf %424, %426 : vector<8x256xf32>
    %428 = vector.extract_strided_slice %385 {offsets = [0, 17], sizes = [8, 239], strides = [1, 1]} : vector<8x256xf32> to vector<8x239xf32>
    %429 = vector.extract_strided_slice %385 {offsets = [0, 0], sizes = [8, 17], strides = [1, 1]} : vector<8x256xf32> to vector<8x17xf32>
    %430 = tpu.concatenate %428, %429 in 1 : vector<8x239xf32>, vector<8x17xf32> -> vector<8x256xf32>
    %431 = vector.extract_strided_slice %384 {offsets = [7, 0], sizes = [1, 256], strides = [1, 1]} : vector<8x256xf32> to vector<1x256xf32>
    %432 = vector.broadcast %431 : vector<1x256xf32> to vector<8x256xf32>
    %433 = arith.mulf %430, %432 : vector<8x256xf32>
    %434 = vector.extract_strided_slice %383 {offsets = [0, 256], sizes = [8, 256], strides = [1, 1]} : vector<8x512xf32> to vector<8x256xf32>
    %435 = vector.extract_strided_slice %434 {offsets = [0, 239], sizes = [8, 17], strides = [1, 1]} : vector<8x256xf32> to vector<8x17xf32>
    %436 = vector.extract_strided_slice %434 {offsets = [0, 0], sizes = [8, 239], strides = [1, 1]} : vector<8x256xf32> to vector<8x239xf32>
    %437 = tpu.concatenate %435, %436 in 1 : vector<8x17xf32>, vector<8x239xf32> -> vector<8x256xf32>
    %438 = vector.extract_strided_slice %384 {offsets = [0, 0], sizes = [1, 256], strides = [1, 1]} : vector<8x256xf32> to vector<1x256xf32>
    %439 = vector.broadcast %438 : vector<1x256xf32> to vector<8x256xf32>
    %440 = arith.mulf %437, %439 : vector<8x256xf32>
    %441 = vector.extract_strided_slice %434 {offsets = [0, 240], sizes = [8, 16], strides = [1, 1]} : vector<8x256xf32> to vector<8x16xf32>
    %442 = vector.extract_strided_slice %434 {offsets = [0, 0], sizes = [8, 240], strides = [1, 1]} : vector<8x256xf32> to vector<8x240xf32>
    %443 = tpu.concatenate %441, %442 in 1 : vector<8x16xf32>, vector<8x240xf32> -> vector<8x256xf32>
    %444 = vector.extract_strided_slice %384 {offsets = [1, 0], sizes = [1, 256], strides = [1, 1]} : vector<8x256xf32> to vector<1x256xf32>
    %445 = vector.broadcast %444 : vector<1x256xf32> to vector<8x256xf32>
    %446 = arith.mulf %443, %445 : vector<8x256xf32>
    %447 = vector.extract_strided_slice %434 {offsets = [0, 241], sizes = [8, 15], strides = [1, 1]} : vector<8x256xf32> to vector<8x15xf32>
    %448 = vector.extract_strided_slice %434 {offsets = [0, 0], sizes = [8, 241], strides = [1, 1]} : vector<8x256xf32> to vector<8x241xf32>
    %449 = tpu.concatenate %447, %448 in 1 : vector<8x15xf32>, vector<8x241xf32> -> vector<8x256xf32>
    %450 = vector.extract_strided_slice %384 {offsets = [2, 0], sizes = [1, 256], strides = [1, 1]} : vector<8x256xf32> to vector<1x256xf32>
    %451 = vector.broadcast %450 : vector<1x256xf32> to vector<8x256xf32>
    %452 = arith.mulf %449, %451 : vector<8x256xf32>
    %453 = vector.extract_strided_slice %434 {offsets = [0, 255], sizes = [8, 1], strides = [1, 1]} : vector<8x256xf32> to vector<8x1xf32>
    %454 = vector.extract_strided_slice %434 {offsets = [0, 0], sizes = [8, 255], strides = [1, 1]} : vector<8x256xf32> to vector<8x255xf32>
    %455 = tpu.concatenate %453, %454 in 1 : vector<8x1xf32>, vector<8x255xf32> -> vector<8x256xf32>
    %456 = vector.extract_strided_slice %384 {offsets = [3, 0], sizes = [1, 256], strides = [1, 1]} : vector<8x256xf32> to vector<1x256xf32>
    %457 = vector.broadcast %456 : vector<1x256xf32> to vector<8x256xf32>
    %458 = arith.mulf %455, %457 : vector<8x256xf32>
    %459 = vector.extract_strided_slice %434 {offsets = [0, 1], sizes = [8, 255], strides = [1, 1]} : vector<8x256xf32> to vector<8x255xf32>
    %460 = vector.extract_strided_slice %434 {offsets = [0, 0], sizes = [8, 1], strides = [1, 1]} : vector<8x256xf32> to vector<8x1xf32>
    %461 = tpu.concatenate %459, %460 in 1 : vector<8x255xf32>, vector<8x1xf32> -> vector<8x256xf32>
    %462 = vector.extract_strided_slice %384 {offsets = [4, 0], sizes = [1, 256], strides = [1, 1]} : vector<8x256xf32> to vector<1x256xf32>
    %463 = vector.broadcast %462 : vector<1x256xf32> to vector<8x256xf32>
    %464 = arith.mulf %461, %463 : vector<8x256xf32>
    %465 = vector.extract_strided_slice %434 {offsets = [0, 15], sizes = [8, 241], strides = [1, 1]} : vector<8x256xf32> to vector<8x241xf32>
    %466 = vector.extract_strided_slice %434 {offsets = [0, 0], sizes = [8, 15], strides = [1, 1]} : vector<8x256xf32> to vector<8x15xf32>
    %467 = tpu.concatenate %465, %466 in 1 : vector<8x241xf32>, vector<8x15xf32> -> vector<8x256xf32>
    %468 = vector.extract_strided_slice %384 {offsets = [5, 0], sizes = [1, 256], strides = [1, 1]} : vector<8x256xf32> to vector<1x256xf32>
    %469 = vector.broadcast %468 : vector<1x256xf32> to vector<8x256xf32>
    %470 = arith.mulf %467, %469 : vector<8x256xf32>
    %471 = vector.extract_strided_slice %434 {offsets = [0, 16], sizes = [8, 240], strides = [1, 1]} : vector<8x256xf32> to vector<8x240xf32>
    %472 = vector.extract_strided_slice %434 {offsets = [0, 0], sizes = [8, 16], strides = [1, 1]} : vector<8x256xf32> to vector<8x16xf32>
    %473 = tpu.concatenate %471, %472 in 1 : vector<8x240xf32>, vector<8x16xf32> -> vector<8x256xf32>
    %474 = vector.extract_strided_slice %384 {offsets = [6, 0], sizes = [1, 256], strides = [1, 1]} : vector<8x256xf32> to vector<1x256xf32>
    %475 = vector.broadcast %474 : vector<1x256xf32> to vector<8x256xf32>
    %476 = arith.mulf %473, %475 : vector<8x256xf32>
    %477 = vector.extract_strided_slice %434 {offsets = [0, 17], sizes = [8, 239], strides = [1, 1]} : vector<8x256xf32> to vector<8x239xf32>
    %478 = vector.extract_strided_slice %434 {offsets = [0, 0], sizes = [8, 17], strides = [1, 1]} : vector<8x256xf32> to vector<8x17xf32>
    %479 = tpu.concatenate %477, %478 in 1 : vector<8x239xf32>, vector<8x17xf32> -> vector<8x256xf32>
    %480 = vector.extract_strided_slice %384 {offsets = [7, 0], sizes = [1, 256], strides = [1, 1]} : vector<8x256xf32> to vector<1x256xf32>
    %481 = vector.broadcast %480 : vector<1x256xf32> to vector<8x256xf32>
    %482 = arith.mulf %479, %481 : vector<8x256xf32>
    %483 = tpu.concatenate %391, %397, %403, %409, %385, %415, %421, %427, %433, %440, %446, %452, %458, %434, %464, %470 in 0 : vector<8x256xf32>, vector<8x256xf32>, vector<8x256xf32>, vector<8x256xf32>, vector<8x256xf32>, vector<8x256xf32>, vector<8x256xf32>, vector<8x256xf32>, vector<8x256xf32>, vector<8x256xf32>, vector<8x256xf32>, vector<8x256xf32>, vector<8x256xf32>, vector<8x256xf32>, vector<8x256xf32>, vector<8x256xf32> -> vector<128x256xf32>
    %484 = tpu.concatenate %476, %482 in 0 : vector<8x256xf32>, vector<8x256xf32> -> vector<16x256xf32>
    %485 = tpu.concatenate %483, %484 in 0 : vector<128x256xf32>, vector<16x256xf32> -> vector<144x256xf32>
    %486 = arith.truncf %485 : vector<144x256xf32> to vector<144x256xbf16>
    %c96 = arith.constant 96 : index
    %c0_62 = arith.constant 0 : index
    %487 = vector.load %arg5[%c96, %c0_62] : memref<112x144xbf16, #tpu.memory_space<vmem>>, vector<2x144xbf16>
    %cst_63 = arith.constant dense<0.000000e+00> : vector<2x256xf32>
    %488 = tpu.matmul %487, %486, %cst_63 {dimension_numbers = #tpu.dot_dimension_numbers<[1], [0], [0], [1], [0, 0, 1, 1], [], []>} : vector<2x144xbf16>, vector<144x256xbf16>, vector<2x256xf32> -> vector<2x256xf32>
    %c0_64 = arith.constant 0 : index
    %c8_65 = arith.constant 8 : index
    %489 = vector.load %arg4[%c0_64, %c8_65] : memref<16x16xf32, #tpu.memory_space<vmem>>, vector<1x1xf32>
    %490 = vector.broadcast %489 : vector<1x1xf32> to vector<2x256xf32>
    %491 = arith.addf %488, %490 : vector<2x256xf32>
    %cst_66 = arith.constant 1.250000e+00 : f32
    %492 = vector.broadcast %cst_66 : f32 to vector<2x256xf32>
    %493 = arith.mulf %491, %492 : vector<2x256xf32>
    %cst_67 = arith.constant dense<0xFF800000> : vector<2xf32>
    %494 = vector.multi_reduction <maximumf>, %493, %cst_67 [1] : vector<2x256xf32> to vector<2xf32>
    %495 = vector.shape_cast %494 : vector<2xf32> to vector<2x1xf32>
    %496 = vector.broadcast %495 : vector<2x1xf32> to vector<2x256xf32>
    %497 = arith.subf %493, %496 : vector<2x256xf32>
    %498 = math.exp %497 : vector<2x256xf32>
    %cst_68 = arith.constant dense<0.000000e+00> : vector<2xf32>
    %499 = vector.multi_reduction <add>, %498, %cst_68 [1] : vector<2x256xf32> to vector<2xf32>
    %500 = vector.shape_cast %499 : vector<2xf32> to vector<2x1xf32>
    %c0_69 = arith.constant 0 : index
    %c0_70 = arith.constant 0 : index
    %501 = vector.load %arg8[%c0_69, %c0_70] : memref<2x256xf32, #tpu.memory_space<vmem>>, vector<2x256xf32>
    tpu.vector_store %arg8[%c0_69, %c0_70], %493 {strides = array<i32>} : memref<2x256xf32, #tpu.memory_space<vmem>>, vector<2x256xf32>,
    %502 = vector.broadcast %500 : vector<2x1xf32> to vector<2x256xf32>
    %503 = arith.divf %498, %502 : vector<2x256xf32>
    %c0_71 = arith.constant 0 : index
    %c0_72 = arith.constant 0 : index
    %504 = vector.load %arg9[%c0_71, %c0_72] : memref<2x256xf32, #tpu.memory_space<vmem>>, vector<2x256xf32>
    tpu.vector_store %arg9[%c0_71, %c0_72], %503 {strides = array<i32>} : memref<2x256xf32, #tpu.memory_space<vmem>>, vector<2x256xf32>,
    return
  }
  func.func @transform_0(%arg0: i32) -> (i32, i32) {
    %c0_i32 = arith.constant 0 : i32
    %c0_i32_0 = arith.constant 0 : i32
    %c0_i32_1 = arith.constant 0 : i32
    return %c0_i32, %c0_i32_0 : i32, i32
  }
  func.func @transform_1(%arg0: i32) -> (i32, i32) {
    %c0_i32 = arith.constant 0 : i32
    %c0_i32_0 = arith.constant 0 : i32
    %c0_i32_1 = arith.constant 0 : i32
    return %c0_i32, %c0_i32_0 : i32, i32
  }
  func.func @transform_2(%arg0: i32) -> (i32, i32) {
    %c0_i32 = arith.constant 0 : i32
    %c0_i32_0 = arith.constant 0 : i32
    %c0_i32_1 = arith.constant 0 : i32
    return %c0_i32, %c0_i32_0 : i32, i32
  }
  func.func @transform_3(%arg0: i32) -> (i32, i32) {
    %c0_i32 = arith.constant 0 : i32
    %c0_i32_0 = arith.constant 0 : i32
    %c0_i32_1 = arith.constant 0 : i32
    return %c0_i32, %c0_i32_0 : i32, i32
  }
  func.func @transform_4(%arg0: i32) -> (i32, i32) {
    %c0_i32 = arith.constant 0 : i32
    %c0_i32_0 = arith.constant 0 : i32
    %c0_i32_1 = arith.constant 0 : i32
    return %c0_i32, %c0_i32_0 : i32, i32
  }
  func.func @transform_5(%arg0: i32) -> (i32, i32) {
    %c0_i32 = arith.constant 0 : i32
    %c0_i32_0 = arith.constant 0 : i32
    %c0_i32_1 = arith.constant 0 : i32
    return %c0_i32, %c0_i32_0 : i32, i32
  }
  func.func @transform_6(%arg0: i32) -> (i32, i32) {
    %c0_i32 = arith.constant 0 : i32
    %c0_i32_0 = arith.constant 0 : i32
    %c0_i32_1 = arith.constant 0 : i32
    return %c0_i32, %c0_i32_0 : i32, i32
  }
  func.func @transform_7(%arg0: i32) -> (i32, i32) {
    %c0_i32 = arith.constant 0 : i32
    %c0_i32_0 = arith.constant 0 : i32
    %c0_i32_1 = arith.constant 0 : i32
    return %c0_i32, %c0_i32_0 : i32, i32
  }
  func.func @transform_8(%arg0: i32) -> (i32, i32) {
    %c0_i32 = arith.constant 0 : i32
    %c0_i32_0 = arith.constant 0 : i32
    %c0_i32_1 = arith.constant 0 : i32
    return %c0_i32, %c0_i32_0 : i32, i32
  }
}

</mosaic_0001>

<bundles_post_ra>
// kernel: location_head_forward.1
= control target key start
LH: loop header
LB: loop body
LE: loop exit
PB: predicated region body
PF: predicated region fallthrough
CT: control target
= control target key end

     0   :  { %14 = vsyncpa [#allocation3], 0  ;;  %s3873_s0 = inlined_call_operand.vmem [shape: f32[32,2], index: 0, kind: input, shape index: {}]   ;;  %s3874_s1 = inlined_call_operand.vmem [shape: f32[32,8], index: 1, kind: input, shape index: {}]   ;;  %s3875_s2 = inlined_call_operand.vmem [shape: f32[72,32], index: 2, kind: input, shape index: {}]   ;;  %s3876_s3 = inlined_call_operand.hbm [shape: f32[16,16], index: 3, kind: input, shape index: {}]   ;;  %s3877_s4 = inlined_call_operand.vmem [shape: bf16[112,144], index: 4, kind: input, shape index: {}]   ;;  %s3878_s5 = inlined_call_operand.hbm [shape: f32[32,512], index: 5, kind: input, shape index: {}]   ;;  %s3879_s6 = inlined_call_operand.vmem [shape: bf16[176,512], index: 6, kind: input, shape index: {}]   ;;  %s3880_s7 = inlined_call_operand.vmem [shape: f32[2,256], index: 7, kind: output, shape index: {0}]   ;;  %s3881_s8 = inlined_call_operand.hbm [shape: f32[2,256], index: 8, kind: output, shape index: {1}]  }
   0x1   :  { %15 = vsyncpa [#allocation6], 0 }
   0x2   :  { %16 = vsyncpa [#allocation4], 0  ;;  %s2714_s27 = smov [#allocation2]  }
   0x3   :  { %s28_s28 = sshll.u32 %s2714_s27, 4  ;;  %s29_s28 = int_to_ptr.vmem [resolvable:$true] %s28_s28 }
   0x4   :  { %s2656_s29 = scalar_lea.vmem %s29_s28, 256  ;;  %p2661_p1 = scmp.lt.s32.totalorder %s29_s28, %s29_s28 }
   0x5   :  { %p2657_p0 = scmp.ne.s32.totalorder %s29_s28, %s2656_s29  ;;  %p2662_p2 = scmp.lt.s32.totalorder %s2656_s29, %s2656_s29 }
   0x7   :  { %p2663_p3 = por %p2662_p2, %p2661_p1 }
   0x9   :  { %p2664_p4 = pnand %p2663_p3, %p2657_p0 }
   0xb   :  { %2667 = shalt.err (!%p2664_p4)
}
   0xc   :  { %s2715_s30 = smov 128   ;;  %s2716_s9 = smov 8  }
   0xd   :  { %34 = dma.hbm_to_vmem [thread:$0]  %s3876_s3, 256, %s29_s28, [#allocation3], %s2715_s30, %s2715_s30, %s2716_s9  }
   0xe   :  { %s2717_s12 = smov [#allocation5]  }
   0xf   :  { %s42_s13 = sshll.u32 %s2717_s12, 4  ;;  %s43_s13 = int_to_ptr.vmem [resolvable:$true] %s42_s13 }
  0x10   :  { %s2676_s14 = scalar_lea.vmem %s43_s13, 2048  ;;  %p2681_p6 = scmp.lt.s32.totalorder %s43_s13, %s43_s13 }
  0x11   :  { %p2677_p5 = scmp.ne.s32.totalorder %s43_s13, %s2676_s14  ;;  %p2682_p7 = scmp.lt.s32.totalorder %s2676_s14, %s2676_s14 }
  0x13   :  { %p2683_p8 = por %p2682_p7, %p2681_p6 }
  0x15   :  { %p2684_p9 = pnand %p2683_p8, %p2677_p5 }
  0x17   :  { %2687 = shalt.err (!%p2684_p9)
}
  0x18   :  { %s2718_s15 = smov 512   ;;  %s2719_s16 = smov 32  }
  0x19   :  { %48 = dma.hbm_to_vmem [thread:$0]  %s3878_s5, 2048, %s43_s13, [#allocation6], %s2718_s15, %s2718_s15, %s2719_s16  }
  0x1a   :  { %2708 = dma.done.wait [#allocation3], 256  }
  0x1b   :  { %2709 = vsyncadd [#allocation3], 4294967040 }
  0x1c   :  { %2710 = dma.done.wait [#allocation6], 2048  }
  0x1d   :  { %2711 = vsyncadd [#allocation6], 4294965248  ;;  %v2720_v0 = vmov 0   ;;  %vm76_vm0 = vcmask 261120   ;;  %v61_v1 = vld [vmem:[%s3873_s0 + $0x18] sm:$0xff]  ;;  %v60_v2 = vld [vmem:[%s3873_s0 + $0x10] sm:$0xff]  ;;  %v458_v49 = vlaneseq }
  0x1e   :  { %2557 = vset.pattern.permute.xlu0 %v2720_v0  ;;  %785 = vmatprep.subr.bf16.mxu1 %v2720_v0  ;;  %v59_v3 = vld [vmem:[%s3873_s0 + $0x8] sm:$0xff]  ;;  %v64_v4 = vld [vmem:[%s3875_s2] sm:$0xff]  ;;  %v160_v9 = vld [vmem:[%s3875_s2 + $0x10] sm:$0x3]  ;;  %vm168_vm1 = vcmask 1041408   ;;  %vm161_vm2 = vcmask 15360  }
  0x1f   :  { %2463 = vmatprep.subr.mxu0 %v61_v1  ;;  %v58_v5 = vld [vmem:[%s3873_s0] sm:$0xff]  ;;  %2471 = vmatprep.mubr.msk.f32.mxu0 %vm76_vm0, %v64_v4  ;;  %v2834_v7 = vld [vmem:[#allocation2 + $0x8] sm:$0xff]  ;;  %v257_v22 = vld [vmem:[%s3875_s2 + $0x38] sm:$0xff]  ;;  %vm261_vm3 = vcmask 130048   ;;  %v2721_v25 = vmov 1   ;;  %s2723_s23 = smov 6  }
  0x20   :  { %2464 = vmatpush3.msra.mxu0 %v61_v1  ;;  %v2832_v6 = vld [vmem:[#allocation2] sm:$0xff]  ;;  %v65_v8 = vld [vmem:[%s3875_s2 + $0x8] sm:$0xff]  ;;  %2558 = vset.pattern.permute.xlu1 %v2721_v25  ;;  %v247_v28 = vld [vmem:[%s3875_s2 + $0x18] sm:$0xff]  ;;  %s2724_s24 = smov 127   ;;  %s2725_s25 = smov 7   ;;  %v2733_v48 = vmov 2  }
  0x21   :  { %2465 = vmatprep.subr.mxu0 %v60_v2  ;;  %68 = vperm.xlu0 %2557, %v2832_v6   ;;  %v252_v10 = vld [vmem:[%s3874_s1 + $0x8] sm:$0xff]  ;;  %v251_v20 = vld [vmem:[%s3874_s1] sm:$0xff]  ;;  %v256_v32 = vld [vmem:[%s3875_s2 + $0x30] sm:$0xff]  ;;  %s2726_s26 = smov 121   ;;  %s2727_s27 = smov 1   ;;  %v2938_v50 = vshrl.u32 %v458_v49, 7 }
  0x22   :  { %2466 = vmatpush3.msra.mxu0 %v60_v2  ;;  %v260_v11 = vmax.f32 %v252_v10, 0.0  ;;  %v259_v21 = vmax.f32 %v251_v20, 0.0  ;;  %v258_v23 = vld [vmem:[%s3875_s2 + $0x40] sm:$0xff]  ;;  %v255_v24 = vld [vmem:[%s3875_s2 + $0x28] sm:$0xff]  ;;  %425 = vperm.xlu1 %2558, %v2832_v6   ;;  %s2728_s28 = smov 122   ;;  %s2729_s0 = smov 2  }
  0x23   :  { %2467 = vmatprep.subr.mxu0 %v59_v3  ;;  %v248_v26 = vld [vmem:[%s3875_s2 + $0x20] sm:$0xff]  ;;  %s2722_s2 = smov 126   ;;  %s2730_s29 = smov 123   ;;  %v2941_v52 = vsub.s32 6, %v2938_v50  ;;  %v2943_v53 = vld [vmem:[#allocation5] sm:$0xff]  ;;  %vm550_vm4 = vcmask 48128  }
  0x24   :  { %2468 = vmatpush3.msra.mxu0 %v59_v3  ;;  %s2731_s30 = smov 3   ;;  %v2571_v47 = vld [vmem:[%s3877_s4 + $0x4] ss:$8 sps:$4 sm:$0xff]   ;;  %s2732_s12 = smov 125   ;;  %v2954_v63 = vsub.s32 5, %v2938_v50  ;;  %vm523_vm5 = vcmask 56320  }
  0x25   :  { %2469 = vmatprep.subr.mxu0 %v58_v5  ;;  %73 = vperm.xlu0 %2557, %v2834_v7   ;;  %s2734_s13 = smov 5   ;;  %v2947_v55 = vrot.slane %v2943_v53, %v2941_v52  ;;  %v2957_v3 = vsub.s32 4, %v2938_v50  ;;  %vm496_vm6 = vcmask 7168   ;;  %vm455_vm7 = vcmask 23552   ;;  %s2740_s16 = smov 28  }
  0x26   :  { %2470 = vmatpush3.msra.mxu0 %v58_v5  ;;  %429 = vperm.xlu1 %2558, %v2834_v7   ;;  %v2961_v4 = vrot.slane %v2943_v53, %v2954_v63  ;;  %vm571_vm8 = vcmask 39936   ;;  %vm1192_vm9 = vcmask 1043456   ;;  %vm2739_vm10 = vmmov 0   ;;  %s2741_s17 = smov 124   ;;  %s2742_s18 = smov 29  }
  0x27   :  { %2472 = vmatmul.mubr.msk.f32.vlgmr.msra.gmra.mxu0 %vm76_vm0, %v65_v8  ;;  %2474 = vmatprep.subr.msk.mxu0 %vm168_vm1, %v160_v9  ;;  %vm1188_vm11 = vcmask 64512   ;;  %s2743_s3 = smov 31   ;;  %s2744_s19 = smov 97   ;;  %vm1377_vm12 = vcmask 228352   ;;  %vm1356_vm13 = vcmask 236544   ;;  %vm1335_vm14 = vcmask 252928  }
  0x28   :  { %2475 = vmatpush3.msk.msra.mxu0 %vm168_vm1, %v160_v9  ;;  %s2745_s20 = smov 99   ;;  %s2747_s21 = smov 4   ;;  %vm1274_vm15 = vcmask 31744  }
  0x29   :  { %2479 = vmatprep.subr.mxu0 %v260_v11  ;;  %2559 = vset.pattern.permute.xlu0 %v2733_v48  ;;  %s2748_s5 = smov 101   ;;  %s2753_s15 = smov 119  }
  0x2a   :  { %2560 = vset.pattern.permute.xlu1 %v2733_v48  ;;  %s2756_s10 = smov 113   ;;  %s2757_s11 = smov 15  }
  0x9c   :  { %v69_v12 = vpop.permute.xlu0 %68 }
  0x9d   :  { %v426_v34 = vpop.permute.xlu1 %425 }
  0xa0   :  { %v74_v13 = vpop.permute.xlu0 %73 }
  0xa1   :  { %v430_v38 = vpop.permute.xlu1 %429 }
  0xe7   :  { %v2473_v14 = vpop.f32.mrf.mxu0 }
  0xe8   :  { %v155_v15 = vadd.f32 %v2473_v14, %v74_v13 }
  0xe9   :  { %v149_v16 = vpop.f32.mrf.mxu0 }
  0xea   :  { %v150_v17 = vadd.f32 %v149_v16, %v69_v12  ;;  %v159_v19 = vmax.f32 %v155_v15, 0.0 }
  0xec   :  { %v158_v18 = vmax.f32 %v150_v17, 0.0 }
  0xee   :  { %2476 = vmatprep.mubr.msk.f32.mxu0 %vm161_vm2, %v158_v18 }
  0xef   :  { %2477 = vmatmul.mubr.msk.f32.vlgmr.msra.gmra.mxu0 %vm161_vm2, %v159_v19  ;;  %v2975_v19 = vsub.s32 3, %v2938_v50 }
  0xf0   :  { %2480 = vmatpush3.msra.mxu0 %v260_v11  ;;  %2483 = vmatprep.mubr.msk.f32.mxu0 %vm261_vm3, %v257_v22  ;;  %v2968_v11 = vrot.slane %v2943_v53, %v2957_v3 }
  0xf1   :  { %2481 = vmatprep.subr.mxu0 %v259_v21  ;;  %v2984_v25 = vrot.slane %v2943_v53, %v2975_v19 }
  0xf2   :  { %2482 = vmatpush3.msra.mxu0 %v259_v21 }
  0xf3   :  { %2484 = vmatmul.mubr.msk.f32.vlgmr.msra.gmra.mxu0 %vm261_vm3, %v258_v23 }
  0xf4   :  { %2490 = vmatprep.mubr.msk.f32.mxu0 %vm261_vm3, %v255_v24  ;;  %v2980_v24 = vsub.s32 2, %v2938_v50 }
 0x1af   :  { %v2478_v27 = vpop.f32.mrf.mxu0 }
 0x1b0   :  { %v250_v29 = vmul.f32 %v2478_v27, %v248_v26 }
 0x1b1   :  { %v238_v30 = vpop.f32.mrf.mxu0 }
 0x1b2   :  { %v249_v31 = vmul.f32 %v247_v28, %v238_v30  ;;  %2486 = vmatprep.subr.mxu0 %v250_v29 }
 0x1b3   :  { %2487 = vmatpush3.msra.mxu0 %v250_v29  ;;  %v2485_v33 = vpop.f32.mrf.mxu0 }
 0x1b4   :  { %2488 = vmatprep.subr.mxu0 %v249_v31 }
 0x1b5   :  { %2489 = vmatpush3.msra.mxu0 %v249_v31  ;;  %v334_v35 = vpop.f32.mrf.mxu0  ;;  %v2993_v31 = vrot.slane %v2943_v53, %v2980_v24 }
 0x1b6   :  { %2491 = vmatmul.mubr.msk.f32.vlgmr.msra.gmra.mxu0 %vm261_vm3, %v256_v32  ;;  %609 = vmatprep.subr.bf16.mxu0 %v2720_v0 }
 0x1b7   :  { %2384 = vmatprep.mubr.msk.bf16.mxu0 %vm261_vm3, %v2571_v47 }
 0x276   :  { %v2492_v36 = vpop.f32.mrf.mxu0 }
 0x277   :  { %v421_v37 = vadd.f32 %v2492_v36, %v2485_v33  ;;  %v2997_v33 = vsub.s32 1, %v2938_v50 }
 0x278   :  { %v415_v39 = vpop.f32.mrf.mxu0 }
 0x279   :  { %v433_v40 = vadd.f32 %v430_v38, %v421_v37  ;;  %v416_v41 = vadd.f32 %v415_v39, %v334_v35 }
 0x27b   :  { %v435_v42 = vmax.f32 %v433_v40, 0.0  ;;  %v432_v43 = vadd.f32 %v426_v34, %v416_v41  ;;  %v3005_v40 = vrot.slane %v2943_v53, %v2997_v33 }
 0x27d   :  { %v2880_v44 = vadd.f32 %v435_v42, %v252_v10  ;;  %v434_v45 = vmax.f32 %v432_v43, 0.0  ;;  %v3008_v42 = vsub.s32 0, %v2938_v50 }
 0x27f   :  { %v2882_v46 = vadd.f32 %v434_v45, %v251_v20  ;;  %540 = vrot.lane.b32.xlu1 %v2880_v44, %s2722_s2 }
 0x281   :  { %538 = vrot.lane.b32.xlu0 %v2882_v46, %s2722_s2  ;;  %v584_v30 = vpack.c.bf16 %v2880_v44, %v2882_v46 }
 0x283   :  { %546 = vrot.lane.b32.xlu1 %v2880_v44, %s2723_s23 }
 0x285   :  { %544 = vrot.lane.b32.xlu0 %v2882_v46, %s2723_s23 }
 0x287   :  { %513 = vrot.lane.b32.xlu1 %v2880_v44, %s2724_s24 }
 0x289   :  { %511 = vrot.lane.b32.xlu0 %v2882_v46, %s2724_s24 }
 0x28b   :  { %519 = vrot.lane.b32.xlu1 %v2880_v44, %s2725_s25 }
 0x28d   :  { %517 = vrot.lane.b32.xlu0 %v2882_v46, %s2725_s25 }
 0x28f   :  { %486 = vrot.lane.b32.xlu1 %v2880_v44, %s2726_s26 }
 0x291   :  { %484 = vrot.lane.b32.xlu0 %v2882_v46, %s2726_s26 }
 0x293   :  { %492 = vrot.lane.b32.xlu1 %v2880_v44, %s2727_s27 }
 0x295   :  { %490 = vrot.lane.b32.xlu0 %v2882_v46, %s2727_s27 }
 0x297   :  { %466 = vrot.lane.b32.xlu1 %v2880_v44, %s2728_s28 }
 0x299   :  { %464 = vrot.lane.b32.xlu0 %v2882_v46, %s2728_s28 }
 0x29b   :  { %472 = vrot.lane.b32.xlu1 %v2880_v44, %s2729_s0 }
 0x29d   :  { %470 = vrot.lane.b32.xlu0 %v2882_v46, %s2729_s0 }
 0x29f   :  { %445 = vrot.lane.b32.xlu1 %v2880_v44, %s2730_s29 }
 0x2a1   :  { %443 = vrot.lane.b32.xlu0 %v2882_v46, %s2730_s29 }
 0x2a3   :  { %451 = vrot.lane.b32.xlu1 %v2880_v44, %s2731_s30 }
 0x2a5   :  { %449 = vrot.lane.b32.xlu0 %v2882_v46, %s2731_s30 }
 0x2a7   :  { %561 = vrot.lane.b32.xlu1 %v2880_v44, %s2732_s12 }
 0x2a9   :  { %559 = vrot.lane.b32.xlu0 %v2882_v46, %s2732_s12 }
 0x2ab   :  { %567 = vrot.lane.b32.xlu1 %v2880_v44, %s2734_s13 }
 0x2ad   :  { %565 = vrot.lane.b32.xlu0 %v2882_v46, %s2734_s13 }
 0x2af   :  { %594 = vperm.xlu1 %2560, %v2834_v7  }
 0x2b1   :  { %590 = vperm.xlu0 %2559, %v2832_v6  }
 0x2f1   :  { %v541_v51 = vpop.permute.xlu1 %540 }
 0x2f3   :  { %v539_v54 = vpop.permute.xlu0 %538 }
 0x2f5   :  { %v547_v56 = vpop.permute.xlu1 %546 }
 0x2f6   :  { %v552_v57 = vsel %vm550_vm4, %v541_v51, %v547_v56  ;;  %v3016_v51 = vrot.slane %v2943_v53, %v3008_v42 }
 0x2f7   :  { %v545_v58 = vpop.permute.xlu0 %544  ;;  %v558_v60 = vmul.f32 %v2947_v55, %v552_v57 }
 0x2f8   :  { %v551_v59 = vsel %vm550_vm4, %v539_v54, %v545_v58 }
 0x2f9   :  { %v557_v61 = vmul.f32 %v2947_v55, %v551_v59  ;;  %v514_v62 = vpop.permute.xlu1 %513 }
 0x2fb   :  { %v587_v1 = vpack.c.bf16 %v558_v60, %v557_v61  ;;  %v512_v2 = vpop.permute.xlu0 %511 }
 0x2fd   :  { %v520_v5 = vpop.permute.xlu1 %519  ;;  %610 = vmatpush1.bf16.msra.mxu0 %v587_v1  ;;  %v3024_v1 = vsub.s32 7, %v2938_v50 }
 0x2fe   :  { %v525_v8 = vsel %vm523_vm5, %v514_v62, %v520_v5  ;;  %611 = vmatprep.subr.bf16.mxu0 %v2720_v0 }
 0x2ff   :  { %v518_v9 = vpop.permute.xlu0 %517  ;;  %v537_v12 = vmul.f32 %v2961_v4, %v525_v8  ;;  %v531_v18 = vmul.f32 %v2968_v11, %v525_v8  ;;  %v3029_v8 = vrot.slane %v2943_v53, %v3024_v1 }
 0x300   :  { %v524_v10 = vsel %vm523_vm5, %v512_v2, %v518_v9 }
 0x301   :  { %v536_v13 = vmul.f32 %v2961_v4, %v524_v10  ;;  %v487_v14 = vpop.permute.xlu1 %486  ;;  %v530_v15 = vmul.f32 %v2968_v11, %v524_v10 }
 0x303   :  { %v586_v16 = vpack.c.bf16 %v537_v12, %v536_v13  ;;  %v485_v17 = vpop.permute.xlu0 %484  ;;  %v585_v21 = vpack.c.bf16 %v531_v18, %v530_v15 }
 0x305   :  { %v493_v20 = vpop.permute.xlu1 %492  ;;  %612 = vmatpush1.bf16.msra.mxu0 %v586_v16  ;;  %v2573_v16 = vld [vmem:[%s3877_s4] ss:$8 sps:$4 sm:$0xff]  }
 0x306   :  { %613 = vmatprep.subr.bf16.mxu0 %v2720_v0  ;;  %v498_v27 = vsel %vm496_vm6, %v487_v14, %v493_v20 }
 0x307   :  { %v491_v22 = vpop.permute.xlu0 %490  ;;  %v510_v32 = vmul.f32 %v2984_v25, %v498_v27  ;;  %v504_v39 = vmul.f32 %v2993_v31, %v498_v27 }
 0x308   :  { %v497_v23 = vsel %vm496_vm6, %v485_v17, %v491_v22 }
 0x309   :  { %v467_v26 = vpop.permute.xlu1 %466  ;;  %614 = vmatpush1.bf16.msra.mxu0 %v585_v21  ;;  %v509_v28 = vmul.f32 %v2984_v25, %v497_v23  ;;  %v503_v35 = vmul.f32 %v2993_v31, %v497_v23 }
 0x30a   :  { %615 = vmatprep.subr.bf16.mxu0 %v2720_v0 }
 0x30b   :  { %v465_v29 = vpop.permute.xlu0 %464  ;;  %v583_v36 = vpack.c.bf16 %v510_v32, %v509_v28  ;;  %v582_v45 = vpack.c.bf16 %v504_v39, %v503_v35  ;;  %v2735_v32 = vmov 3  }
 0x30c   :  { %2561 = vset.pattern.permute.xlu1 %v2735_v32  ;;  %2562 = vset.pattern.permute.xlu0 %v2735_v32 }
 0x30d   :  { %v473_v34 = vpop.permute.xlu1 %472  ;;  %616 = vmatpush1.bf16.msra.mxu0 %v584_v30  ;;  %v2576_v30 = vld [vmem:[%s3877_s4 + $0x14] ss:$8 sps:$4 sm:$0xff]  }
 0x30e   :  { %617 = vmatprep.subr.bf16.mxu0 %v2720_v0  ;;  %v477_v43 = vsel %vm161_vm2, %v467_v26, %v473_v34  ;;  %2387 = vmatprep.mubr.msk.bf16.mxu1 %vm261_vm3, %v2576_v30 }
 0x30f   :  { %v471_v37 = vpop.permute.xlu0 %470  ;;  %v483_v49 = vmul.f32 %v3005_v40, %v477_v43 }
 0x310   :  { %v476_v38 = vsel %vm161_vm2, %v465_v29, %v471_v37 }
 0x311   :  { %v446_v41 = vpop.permute.xlu1 %445  ;;  %618 = vmatpush1.bf16.msra.mxu0 %v583_v36  ;;  %v482_v47 = vmul.f32 %v3005_v40, %v476_v38 }
 0x312   :  { %619 = vmatprep.subr.bf16.mxu0 %v2720_v0 }
 0x313   :  { %v444_v48 = vpop.permute.xlu0 %443  ;;  %v581_v57 = vpack.c.bf16 %v483_v49, %v482_v47 }
 0x315   :  { %v452_v54 = vpop.permute.xlu1 %451  ;;  %620 = vmatpush1.bf16.msra.mxu0 %v582_v45 }
 0x316   :  { %v457_v56 = vsel %vm455_vm7, %v446_v41, %v452_v54  ;;  %621 = vmatprep.subr.bf16.mxu0 %v2720_v0 }
 0x317   :  { %v450_v58 = vpop.permute.xlu0 %449  ;;  %v463_v60 = vmul.f32 %v3016_v51, %v457_v56 }
 0x318   :  { %v456_v59 = vsel %vm455_vm7, %v444_v48, %v450_v58 }
 0x319   :  { %v462_v61 = vmul.f32 %v3016_v51, %v456_v59  ;;  %v562_v62 = vpop.permute.xlu1 %561  ;;  %622 = vmatpush1.bf16.msra.mxu0 %v581_v57 }
 0x31a   :  { %623 = vmatprep.subr.bf16.mxu0 %v2720_v0 }
 0x31b   :  { %v580_v2 = vpack.c.bf16 %v463_v60, %v462_v61  ;;  %v560_v5 = vpop.permute.xlu0 %559 }
 0x31d   :  { %v568_v9 = vpop.permute.xlu1 %567  ;;  %624 = vmatpush1.bf16.msra.mxu0 %v580_v2 }
 0x31e   :  { %v573_v10 = vsel %vm571_vm8, %v562_v62, %v568_v9  ;;  %639 = vmatprep.subr.bf16.mxu0 %v2720_v0 }
 0x31f   :  { %v566_v12 = vpop.permute.xlu0 %565  ;;  %v579_v50 = vmul.f32 %v3029_v8, %v573_v10 }
 0x320   :  { %v572_v13 = vsel %vm571_vm8, %v560_v5, %v566_v12 }
 0x321   :  { %v578_v14 = vmul.f32 %v3029_v8, %v572_v13 }
 0x323   :  { %v588_v15 = vpack.c.bf16 %v579_v50, %v578_v14 }
 0x325   :  { %640 = vmatpush2.bf16.msra.mxu0 %v588_v15 }
 0x326   :  { %965 = vmatprep.subr.bf16.mxu0 %v2720_v0 }
 0x328   :  { %642 = vmatmul.mubr.bf16.vlgmr.msra.gmra.mxu0 %v2573_v16 }
 0x32a   :  { %v595_v21 = vpop.permute.xlu1 %594 }
 0x32c   :  { %v591_v53 = vpop.permute.xlu0 %590 }
 0x3e8   :  { %v643_v17 = vpop.f32.mrf.mxu0 }
 0x3e9   :  { %v644_v18 = vadd.f32 %v643_v17, %v591_v53 }
 0x3ea   :  { %v645_v20 = vpop.f32.mrf.mxu0 }
 0x3eb   :  { %v3040_v22 = vmax.f32 %v644_v18, 0.0 }
 0x3ec   :  { %v646_v23 = vpop.f32.mrf.mxu0 }
 0x3ed   :  { %v647_v26 = vadd.f32 %v646_v23, %v595_v21  ;;  %724 = vrot.lane.b32.xlu1 %v3040_v22, %s2722_s2 }
 0x3ee   :  { %v648_v27 = vpop.f32.mrf.mxu0 }
 0x3ef   :  { %v3044_v28 = vmax.f32 %v647_v26, 0.0 }
 0x3f1   :  { %726 = vrot.lane.b32.xlu0 %v3044_v28, %s2722_s2  ;;  %730 = vrot.lane.b32.xlu1 %v3040_v22, %s2723_s23  ;;  %v760_v29 = vpack.c.bf16 %v3044_v28, %v3040_v22 }
 0x3f5   :  { %732 = vrot.lane.b32.xlu0 %v3044_v28, %s2723_s23  ;;  %706 = vrot.lane.b32.xlu1 %v3040_v22, %s2724_s24 }
 0x3f9   :  { %708 = vrot.lane.b32.xlu0 %v3044_v28, %s2724_s24  ;;  %712 = vrot.lane.b32.xlu1 %v3040_v22, %s2725_s25 }
 0x3fd   :  { %714 = vrot.lane.b32.xlu0 %v3044_v28, %s2725_s25  ;;  %688 = vrot.lane.b32.xlu1 %v3040_v22, %s2726_s26 }
 0x401   :  { %690 = vrot.lane.b32.xlu0 %v3044_v28, %s2726_s26  ;;  %694 = vrot.lane.b32.xlu1 %v3040_v22, %s2727_s27 }
 0x405   :  { %696 = vrot.lane.b32.xlu0 %v3044_v28, %s2727_s27  ;;  %672 = vrot.lane.b32.xlu1 %v3040_v22, %s2728_s28 }
 0x409   :  { %674 = vrot.lane.b32.xlu0 %v3044_v28, %s2728_s28  ;;  %678 = vrot.lane.b32.xlu1 %v3040_v22, %s2729_s0 }
 0x40d   :  { %680 = vrot.lane.b32.xlu0 %v3044_v28, %s2729_s0  ;;  %656 = vrot.lane.b32.xlu1 %v3040_v22, %s2730_s29 }
 0x411   :  { %658 = vrot.lane.b32.xlu0 %v3044_v28, %s2730_s29  ;;  %662 = vrot.lane.b32.xlu1 %v3040_v22, %s2731_s30 }
 0x415   :  { %664 = vrot.lane.b32.xlu0 %v3044_v28, %s2731_s30  ;;  %740 = vrot.lane.b32.xlu1 %v3040_v22, %s2732_s12 }
 0x419   :  { %742 = vrot.lane.b32.xlu0 %v3044_v28, %s2732_s12  ;;  %746 = vrot.lane.b32.xlu1 %v3040_v22, %s2734_s13 }
 0x41d   :  { %748 = vrot.lane.b32.xlu0 %v3044_v28, %s2734_s13  ;;  %766 = vperm.xlu1 %2561, %v2832_v6  }
 0x421   :  { %770 = vperm.xlu0 %2562, %v2834_v7  }
 0x45f   :  { %v725_v34 = vpop.permute.xlu1 %724 }
 0x463   :  { %v727_v35 = vpop.permute.xlu0 %726  ;;  %v731_v36 = vpop.permute.xlu1 %730 }
 0x464   :  { %v736_v37 = vsel %vm550_vm4, %v725_v34, %v731_v36 }
 0x465   :  { %v738_v43 = vmul.f32 %v736_v37, %v2947_v55 }
 0x467   :  { %v733_v38 = vpop.permute.xlu0 %732  ;;  %v707_v39 = vpop.permute.xlu1 %706 }
 0x468   :  { %v737_v41 = vsel %vm550_vm4, %v727_v35, %v733_v38 }
 0x469   :  { %v739_v45 = vmul.f32 %v737_v41, %v2947_v55 }
 0x46b   :  { %v709_v47 = vpop.permute.xlu0 %708  ;;  %v713_v48 = vpop.permute.xlu1 %712  ;;  %v763_v49 = vpack.c.bf16 %v739_v45, %v738_v43 }
 0x46c   :  { %v718_v54 = vsel %vm523_vm5, %v707_v39, %v713_v48 }
 0x46d   :  { %786 = vmatpush1.bf16.msra.mxu1 %v763_v49  ;;  %v722_v59 = vmul.f32 %v718_v54, %v2961_v4  ;;  %v720_v9 = vmul.f32 %v718_v54, %v2968_v11 }
 0x46e   :  { %787 = vmatprep.subr.bf16.mxu1 %v2720_v0 }
 0x46f   :  { %v715_v56 = vpop.permute.xlu0 %714  ;;  %v689_v57 = vpop.permute.xlu1 %688 }
 0x470   :  { %v719_v58 = vsel %vm523_vm5, %v709_v47, %v715_v56 }
 0x471   :  { %v723_v60 = vmul.f32 %v719_v58, %v2961_v4  ;;  %v721_v61 = vmul.f32 %v719_v58, %v2968_v11 }
 0x473   :  { %v691_v62 = vpop.permute.xlu0 %690  ;;  %v695_v2 = vpop.permute.xlu1 %694  ;;  %v762_v5 = vpack.c.bf16 %v723_v60, %v722_v59  ;;  %v761_v13 = vpack.c.bf16 %v721_v61, %v720_v9  ;;  %v2574_v60 = vld [vmem:[%s3877_s4 + $0x10] ss:$8 sps:$4 sm:$0xff]  }
 0x474   :  { %v700_v14 = vsel %vm496_vm6, %v689_v57, %v695_v2 }
 0x475   :  { %788 = vmatpush1.bf16.msra.mxu1 %v762_v5  ;;  %v704_v17 = vmul.f32 %v700_v14, %v2984_v25  ;;  %v702_v27 = vmul.f32 %v700_v14, %v2993_v31 }
 0x476   :  { %789 = vmatprep.subr.bf16.mxu1 %v2720_v0 }
 0x477   :  { %v697_v10 = vpop.permute.xlu0 %696  ;;  %v673_v12 = vpop.permute.xlu1 %672 }
 0x478   :  { %v701_v50 = vsel %vm496_vm6, %v691_v62, %v697_v10 }
 0x479   :  { %790 = vmatpush1.bf16.msra.mxu1 %v761_v13  ;;  %v705_v15 = vmul.f32 %v701_v50, %v2984_v25  ;;  %v703_v18 = vmul.f32 %v701_v50, %v2993_v31 }
 0x47a   :  { %791 = vmatprep.subr.bf16.mxu1 %v2720_v0 }
 0x47b   :  { %v675_v16 = vpop.permute.xlu0 %674  ;;  %v679_v53 = vpop.permute.xlu1 %678  ;;  %v759_v23 = vpack.c.bf16 %v705_v15, %v704_v17  ;;  %v254_v17 = vld [vmem:[%s3874_s1 + $0x18] sm:$0xff] }
 0x47c   :  { %v684_v30 = vsel %vm161_vm2, %v673_v12, %v679_v53  ;;  %v253_v12 = vld [vmem:[%s3874_s1 + $0x10] sm:$0xff]  ;;  %s2749_s1 = smov 27  }
 0x47d   :  { %792 = vmatpush1.bf16.msra.mxu1 %v760_v29  ;;  %v758_v29 = vpack.c.bf16 %v703_v18, %v702_v27  ;;  %v686_v34 = vmul.f32 %v684_v30, %v3005_v40 }
 0x47e   :  { %793 = vmatprep.subr.bf16.mxu1 %v2720_v0 }
 0x47f   :  { %v681_v20 = vpop.permute.xlu0 %680  ;;  %v657_v21 = vpop.permute.xlu1 %656 }
 0x480   :  { %v685_v26 = vsel %vm161_vm2, %v675_v16, %v681_v20  ;;  %v2736_v20 = vmov 4  }
 0x481   :  { %794 = vmatpush1.bf16.msra.mxu1 %v759_v23  ;;  %v687_v32 = vmul.f32 %v685_v26, %v3005_v40  ;;  %2563 = vset.pattern.permute.xlu0 %v2736_v20 }
 0x482   :  { %795 = vmatprep.subr.bf16.mxu1 %v2720_v0  ;;  %2564 = vset.pattern.permute.xlu1 %v2736_v20 }
 0x483   :  { %v659_v22 = vpop.permute.xlu0 %658  ;;  %v663_v28 = vpop.permute.xlu1 %662  ;;  %v757_v38 = vpack.c.bf16 %v687_v32, %v686_v34 }
 0x484   :  { %v668_v35 = vsel %vm455_vm7, %v657_v21, %v663_v28 }
 0x485   :  { %796 = vmatpush1.bf16.msra.mxu1 %v758_v29  ;;  %v670_v41 = vmul.f32 %v668_v35, %v3016_v51 }
 0x486   :  { %797 = vmatprep.subr.bf16.mxu1 %v2720_v0 }
 0x487   :  { %v665_v36 = vpop.permute.xlu0 %664  ;;  %v741_v37 = vpop.permute.xlu1 %740 }
 0x488   :  { %v669_v39 = vsel %vm455_vm7, %v659_v22, %v665_v36 }
 0x489   :  { %v671_v43 = vmul.f32 %v669_v39, %v3016_v51  ;;  %798 = vmatpush1.bf16.msra.mxu1 %v757_v38 }
 0x48a   :  { %799 = vmatprep.subr.bf16.mxu1 %v2720_v0 }
 0x48b   :  { %v743_v45 = vpop.permute.xlu0 %742  ;;  %v747_v47 = vpop.permute.xlu1 %746  ;;  %v756_v48 = vpack.c.bf16 %v671_v43, %v670_v41 }
 0x48c   :  { %v752_v49 = vsel %vm571_vm8, %v741_v37, %v747_v47 }
 0x48d   :  { %800 = vmatpush1.bf16.msra.mxu1 %v756_v48  ;;  %v754_v57 = vmul.f32 %v752_v49, %v3029_v8 }
 0x48e   :  { %815 = vmatprep.subr.bf16.mxu1 %v2720_v0 }
 0x48f   :  { %v749_v54 = vpop.permute.xlu0 %748 }
 0x490   :  { %v753_v56 = vsel %vm571_vm8, %v743_v45, %v749_v54 }
 0x491   :  { %v755_v58 = vmul.f32 %v753_v56, %v3029_v8 }
 0x493   :  { %v764_v59 = vpack.c.bf16 %v755_v58, %v754_v57 }
 0x495   :  { %816 = vmatpush2.bf16.msra.mxu1 %v764_v59 }
 0x496   :  { %1141 = vmatprep.subr.bf16.mxu1 %v2720_v0 }
 0x498   :  { %818 = vmatmul.mubr.bf16.vlgmr.msra.gmra.mxu1 %v2574_v60  ;;  %v767_v61 = vpop.permute.xlu1 %766 }
 0x49c   :  { %v771_v9 = vpop.permute.xlu0 %770 }
 0x558   :  { %v819_v62 = vpop.f32.mrf.mxu1 }
 0x559   :  { %v820_v2 = vadd.f32 %v819_v62, %v767_v61 }
 0x55a   :  { %v821_v5 = vpop.f32.mrf.mxu1 }
 0x55b   :  { %v826_v10 = vadd.f32 %v820_v2, %v2882_v46 }
 0x55c   :  { %v822_v13 = vpop.f32.mrf.mxu1 }
 0x55d   :  { %v828_v50 = vmax.f32 %v826_v10, 0.0  ;;  %v823_v14 = vadd.f32 %v822_v13, %v771_v9 }
 0x55e   :  { %v824_v15 = vpop.f32.mrf.mxu1 }
 0x55f   :  { %v3147_v16 = vadd.f32 %v828_v50, %v253_v12  ;;  %v827_v53 = vadd.f32 %v823_v14, %v2880_v44  ;;  %v2577_v44 = vld [vmem:[%s3877_s4 + $0x24] ss:$8 sps:$4 sm:$0xff]  }
 0x560   :  { %2390 = vmatprep.mubr.msk.bf16.mxu0 %vm261_vm3, %v2577_v44 }
 0x561   :  { %v829_v18 = vmax.f32 %v827_v53, 0.0  ;;  %910 = vrot.lane.b32.xlu0 %v3147_v16, %s2723_s23  ;;  %904 = vrot.lane.b32.xlu1 %v3147_v16, %s2722_s2 }
 0x563   :  { %v3157_v46 = vadd.f32 %v829_v18, %v254_v17 }
 0x565   :  { %886 = vrot.lane.b32.xlu0 %v3147_v16, %s2724_s24  ;;  %906 = vrot.lane.b32.xlu1 %v3157_v46, %s2722_s2  ;;  %v940_v5 = vpack.c.bf16 %v3157_v46, %v3147_v16 }
 0x569   :  { %892 = vrot.lane.b32.xlu0 %v3147_v16, %s2725_s25  ;;  %912 = vrot.lane.b32.xlu1 %v3157_v46, %s2723_s23 }
 0x56d   :  { %868 = vrot.lane.b32.xlu0 %v3147_v16, %s2726_s26  ;;  %888 = vrot.lane.b32.xlu1 %v3157_v46, %s2724_s24 }
 0x571   :  { %874 = vrot.lane.b32.xlu0 %v3147_v16, %s2727_s27  ;;  %894 = vrot.lane.b32.xlu1 %v3157_v46, %s2725_s25 }
 0x575   :  { %852 = vrot.lane.b32.xlu0 %v3147_v16, %s2728_s28  ;;  %870 = vrot.lane.b32.xlu1 %v3157_v46, %s2726_s26 }
 0x579   :  { %858 = vrot.lane.b32.xlu0 %v3147_v16, %s2729_s0  ;;  %876 = vrot.lane.b32.xlu1 %v3157_v46, %s2727_s27 }
 0x57d   :  { %836 = vrot.lane.b32.xlu0 %v3147_v16, %s2730_s29  ;;  %854 = vrot.lane.b32.xlu1 %v3157_v46, %s2728_s28 }
 0x581   :  { %842 = vrot.lane.b32.xlu0 %v3147_v16, %s2731_s30  ;;  %860 = vrot.lane.b32.xlu1 %v3157_v46, %s2729_s0 }
 0x585   :  { %920 = vrot.lane.b32.xlu0 %v3147_v16, %s2732_s12  ;;  %838 = vrot.lane.b32.xlu1 %v3157_v46, %s2730_s29 }
 0x589   :  { %926 = vrot.lane.b32.xlu0 %v3147_v16, %s2734_s13  ;;  %844 = vrot.lane.b32.xlu1 %v3157_v46, %s2731_s30 }
 0x58d   :  { %922 = vrot.lane.b32.xlu1 %v3157_v46, %s2732_s12  ;;  %946 = vperm.xlu0 %2563, %v2832_v6  }
 0x591   :  { %928 = vrot.lane.b32.xlu1 %v3157_v46, %s2734_s13 }
 0x595   :  { %950 = vperm.xlu1 %2564, %v2834_v7  }
 0x5d3   :  { %v911_v21 = vpop.permute.xlu0 %910  ;;  %v905_v23 = vpop.permute.xlu1 %904 }
 0x5d4   :  { %v916_v30 = vsel %vm550_vm4, %v905_v23, %v911_v21 }
 0x5d5   :  { %v918_v29 = vmul.f32 %v916_v30, %v2947_v55 }
 0x5d7   :  { %v887_v26 = vpop.permute.xlu0 %886  ;;  %v907_v27 = vpop.permute.xlu1 %906 }
 0x5db   :  { %v893_v32 = vpop.permute.xlu0 %892  ;;  %v913_v22 = vpop.permute.xlu1 %912 }
 0x5dc   :  { %v917_v28 = vsel %vm550_vm4, %v907_v27, %v913_v22  ;;  %v898_v7 = vsel %vm523_vm5, %v887_v26, %v893_v32 }
 0x5dd   :  { %v919_v6 = vmul.f32 %v917_v28, %v2947_v55  ;;  %v902_v41 = vmul.f32 %v898_v7, %v2961_v4  ;;  %v900_v54 = vmul.f32 %v898_v7, %v2968_v11 }
 0x5df   :  { %v943_v34 = vpack.c.bf16 %v919_v6, %v918_v29  ;;  %v869_v35 = vpop.permute.xlu0 %868  ;;  %v889_v36 = vpop.permute.xlu1 %888 }
 0x5e1   :  { %966 = vmatpush1.bf16.msra.mxu0 %v943_v34 }
 0x5e2   :  { %967 = vmatprep.subr.bf16.mxu0 %v2720_v0 }
 0x5e3   :  { %v875_v37 = vpop.permute.xlu0 %874  ;;  %v895_v38 = vpop.permute.xlu1 %894 }
 0x5e4   :  { %v899_v39 = vsel %vm523_vm5, %v889_v36, %v895_v38  ;;  %v880_v60 = vsel %vm496_vm6, %v869_v35, %v875_v37 }
 0x5e5   :  { %v903_v43 = vmul.f32 %v899_v39, %v2961_v4  ;;  %v901_v45 = vmul.f32 %v899_v39, %v2968_v11  ;;  %v884_v9 = vmul.f32 %v880_v60, %v2984_v25  ;;  %v882_v15 = vmul.f32 %v880_v60, %v2993_v31  ;;  %v2579_v39 = vld [vmem:[%s3877_s4 + $0x20] ss:$8 sps:$4 sm:$0xff]   ;;  %v2580_v60 = vld [vmem:[%s3877_s4 + $0x34] ss:$8 sps:$4 sm:$0xff]  }
 0x5e6   :  { %2393 = vmatprep.mubr.msk.bf16.mxu1 %vm261_vm3, %v2580_v60 }
 0x5e7   :  { %v942_v47 = vpack.c.bf16 %v903_v43, %v902_v41  ;;  %v853_v48 = vpop.permute.xlu0 %852  ;;  %v871_v49 = vpop.permute.xlu1 %870  ;;  %v941_v56 = vpack.c.bf16 %v901_v45, %v900_v54 }
 0x5e9   :  { %968 = vmatpush1.bf16.msra.mxu0 %v942_v47 }
 0x5ea   :  { %969 = vmatprep.subr.bf16.mxu0 %v2720_v0 }
 0x5eb   :  { %v859_v57 = vpop.permute.xlu0 %858  ;;  %v877_v58 = vpop.permute.xlu1 %876 }
 0x5ec   :  { %v881_v59 = vsel %vm496_vm6, %v871_v49, %v877_v58  ;;  %v864_v53 = vsel %vm161_vm2, %v853_v48, %v859_v57 }
 0x5ed   :  { %970 = vmatpush1.bf16.msra.mxu0 %v941_v56  ;;  %v885_v61 = vmul.f32 %v881_v59, %v2984_v25  ;;  %v883_v10 = vmul.f32 %v881_v59, %v2993_v31  ;;  %v866_v20 = vmul.f32 %v864_v53, %v3005_v40 }
 0x5ee   :  { %971 = vmatprep.subr.bf16.mxu0 %v2720_v0 }
 0x5ef   :  { %v837_v62 = vpop.permute.xlu0 %836  ;;  %v855_v2 = vpop.permute.xlu1 %854  ;;  %v939_v12 = vpack.c.bf16 %v885_v61, %v884_v9  ;;  %v938_v17 = vpack.c.bf16 %v883_v10, %v882_v15  ;;  %v2737_v61 = vmov 5  }
 0x5f0   :  { %2565 = vset.pattern.permute.xlu1 %v2737_v61  ;;  %2566 = vset.pattern.permute.xlu0 %v2737_v61 }
 0x5f1   :  { %972 = vmatpush1.bf16.msra.mxu0 %v940_v5 }
 0x5f2   :  { %973 = vmatprep.subr.bf16.mxu0 %v2720_v0 }
 0x5f3   :  { %v843_v13 = vpop.permute.xlu0 %842  ;;  %v861_v50 = vpop.permute.xlu1 %860 }
 0x5f4   :  { %v865_v14 = vsel %vm161_vm2, %v855_v2, %v861_v50  ;;  %v848_v23 = vsel %vm455_vm7, %v837_v62, %v843_v13  ;;  %v3308_v62 = vld [vmem:[#allocation2] sm:$0xff]  ;;  %v3311_v2 = vld [vmem:[#allocation2 + $0x8] sm:$0xff] }
 0x5f5   :  { %974 = vmatpush1.bf16.msra.mxu0 %v939_v12  ;;  %v867_v18 = vmul.f32 %v865_v14, %v3005_v40  ;;  %v850_v32 = vmul.f32 %v848_v23, %v3016_v51 }
 0x5f6   :  { %975 = vmatprep.subr.bf16.mxu0 %v2720_v0 }
 0x5f7   :  { %v839_v44 = vpop.permute.xlu1 %838  ;;  %v921_v21 = vpop.permute.xlu0 %920  ;;  %v937_v26 = vpack.c.bf16 %v867_v18, %v866_v20 }
 0x5f9   :  { %976 = vmatpush1.bf16.msra.mxu0 %v938_v17 }
 0x5fa   :  { %977 = vmatprep.subr.bf16.mxu0 %v2720_v0 }
 0x5fb   :  { %v845_v27 = vpop.permute.xlu1 %844  ;;  %v927_v28 = vpop.permute.xlu0 %926 }
 0x5fc   :  { %v849_v30 = vsel %vm455_vm7, %v839_v44, %v845_v27  ;;  %v932_v34 = vsel %vm571_vm8, %v921_v21, %v927_v28 }
 0x5fd   :  { %v851_v22 = vmul.f32 %v849_v30, %v3016_v51  ;;  %978 = vmatpush1.bf16.msra.mxu0 %v937_v26  ;;  %v934_v7 = vmul.f32 %v932_v34, %v3029_v8 }
 0x5fe   :  { %979 = vmatprep.subr.bf16.mxu0 %v2720_v0 }
 0x5ff   :  { %v936_v29 = vpack.c.bf16 %v851_v22, %v850_v32  ;;  %v923_v6 = vpop.permute.xlu1 %922 }
 0x601   :  { %980 = vmatpush1.bf16.msra.mxu0 %v936_v29 }
 0x602   :  { %995 = vmatprep.subr.bf16.mxu0 %v2720_v0 }
 0x603   :  { %v929_v35 = vpop.permute.xlu1 %928 }
 0x604   :  { %v933_v36 = vsel %vm571_vm8, %v923_v6, %v929_v35 }
 0x605   :  { %v935_v37 = vmul.f32 %v933_v36, %v3029_v8 }
 0x607   :  { %v944_v38 = vpack.c.bf16 %v935_v37, %v934_v7 }
 0x608   :  { %v947_v41 = vpop.permute.xlu0 %946 }
 0x609   :  { %996 = vmatpush2.bf16.msra.mxu0 %v944_v38 }
 0x60c   :  { %998 = vmatmul.mubr.bf16.vlgmr.msra.gmra.mxu0 %v2579_v39 }
 0x610   :  { %v951_v48 = vpop.permute.xlu1 %950 }
 0x6cc   :  { %v999_v43 = vpop.f32.mrf.mxu0 }
 0x6cd   :  { %v1000_v45 = vadd.f32 %v999_v43, %v947_v41 }
 0x6ce   :  { %v1001_v47 = vpop.f32.mrf.mxu0 }
 0x6cf   :  { %v3250_v49 = vmax.f32 %v1000_v45, 0.0 }
 0x6d0   :  { %v1002_v54 = vpop.f32.mrf.mxu0 }
 0x6d1   :  { %v1003_v56 = vadd.f32 %v1002_v54, %v951_v48  ;;  %1080 = vrot.lane.b32.xlu1 %v3250_v49, %s2722_s2 }
 0x6d2   :  { %v1004_v57 = vpop.f32.mrf.mxu0 }
 0x6d3   :  { %v3254_v58 = vmax.f32 %v1003_v56, 0.0 }
 0x6d5   :  { %1082 = vrot.lane.b32.xlu0 %v3254_v58, %s2722_s2  ;;  %1086 = vrot.lane.b32.xlu1 %v3250_v49, %s2723_s23  ;;  %v1116_v59 = vpack.c.bf16 %v3254_v58, %v3250_v49  ;;  %s2758_s2 = smov 111  }
 0x6d9   :  { %1088 = vrot.lane.b32.xlu0 %v3254_v58, %s2723_s23  ;;  %1062 = vrot.lane.b32.xlu1 %v3250_v49, %s2724_s24  ;;  %s2759_s23 = smov 17  }
 0x6dd   :  { %1064 = vrot.lane.b32.xlu0 %v3254_v58, %s2724_s24  ;;  %1068 = vrot.lane.b32.xlu1 %v3250_v49, %s2725_s25 }
 0x6e1   :  { %1070 = vrot.lane.b32.xlu0 %v3254_v58, %s2725_s25  ;;  %1044 = vrot.lane.b32.xlu1 %v3250_v49, %s2726_s26 }
 0x6e5   :  { %1046 = vrot.lane.b32.xlu0 %v3254_v58, %s2726_s26  ;;  %1050 = vrot.lane.b32.xlu1 %v3250_v49, %s2727_s27 }
 0x6e9   :  { %1052 = vrot.lane.b32.xlu0 %v3254_v58, %s2727_s27  ;;  %1028 = vrot.lane.b32.xlu1 %v3250_v49, %s2728_s28 }
 0x6ed   :  { %1030 = vrot.lane.b32.xlu0 %v3254_v58, %s2728_s28  ;;  %1034 = vrot.lane.b32.xlu1 %v3250_v49, %s2729_s0  ;;  %s2751_s28 = smov 120  }
 0x6f1   :  { %1036 = vrot.lane.b32.xlu0 %v3254_v58, %s2729_s0  ;;  %1012 = vrot.lane.b32.xlu1 %v3250_v49, %s2730_s29  ;;  %s2752_s0 = smov 9  }
 0x6f5   :  { %1014 = vrot.lane.b32.xlu0 %v3254_v58, %s2730_s29  ;;  %1018 = vrot.lane.b32.xlu1 %v3250_v49, %s2731_s30 }
 0x6f9   :  { %1020 = vrot.lane.b32.xlu0 %v3254_v58, %s2731_s30  ;;  %1096 = vrot.lane.b32.xlu1 %v3250_v49, %s2732_s12 }
 0x6fd   :  { %1098 = vrot.lane.b32.xlu0 %v3254_v58, %s2732_s12  ;;  %1102 = vrot.lane.b32.xlu1 %v3250_v49, %s2734_s13 }
 0x701   :  { %1104 = vrot.lane.b32.xlu0 %v3254_v58, %s2734_s13  ;;  %1122 = vperm.xlu1 %2565, %v3308_v62  }
 0x705   :  { %1126 = vperm.xlu0 %2566, %v3311_v2  }
 0x743   :  { %v1081_v5 = vpop.permute.xlu1 %1080 }
 0x747   :  { %v1083_v9 = vpop.permute.xlu0 %1082  ;;  %v1087_v10 = vpop.permute.xlu1 %1086 }
 0x748   :  { %v1092_v12 = vsel %vm550_vm4, %v1081_v5, %v1087_v10 }
 0x749   :  { %v1094_v15 = vmul.f32 %v1092_v12, %v2947_v55 }
 0x74b   :  { %v1089_v13 = vpop.permute.xlu0 %1088  ;;  %v1063_v50 = vpop.permute.xlu1 %1062 }
 0x74c   :  { %v1093_v14 = vsel %vm550_vm4, %v1083_v9, %v1089_v13  ;;  %vm2086_vm4 = vcmask 924672  }
 0x74d   :  { %v1095_v53 = vmul.f32 %v1093_v14, %v2947_v55 }
 0x74f   :  { %v1119_v17 = vpack.c.bf16 %v1095_v53, %v1094_v15  ;;  %v1065_v18 = vpop.permute.xlu0 %1064  ;;  %v1069_v44 = vpop.permute.xlu1 %1068 }
 0x750   :  { %v1074_v20 = vsel %vm523_vm5, %v1063_v50, %v1069_v44  ;;  %v1186_v44 = vld [vmem:[%s3879_s6] sm:$0xf] }
 0x751   :  { %1142 = vmatpush1.bf16.msra.mxu1 %v1119_v17  ;;  %v1078_v27 = vmul.f32 %v1074_v20, %v2961_v4  ;;  %v1076_v29 = vmul.f32 %v1074_v20, %v2968_v11  ;;  %v2738_v20 = vmov 0.0  }
 0x752   :  { %1143 = vmatprep.subr.bf16.mxu1 %v2720_v0  ;;  %2493 = vmatprep.subr.bf16.mxu0 %v2738_v20 }
 0x753   :  { %v1071_v21 = vpop.permute.xlu0 %1070  ;;  %v1045_v23 = vpop.permute.xlu1 %1044  ;;  %2495 = vmatprep.mubr.msk.bf16.mxu0 %vm2739_vm10, %v2738_v20 }
 0x754   :  { %v1075_v26 = vsel %vm523_vm5, %v1065_v18, %v1071_v21  ;;  %v1194_v21 = vsel %vm1192_vm9, %v1186_v44, 0  ;;  %vm2029_vm5 = vcmask 121856   ;;  %vm2106_vm9 = vcmask 916480  }
 0x755   :  { %v1079_v30 = vmul.f32 %v1075_v26, %v2961_v4  ;;  %v1077_v32 = vmul.f32 %v1075_v26, %v2968_v11  ;;  %2494 = vmatpush3.bf16.msra.mxu0 %v1194_v21 }
 0x756   :  { %2499 = vmatprep.subr.bf16.mxu0 %v2738_v20 }
 0x757   :  { %v1118_v22 = vpack.c.bf16 %v1079_v30, %v1078_v27  ;;  %v1047_v55 = vpop.permute.xlu0 %1046  ;;  %v1051_v28 = vpop.permute.xlu1 %1050  ;;  %v1117_v6 = vpack.c.bf16 %v1077_v32, %v1076_v29 }
 0x758   :  { %v1056_v7 = vsel %vm496_vm6, %v1045_v23, %v1051_v28 }
 0x759   :  { %1144 = vmatpush1.bf16.msra.mxu1 %v1118_v22  ;;  %v1060_v39 = vmul.f32 %v1056_v7, %v2984_v25  ;;  %v1058_v48 = vmul.f32 %v1056_v7, %v2993_v31 }
 0x75a   :  { %1145 = vmatprep.subr.bf16.mxu1 %v2720_v0 }
 0x75b   :  { %v1053_v34 = vpop.permute.xlu0 %1052  ;;  %v1029_v35 = vpop.permute.xlu1 %1028 }
 0x75c   :  { %v1057_v36 = vsel %vm496_vm6, %v1047_v55, %v1053_v34 }
 0x75d   :  { %1146 = vmatpush1.bf16.msra.mxu1 %v1117_v6  ;;  %v1061_v4 = vmul.f32 %v1057_v36, %v2984_v25  ;;  %v1059_v11 = vmul.f32 %v1057_v36, %v2993_v31 }
 0x75e   :  { %1147 = vmatprep.subr.bf16.mxu1 %v2720_v0 }
 0x75f   :  { %v1031_v37 = vpop.permute.xlu0 %1030  ;;  %v1035_v38 = vpop.permute.xlu1 %1034  ;;  %v1115_v41 = vpack.c.bf16 %v1061_v4, %v1060_v39  ;;  %v1114_v25 = vpack.c.bf16 %v1059_v11, %v1058_v48 }
 0x760   :  { %v1040_v54 = vsel %vm161_vm2, %v1029_v35, %v1035_v38  ;;  %v2750_v38 = vmov 6  }
 0x761   :  { %1148 = vmatpush1.bf16.msra.mxu1 %v1116_v59  ;;  %v1042_v58 = vmul.f32 %v1040_v54, %v3005_v40  ;;  %2567 = vset.pattern.permute.xlu0 %v2750_v38 }
 0x762   :  { %1149 = vmatprep.subr.bf16.mxu1 %v2720_v0  ;;  %2568 = vset.pattern.permute.xlu1 %v2750_v38 }
 0x763   :  { %v1037_v43 = vpop.permute.xlu0 %1036  ;;  %v1013_v45 = vpop.permute.xlu1 %1012 }
 0x764   :  { %v1041_v47 = vsel %vm161_vm2, %v1031_v37, %v1037_v43  ;;  %v2583_v37 = vld [vmem:[%s3877_s4 + $0x44] ss:$8 sps:$4 sm:$0xff]   ;;  %vm1398_vm2 = vcmask 220160  }
 0x765   :  { %1150 = vmatpush1.bf16.msra.mxu1 %v1115_v41  ;;  %v1043_v49 = vmul.f32 %v1041_v47, %v3005_v40  ;;  %v3424_v41 = vld [vmem:[#allocation5 + $0x20] sm:$0xff] }
 0x766   :  { %1151 = vmatprep.subr.bf16.mxu1 %v2720_v0  ;;  %v1383_v47 = vrot.slane %v3424_v41, %v2941_v52 }
 0x767   :  { %v1015_v56 = vpop.permute.xlu0 %1014  ;;  %v1019_v57 = vpop.permute.xlu1 %1018  ;;  %v1113_v60 = vpack.c.bf16 %v1043_v49, %v1042_v58 }
 0x768   :  { %v1024_v59 = vsel %vm455_vm7, %v1013_v45, %v1019_v57 }
 0x769   :  { %1152 = vmatpush1.bf16.msra.mxu1 %v1114_v25  ;;  %v1026_v9 = vmul.f32 %v1024_v59, %v3016_v51  ;;  %v1362_v59 = vrot.slane %v3424_v41, %v2954_v63 }
 0x76a   :  { %1153 = vmatprep.subr.bf16.mxu1 %v2720_v0 }
 0x76b   :  { %v1021_v61 = vpop.permute.xlu0 %1020  ;;  %v1097_v31 = vpop.permute.xlu1 %1096 }
 0x76c   :  { %v1025_v5 = vsel %vm455_vm7, %v1015_v56, %v1021_v61 }
 0x76d   :  { %v1027_v10 = vmul.f32 %v1025_v5, %v3016_v51  ;;  %1154 = vmatpush1.bf16.msra.mxu1 %v1113_v60  ;;  %v2582_v51 = vld [vmem:[%s3877_s4 + $0x30] ss:$8 sps:$4 sm:$0xff]  }
 0x76e   :  { %1155 = vmatprep.subr.bf16.mxu1 %v2720_v0 }
 0x76f   :  { %v1112_v12 = vpack.c.bf16 %v1027_v10, %v1026_v9  ;;  %v1099_v13 = vpop.permute.xlu0 %1098  ;;  %v1103_v40 = vpop.permute.xlu1 %1102 }
 0x770   :  { %v1108_v50 = vsel %vm571_vm8, %v1097_v31, %v1103_v40 }
 0x771   :  { %1156 = vmatpush1.bf16.msra.mxu1 %v1112_v12  ;;  %v1110_v53 = vmul.f32 %v1108_v50, %v3029_v8  ;;  %v1341_v50 = vrot.slane %v3424_v41, %v2957_v3 }
 0x772   :  { %1171 = vmatprep.subr.bf16.mxu1 %v2720_v0 }
 0x773   :  { %v1105_v14 = vpop.permute.xlu0 %1104 }
 0x774   :  { %v1109_v15 = vsel %vm571_vm8, %v1099_v13, %v1105_v14 }
 0x775   :  { %v1111_v17 = vmul.f32 %v1109_v15, %v3029_v8 }
 0x777   :  { %v1120_v18 = vpack.c.bf16 %v1111_v17, %v1110_v53 }
 0x779   :  { %1172 = vmatpush2.bf16.msra.mxu1 %v1120_v18 }
 0x77a   :  { %1436 = vmatprep.subr.bf16.mxu1 %v2720_v0 }
 0x77c   :  { %1174 = vmatmul.mubr.bf16.vlgmr.msra.gmra.mxu1 %v2582_v51  ;;  %v1123_v8 = vpop.permute.xlu1 %1122 }
 0x77d   :  { %2397 = vmatprep.mubr.msk.bf16.mxu1 %vm261_vm3, %v2583_v37 }
 0x780   :  { %v1127_v30 = vpop.permute.xlu0 %1126 }
 0x83c   :  { %v1175_v23 = vpop.f32.mrf.mxu1 }
 0x83d   :  { %v1176_v26 = vadd.f32 %v1175_v23, %v1123_v8  ;;  %v1320_v23 = vrot.slane %v3424_v41, %v2975_v19 }
 0x83e   :  { %v1177_v27 = vpop.f32.mrf.mxu1 }
 0x83f   :  { %v1182_v22 = vadd.f32 %v1176_v26, %v3147_v16 }
 0x840   :  { %v1178_v32 = vpop.f32.mrf.mxu1 }
 0x841   :  { %v1179_v55 = vadd.f32 %v1178_v32, %v1127_v30  ;;  %v1184_v6 = vmax.f32 %v1182_v22, 0.0 }
 0x842   :  { %v1180_v28 = vpop.f32.mrf.mxu1 }
 0x843   :  { %v1183_v29 = vadd.f32 %v1179_v55, %v3157_v46 }
 0x845   :  { %v1185_v34 = vmax.f32 %v1183_v29, 0.0 }
 0x847   :  { %v1187_v35 = vpack.c.bf16 %v1185_v34, %v1184_v6  ;;  %v1300_v34 = vrot.slane %v3424_v41, %v2980_v24 }
 0x849   :  { %2496 = vmatmul.mubr.msk.bf16.vlgmr.msra.gmra.mxu0 %vm1188_vm11, %v1187_v35 }
 0x84a   :  { %2503 = vmatprep.mubr.msk.bf16.mxu0 %vm2739_vm10, %v2738_v20 }
 0x909   :  { %v3368_v36 = vpop.f32.mrf.mxu0 }
 0x90a   :  { %1371 = vrot.lane.b32.xlu0 %v3368_v36, %s2740_s16  ;;  %1365 = vrot.lane.b32.xlu1 %v3368_v36, %s2741_s17 }
 0x90b   :  { %v2497_v16 = vpop.f32.mrf.mxu0 }
 0x90d   :  { %v3372_v7 = vpop.f32.mrf.mxu0 }
 0x90e   :  { %1344 = vrot.lane.b32.xlu0 %v3368_v36, %s2732_s12  ;;  %1367 = vrot.lane.b32.xlu1 %v3372_v7, %s2741_s17  ;;  %v1411_v46 = vpack.c.bf16 %v3372_v7, %v3368_v36 }
 0x90f   :  { %v2498_v4 = vpop.f32.mrf.mxu0 }
 0x912   :  { %1350 = vrot.lane.b32.xlu0 %v3368_v36, %s2742_s18  ;;  %1373 = vrot.lane.b32.xlu1 %v3372_v7, %s2740_s16 }
 0x916   :  { %1323 = vrot.lane.b32.xlu0 %v3368_v36, %s2724_s24  ;;  %1346 = vrot.lane.b32.xlu1 %v3372_v7, %s2732_s12  ;;  %s2746_s12 = smov 100  }
 0x91a   :  { %1329 = vrot.lane.b32.xlu0 %v3368_v36, %s2743_s3  ;;  %1352 = vrot.lane.b32.xlu1 %v3372_v7, %s2742_s18 }
 0x91e   :  { %1303 = vrot.lane.b32.xlu0 %v3368_v36, %s2744_s19  ;;  %1325 = vrot.lane.b32.xlu1 %v3372_v7, %s2724_s24 }
 0x922   :  { %1309 = vrot.lane.b32.xlu0 %v3368_v36, %s2727_s27  ;;  %1331 = vrot.lane.b32.xlu1 %v3372_v7, %s2743_s3 }
 0x926   :  { %1283 = vrot.lane.b32.xlu0 %v3368_v36, %s2745_s20  ;;  %1305 = vrot.lane.b32.xlu1 %v3372_v7, %s2744_s19 }
 0x92a   :  { %1289 = vrot.lane.b32.xlu0 %v3368_v36, %s2731_s30  ;;  %1311 = vrot.lane.b32.xlu1 %v3372_v7, %s2727_s27 }
 0x92e   :  { %1262 = vrot.lane.b32.xlu0 %v3368_v36, %s2746_s12  ;;  %1285 = vrot.lane.b32.xlu1 %v3372_v7, %s2745_s20 }
 0x932   :  { %1268 = vrot.lane.b32.xlu0 %v3368_v36, %s2747_s21  ;;  %1291 = vrot.lane.b32.xlu1 %v3372_v7, %s2731_s30 }
 0x936   :  { %1242 = vrot.lane.b32.xlu0 %v3368_v36, %s2748_s5  ;;  %1264 = vrot.lane.b32.xlu1 %v3372_v7, %s2746_s12 }
 0x93a   :  { %1248 = vrot.lane.b32.xlu0 %v3368_v36, %s2734_s13  ;;  %1270 = vrot.lane.b32.xlu1 %v3372_v7, %s2747_s21 }
 0x93e   :  { %1386 = vrot.lane.b32.xlu0 %v3368_v36, %s2730_s29  ;;  %1244 = vrot.lane.b32.xlu1 %v3372_v7, %s2748_s5 }
 0x942   :  { %1392 = vrot.lane.b32.xlu0 %v3368_v36, %s2749_s1  ;;  %1250 = vrot.lane.b32.xlu1 %v3372_v7, %s2734_s13 }
 0x946   :  { %1388 = vrot.lane.b32.xlu1 %v3372_v7, %s2730_s29  ;;  %1417 = vperm.xlu0 %2567, %v3308_v62  }
 0x94a   :  { %1394 = vrot.lane.b32.xlu1 %v3372_v7, %s2749_s1 }
 0x94e   :  { %1421 = vperm.xlu1 %2568, %v3311_v2  }
 0x97c   :  { %v1372_v39 = vpop.permute.xlu0 %1371  ;;  %v1366_v11 = vpop.permute.xlu1 %1365 }
 0x97d   :  { %v1378_v48 = vsel %vm1377_vm12, %v1366_v11, %v1372_v39  ;;  %v1280_v11 = vrot.slane %v3424_v41, %v2997_v33 }
 0x97e   :  { %v1384_v62 = vmul.f32 %v1383_v47, %v1378_v48 }
 0x980   :  { %v1345_v43 = vpop.permute.xlu0 %1344  ;;  %v1368_v45 = vpop.permute.xlu1 %1367 }
 0x984   :  { %v1351_v54 = vpop.permute.xlu0 %1350  ;;  %v1374_v25 = vpop.permute.xlu1 %1373 }
 0x985   :  { %v1379_v49 = vsel %vm1377_vm12, %v1368_v45, %v1374_v25  ;;  %v1357_v60 = vsel %vm1356_vm13, %v1345_v43, %v1351_v54 }
 0x986   :  { %v1385_v56 = vmul.f32 %v1383_v47, %v1379_v49  ;;  %v1363_v9 = vmul.f32 %v1362_v59, %v1357_v60 }
 0x988   :  { %v1414_v57 = vpack.c.bf16 %v1385_v56, %v1384_v62  ;;  %v1324_v58 = vpop.permute.xlu0 %1323  ;;  %v1347_v2 = vpop.permute.xlu1 %1346  ;;  %v1259_v56 = vrot.slane %v3424_v41, %v3008_v42 }
 0x98a   :  { %1437 = vmatpush1.bf16.msra.mxu1 %v1414_v57 }
 0x98b   :  { %1438 = vmatprep.subr.bf16.mxu1 %v2720_v0 }
 0x98c   :  { %v1330_v61 = vpop.permute.xlu0 %1329  ;;  %v1353_v31 = vpop.permute.xlu1 %1352 }
 0x98d   :  { %v1358_v5 = vsel %vm1356_vm13, %v1347_v2, %v1353_v31  ;;  %v1336_v14 = vsel %vm1335_vm14, %v1324_v58, %v1330_v61 }
 0x98e   :  { %v1364_v10 = vmul.f32 %v1362_v59, %v1358_v5  ;;  %v1342_v18 = vmul.f32 %v1341_v50, %v1336_v14 }
 0x990   :  { %v1413_v12 = vpack.c.bf16 %v1364_v10, %v1363_v9  ;;  %v1304_v13 = vpop.permute.xlu0 %1303  ;;  %v1326_v40 = vpop.permute.xlu1 %1325  ;;  %v1404_v10 = vrot.slane %v3424_v41, %v3024_v1  ;;  %v2586_v41 = vld [vmem:[%s3879_s6 + $0x40] ss:$16 sps:$4 sm:$0xff]  }
 0x991   :  { %2500 = vmatpush3.bf16.msra.mxu0 %v2586_v41 }
 0x992   :  { %1439 = vmatpush1.bf16.msra.mxu1 %v1413_v12  ;;  %2501 = vmatprep.subr.bf16.mxu0 %v2738_v20 }
 0x993   :  { %1440 = vmatprep.subr.bf16.mxu1 %v2720_v0 }
 0x994   :  { %v1310_v15 = vpop.permute.xlu0 %1309  ;;  %v1332_v53 = vpop.permute.xlu1 %1331 }
 0x995   :  { %v1337_v17 = vsel %vm1335_vm14, %v1326_v40, %v1332_v53  ;;  %v1315_v26 = vsel %vm496_vm6, %v1304_v13, %v1310_v15  ;;  %v2585_v53 = vld [vmem:[%s3877_s4 + $0x40] ss:$8 sps:$4 sm:$0xff]  }
 0x996   :  { %v1343_v51 = vmul.f32 %v1341_v50, %v1337_v17  ;;  %v1321_v22 = vmul.f32 %v1320_v23, %v1315_v26  ;;  %v2587_v17 = vld [vmem:[%s3879_s6 + $0x20] ss:$16 sps:$4 sm:$0xff]  }
 0x997   :  { %2502 = vmatpush3.bf16.msra.mxu0 %v2587_v17 }
 0x998   :  { %v1412_v44 = vpack.c.bf16 %v1343_v51, %v1342_v18  ;;  %v1284_v21 = vpop.permute.xlu0 %1283  ;;  %v1306_v8 = vpop.permute.xlu1 %1305  ;;  %1665 = vmatprep.subr.bf16.mxu0 %v2720_v0 }
 0x99a   :  { %1441 = vmatpush1.bf16.msra.mxu1 %v1412_v44 }
 0x99b   :  { %1442 = vmatprep.subr.bf16.mxu1 %v2720_v0 }
 0x99c   :  { %v1290_v27 = vpop.permute.xlu0 %1289  ;;  %v1312_v30 = vpop.permute.xlu1 %1311 }
 0x99d   :  { %v1316_v32 = vsel %vm496_vm6, %v1306_v8, %v1312_v30  ;;  %v1295_v35 = vsel %vm455_vm7, %v1284_v21, %v1290_v27 }
 0x99e   :  { %v1322_v55 = vmul.f32 %v1320_v23, %v1316_v32  ;;  %1443 = vmatpush1.bf16.msra.mxu1 %v1411_v46  ;;  %v1301_v38 = vmul.f32 %v1300_v34, %v1295_v35 }
 0x99f   :  { %1444 = vmatprep.subr.bf16.mxu1 %v2720_v0 }
 0x9a0   :  { %v1410_v28 = vpack.c.bf16 %v1322_v55, %v1321_v22  ;;  %v1263_v29 = vpop.permute.xlu0 %1262  ;;  %v1286_v6 = vpop.permute.xlu1 %1285 }
 0x9a2   :  { %1445 = vmatpush1.bf16.msra.mxu1 %v1410_v28 }
 0x9a3   :  { %1446 = vmatprep.subr.bf16.mxu1 %v2720_v0 }
 0x9a4   :  { %v1269_v16 = vpop.permute.xlu0 %1268  ;;  %v1292_v4 = vpop.permute.xlu1 %1291 }
 0x9a5   :  { %v1296_v37 = vsel %vm455_vm7, %v1286_v6, %v1292_v4  ;;  %v1275_v43 = vsel %vm1274_vm15, %v1263_v29, %v1269_v16  ;;  %v1541_v16 = vld [vmem:[#allocation2] sm:$0xff]  ;;  %vm1990_vm7 = vcmask 138240  }
 0x9a6   :  { %v1302_v36 = vmul.f32 %v1300_v34, %v1296_v37  ;;  %v1281_v54 = vmul.f32 %v1280_v11, %v1275_v43  ;;  %v3506_v34 = vld [vmem:[%s3877_s4 + $0x50] sm:$0xff] }
 0x9a7   :  { %v2402_v35 = vcombine.high %v3506_v34, %v3506_v34  ;;  %v2590_v4 = vld [vmem:[%s3879_s6 + $0x140] ss:$16 sps:$4 sm:$0xff]   ;;  %v2592_v37 = vld [vmem:[%s3879_s6 + $0x144] ss:$16 sps:$4 sm:$0xff]  }
 0x9a8   :  { %v1409_v7 = vpack.c.bf16 %v1302_v36, %v1301_v38  ;;  %v1243_v46 = vpop.permute.xlu0 %1242  ;;  %v1265_v39 = vpop.permute.xlu1 %1264  ;;  %v2754_v38 = vmov 7   ;;  %v2598_v36 = vld [vmem:[%s3879_s6 + $0x124] ss:$16 sps:$4 sm:$0xff]   ;;  %v2608_v43 = vld [vmem:[%s3879_s6 + $0xe0] ss:$16 sps:$4 sm:$0xff]  }
 0x9a9   :  { %2569 = vset.pattern.permute.xlu1 %v2754_v38  ;;  %2570 = vset.pattern.permute.xlu0 %v2754_v38 }
 0x9aa   :  { %1447 = vmatpush1.bf16.msra.mxu1 %v1409_v7  ;;  %v2596_v7 = vld [vmem:[%s3879_s6 + $0x120] ss:$16 sps:$4 sm:$0xff]  }
 0x9ab   :  { %1448 = vmatprep.subr.bf16.mxu1 %v2720_v0 }
 0x9ac   :  { %v1249_v45 = vpop.permute.xlu0 %1248  ;;  %v1271_v47 = vpop.permute.xlu1 %1270 }
 0x9ad   :  { %v1276_v48 = vsel %vm1274_vm15, %v1265_v39, %v1271_v47  ;;  %v1254_v58 = vsel %vm571_vm8, %v1243_v46, %v1249_v45  ;;  %v2604_v46 = vld [vmem:[%s3879_s6 + $0x104] ss:$16 sps:$4 sm:$0xff]   ;;  %v2602_v39 = vld [vmem:[%s3879_s6 + $0x100] ss:$16 sps:$4 sm:$0xff]  }
 0x9ae   :  { %v1282_v25 = vmul.f32 %v1280_v11, %v1276_v48  ;;  %v1260_v60 = vmul.f32 %v1259_v56, %v1254_v58  ;;  %v2610_v11 = vld [vmem:[%s3879_s6 + $0xe4] ss:$16 sps:$4 sm:$0xff]   ;;  %v2614_v47 = vld [vmem:[%s3879_s6 + $0xc0] ss:$16 sps:$4 sm:$0xff]  }
 0x9af   :  { %v2616_v45 = vld [vmem:[%s3879_s6 + $0xc4] ss:$16 sps:$4 sm:$0xff]  }
 0x9b0   :  { %v1408_v49 = vpack.c.bf16 %v1282_v25, %v1281_v54  ;;  %v1245_v62 = vpop.permute.xlu1 %1244  ;;  %v1387_v57 = vpop.permute.xlu0 %1386  ;;  %v2622_v48 = vld [vmem:[%s3879_s6 + $0xa4] ss:$16 sps:$4 sm:$0xff]   ;;  %v2620_v54 = vld [vmem:[%s3879_s6 + $0xa0] ss:$16 sps:$4 sm:$0xff]  }
 0x9b1   :  { %v2628_v25 = vld [vmem:[%s3879_s6 + $0x84] ss:$16 sps:$4 sm:$0xff]  }
 0x9b2   :  { %1449 = vmatpush1.bf16.msra.mxu1 %v1408_v49  ;;  %v2626_v49 = vld [vmem:[%s3879_s6 + $0x80] ss:$16 sps:$4 sm:$0xff]  }
 0x9b3   :  { %1450 = vmatprep.subr.bf16.mxu1 %v2720_v0 }
 0x9b4   :  { %v1251_v2 = vpop.permute.xlu1 %1250  ;;  %v1393_v31 = vpop.permute.xlu0 %1392 }
 0x9b5   :  { %v1255_v59 = vsel %vm571_vm8, %v1245_v62, %v1251_v2  ;;  %v1399_v12 = vsel %vm1398_vm2, %v1387_v57, %v1393_v31  ;;  %v1542_v62 = vld [vmem:[#allocation5 + $0x40] sm:$0xff]  ;;  %vm2126_vm8 = vcmask 908288  }
 0x9b6   :  { %v1261_v61 = vmul.f32 %v1259_v56, %v1255_v59  ;;  %v1405_v50 = vmul.f32 %v1404_v10, %v1399_v12  ;;  %v1627_v57 = vrot.slane %v1542_v62, %v2941_v52  ;;  %v1603_v12 = vrot.slane %v1542_v62, %v2957_v3 }
 0x9b8   :  { %v1407_v5 = vpack.c.bf16 %v1261_v61, %v1260_v60  ;;  %v1389_v9 = vpop.permute.xlu1 %1388  ;;  %v1615_v60 = vrot.slane %v1542_v62, %v2954_v63 }
 0x9ba   :  { %1451 = vmatpush1.bf16.msra.mxu1 %v1407_v5 }
 0x9bb   :  { %1466 = vmatprep.subr.bf16.mxu1 %v2720_v0 }
 0x9bc   :  { %v1395_v13 = vpop.permute.xlu1 %1394 }
 0x9bd   :  { %v1400_v40 = vsel %vm1398_vm2, %v1389_v9, %v1395_v13 }
 0x9be   :  { %v1406_v14 = vmul.f32 %v1404_v10, %v1400_v40 }
 0x9c0   :  { %v1415_v15 = vpack.c.bf16 %v1406_v14, %v1405_v50 }
 0x9c1   :  { %v1418_v51 = vpop.permute.xlu0 %1417 }
 0x9c2   :  { %1467 = vmatpush2.bf16.msra.mxu1 %v1415_v15 }
 0x9c3   :  { %1899 = vmatprep.subr.bf16.mxu1 %v2592_v37 }
 0x9c5   :  { %1469 = vmatmul.mubr.bf16.vlgmr.msra.gmra.mxu1 %v2585_v53 }
 0x9c6   :  { %1931 = vmatprep.mubr.bf16.mxu1 %v2720_v0  ;;  %1900 = vmatpush1.bf16.msra.mxu1 %v2590_v4 }
 0x9c7   :  { %1901 = vmatprep.subr.bf16.mxu1 %v2598_v36 }
 0x9c9   :  { %v1422_v21 = vpop.permute.xlu1 %1421 }
 0x9ca   :  { %1902 = vmatpush1.bf16.msra.mxu1 %v2596_v7  ;;  %v1639_v7 = vrot.slane %v1542_v62, %v3024_v1 }
 0x9cb   :  { %1903 = vmatprep.subr.bf16.mxu1 %v2604_v46 }
 0x9ce   :  { %1904 = vmatpush1.bf16.msra.mxu1 %v2602_v39 }
 0x9cf   :  { %1905 = vmatprep.subr.bf16.mxu1 %v2610_v11 }
 0x9d2   :  { %1906 = vmatpush1.bf16.msra.mxu1 %v2608_v43 }
 0x9d3   :  { %1907 = vmatprep.subr.bf16.mxu1 %v2616_v45  ;;  %v2595_v45 = vld [vmem:[%s3879_s6 + $0x14c] ss:$16 sps:$4 sm:$0xff]  }
 0x9d6   :  { %1908 = vmatpush1.bf16.msra.mxu1 %v2614_v47 }
 0x9d7   :  { %1909 = vmatprep.subr.bf16.mxu1 %v2622_v48  ;;  %v2401_v48 = vcombine.low %v3506_v34, %v3506_v34  ;;  %v2607_v34 = vld [vmem:[%s3879_s6 + $0x10c] ss:$16 sps:$4 sm:$0xff]  }
 0x9da   :  { %1910 = vmatpush1.bf16.msra.mxu1 %v2620_v54  ;;  %v2593_v54 = vld [vmem:[%s3879_s6 + $0x148] ss:$16 sps:$4 sm:$0xff]  }
 0x9db   :  { %1911 = vmatprep.subr.bf16.mxu1 %v2628_v25  ;;  %v2601_v25 = vld [vmem:[%s3879_s6 + $0x12c] ss:$16 sps:$4 sm:$0xff]  }
 0x9de   :  { %1912 = vmatpush1.bf16.msra.mxu1 %v2626_v49  ;;  %v2599_v49 = vld [vmem:[%s3879_s6 + $0x128] ss:$16 sps:$4 sm:$0xff]  }
 0xa85   :  { %v1470_v18 = vpop.f32.mrf.mxu1 }
 0xa86   :  { %v1471_v8 = vadd.f32 %v1470_v18, %v1418_v51  ;;  %v1590_v51 = vrot.slane %v1542_v62, %v2975_v19 }
 0xa87   :  { %v1472_v44 = vpop.f32.mrf.mxu1 }
 0xa88   :  { %v1477_v30 = vmax.f32 %v1471_v8, 0.0 }
 0xa89   :  { %v1473_v23 = vpop.f32.mrf.mxu1 }
 0xa8a   :  { %v1474_v26 = vadd.f32 %v1473_v23, %v1422_v21  ;;  %v1578_v23 = vrot.slane %v1542_v62, %v2980_v24 }
 0xa8b   :  { %v1475_v27 = vpop.f32.mrf.mxu1 }
 0xa8c   :  { %v1478_v32 = vmax.f32 %v1474_v26, 0.0 }
 0xa8e   :  { %v1483_v22 = vpack.c.bf16 %v1478_v32, %v1477_v30 }
 0xa90   :  { %2504 = vmatmul.mubr.msk.bf16.vlgmr.msra.gmra.mxu0 %vm76_vm0, %v1483_v22  ;;  %vm1599_vm0 = vcmask 1039360  }
 0xa91   :  { %2403 = vmatprep.mubr.msk.bf16.mxu0 %vm261_vm3, %v2402_v35 }
 0xb50   :  { %v3472_v20 = vpop.f32.mrf.mxu0 }
 0xb51   :  { %1618 = vrot.lane.b32.xlu1 %v3472_v20, %s2751_s28 }
 0xb52   :  { %v2505_v55 = vpop.f32.mrf.mxu0 }
 0xb53   :  { %v1566_v55 = vrot.slane %v1542_v62, %v2997_v33 }
 0xb54   :  { %v3476_v28 = vpop.f32.mrf.mxu0 }
 0xb55   :  { %1606 = vrot.lane.b32.xlu1 %v3472_v20, %s2726_s26  ;;  %1620 = vrot.lane.b32.xlu0 %v3476_v28, %s2751_s28  ;;  %v1646_v29 = vpack.c.bf16 %v3476_v28, %v3472_v20 }
 0xb56   :  { %v2506_v6 = vpop.f32.mrf.mxu0 }
 0xb59   :  { %1593 = vrot.lane.b32.xlu1 %v3472_v20, %s2724_s24  ;;  %1608 = vrot.lane.b32.xlu0 %v3476_v28, %s2726_s26 }
 0xb5d   :  { %1581 = vrot.lane.b32.xlu1 %v3472_v20, %s2727_s27  ;;  %1595 = vrot.lane.b32.xlu0 %v3476_v28, %s2724_s24 }
 0xb61   :  { %1569 = vrot.lane.b32.xlu1 %v3472_v20, %s2725_s25  ;;  %1583 = vrot.lane.b32.xlu0 %v3476_v28, %s2727_s27 }
 0xb65   :  { %1557 = vrot.lane.b32.xlu1 %v3472_v20, %s2716_s9  ;;  %1571 = vrot.lane.b32.xlu0 %v3476_v28, %s2725_s25 }
 0xb69   :  { %1545 = vrot.lane.b32.xlu1 %v3472_v20, %s2752_s0  ;;  %1559 = vrot.lane.b32.xlu0 %v3476_v28, %s2716_s9 }
 0xb6d   :  { %1630 = vrot.lane.b32.xlu1 %v3472_v20, %s2753_s15  ;;  %1547 = vrot.lane.b32.xlu0 %v3476_v28, %s2752_s0  ;;  %v1554_v20 = vrot.slane %v1542_v62, %v3008_v42  ;;  %v2605_v62 = vld [vmem:[%s3879_s6 + $0x108] ss:$16 sps:$4 sm:$0xff]   ;;  %s2760_s0 = smov 112  }
 0xb71   :  { %1632 = vrot.lane.b32.xlu0 %v3476_v28, %s2753_s15  ;;  %1653 = vperm.xlu1 %2569, %v1541_v16  }
 0xbc3   :  { %v1619_v56 = vpop.permute.xlu1 %1618 }
 0xbc4   :  { %v1628_v59 = vmul.f32 %v1627_v57, %v1619_v56  ;;  %v2613_v56 = vld [vmem:[%s3879_s6 + $0xec] ss:$16 sps:$4 sm:$0xff]  }
 0xbc7   :  { %v1607_v58 = vpop.permute.xlu1 %1606  ;;  %v1621_v2 = vpop.permute.xlu0 %1620 }
 0xbc8   :  { %v1629_v61 = vmul.f32 %v1627_v57, %v1621_v2  ;;  %v1616_v10 = vmul.f32 %v1615_v60, %v1607_v58  ;;  %v2619_v57 = vld [vmem:[%s3879_s6 + $0xcc] ss:$16 sps:$4 sm:$0xff]   ;;  %v2617_v58 = vld [vmem:[%s3879_s6 + $0xc8] ss:$16 sps:$4 sm:$0xff]  }
 0xbc9   :  { %v2625_v2 = vld [vmem:[%s3879_s6 + $0xac] ss:$16 sps:$4 sm:$0xff]  }
 0xbca   :  { %v1649_v31 = vpack.c.bf16 %v1629_v61, %v1628_v59  ;;  %v2623_v59 = vld [vmem:[%s3879_s6 + $0xa8] ss:$16 sps:$4 sm:$0xff]  }
 0xbcb   :  { %v1594_v5 = vpop.permute.xlu1 %1593  ;;  %v1609_v9 = vpop.permute.xlu0 %1608  ;;  %v2629_v61 = vld [vmem:[%s3879_s6 + $0x88] ss:$16 sps:$4 sm:$0xff]  }
 0xbcc   :  { %v1617_v13 = vmul.f32 %v1615_v60, %v1609_v9  ;;  %1666 = vmatpush1.bf16.msra.mxu0 %v1649_v31  ;;  %v1604_v15 = vmul.f32 %v1603_v12, %v1594_v5  ;;  %v2631_v60 = vld [vmem:[%s3879_s6 + $0x8c] ss:$16 sps:$4 sm:$0xff]   ;;  %v2634_v31 = vld [vmem:[%s3879_s6 + $0x64] ss:$16 sps:$4 sm:$0xff]   ;;  %v2632_v9 = vld [vmem:[%s3879_s6 + $0x60] ss:$16 sps:$4 sm:$0xff]  }
 0xbcd   :  { %1667 = vmatprep.subr.bf16.mxu0 %v2720_v0  ;;  %v2637_v5 = vld [vmem:[%s3879_s6 + $0x6c] ss:$16 sps:$4 sm:$0xff]   ;;  %1913 = vmatprep.subr.bf16.mxu1 %v2634_v31 }
 0xbce   :  { %v1648_v40 = vpack.c.bf16 %v1617_v13, %v1616_v10  ;;  %v2635_v10 = vld [vmem:[%s3879_s6 + $0x68] ss:$16 sps:$4 sm:$0xff]   ;;  %1914 = vmatpush1.bf16.msra.mxu1 %v2632_v9 }
 0xbcf   :  { %v1582_v50 = vpop.permute.xlu1 %1581  ;;  %v1596_v14 = vpop.permute.xlu0 %1595 }
 0xbd0   :  { %v1605_v53 = vmul.f32 %v1603_v12, %v1596_v14  ;;  %1668 = vmatpush1.bf16.msra.mxu0 %v1648_v40  ;;  %v1591_v8 = vmul.f32 %v1590_v51, %v1582_v50 }
 0xbd1   :  { %1669 = vmatprep.subr.bf16.mxu0 %v2720_v0 }
 0xbd2   :  { %v1647_v41 = vpack.c.bf16 %v1605_v53, %v1604_v15 }
 0xbd3   :  { %v1570_v17 = vpop.permute.xlu1 %1569  ;;  %v1584_v18 = vpop.permute.xlu0 %1583 }
 0xbd4   :  { %1670 = vmatpush1.bf16.msra.mxu0 %v1647_v41  ;;  %v1592_v44 = vmul.f32 %v1590_v51, %v1584_v18  ;;  %v1579_v22 = vmul.f32 %v1578_v23, %v1570_v17 }
 0xbd5   :  { %1671 = vmatprep.subr.bf16.mxu0 %v2720_v0 }
 0xbd6   :  { %v1645_v27 = vpack.c.bf16 %v1592_v44, %v1591_v8 }
 0xbd7   :  { %v1572_v21 = vpop.permute.xlu0 %1571  ;;  %v1558_v26 = vpop.permute.xlu1 %1557 }
 0xbd8   :  { %1672 = vmatpush1.bf16.msra.mxu0 %v1646_v29  ;;  %v1580_v30 = vmul.f32 %v1578_v23, %v1572_v21  ;;  %v1567_v37 = vmul.f32 %v1566_v55, %v1558_v26 }
 0xbd9   :  { %1673 = vmatprep.subr.bf16.mxu0 %v2720_v0 }
 0xbda   :  { %v1644_v6 = vpack.c.bf16 %v1580_v30, %v1579_v22 }
 0xbdb   :  { %v1560_v32 = vpop.permute.xlu0 %1559  ;;  %v1546_v16 = vpop.permute.xlu1 %1545 }
 0xbdc   :  { %1674 = vmatpush1.bf16.msra.mxu0 %v1645_v27  ;;  %v1568_v35 = vmul.f32 %v1566_v55, %v1560_v32  ;;  %v1555_v36 = vmul.f32 %v1554_v20, %v1546_v16  ;;  %v3684_v27 = vld [vmem:[%s3877_s4 + $0x60] sm:$0x11] }
 0xbdd   :  { %1675 = vmatprep.subr.bf16.mxu0 %v2720_v0  ;;  %v2437_v30 = vcombine.high %v3684_v27, %v3684_v27  ;;  %v2251_v32 = vld [vmem:[#allocation2] sm:$0x1] }
 0xbde   :  { %v1643_v28 = vpack.c.bf16 %v1568_v35, %v1567_v37 }
 0xbdf   :  { %v1548_v4 = vpop.permute.xlu0 %1547  ;;  %v1631_v46 = vpop.permute.xlu1 %1630 }
 0xbe0   :  { %1676 = vmatpush1.bf16.msra.mxu0 %v1644_v6  ;;  %v1556_v29 = vmul.f32 %v1554_v20, %v1548_v4  ;;  %v1640_v43 = vmul.f32 %v1639_v7, %v1631_v46  ;;  %v3713_v46 = vld [vmem:[#allocation5 + $0x68] sm:$0xff] }
 0xbe1   :  { %1677 = vmatprep.subr.bf16.mxu0 %v2720_v0  ;;  %v3756_v31 = vrot.slane %v3713_v46, %v2997_v33 }
 0xbe2   :  { %v1642_v39 = vpack.c.bf16 %v1556_v29, %v1555_v36 }
 0xbe3   :  { %v1633_v38 = vpop.permute.xlu0 %1632 }
 0xbe4   :  { %1678 = vmatpush1.bf16.msra.mxu0 %v1643_v28  ;;  %v1641_v11 = vmul.f32 %v1639_v7, %v1633_v38  ;;  %v3711_v7 = vld [vmem:[#allocation5 + $0x60] sm:$0xff] }
 0xbe5   :  { %1679 = vmatprep.subr.bf16.mxu0 %v2720_v0 }
 0xbe6   :  { %v1650_v47 = vpack.c.bf16 %v1641_v11, %v1640_v43  ;;  %v3717_v43 = vrot.slane %v3711_v7, %v2957_v3 }
 0xbe8   :  { %1680 = vmatpush1.bf16.msra.mxu0 %v1642_v39 }
 0xbe9   :  { %1695 = vmatprep.subr.bf16.mxu0 %v2720_v0 }
 0xbec   :  { %1696 = vmatpush2.bf16.msra.mxu0 %v1650_v47  ;;  %v1654_v12 = vpop.permute.xlu1 %1653  ;;  %v3725_v47 = vrot.slane %v3713_v46, %v2975_v19 }
 0xbed   :  { %1940 = vmatprep.subr.bf16.mxu0 %v2595_v45  ;;  %v3721_v45 = vrot.slane %v3713_v46, %v2957_v3 }
 0xbef   :  { %1698 = vmatmul.mubr.bf16.vlgmr.msra.gmra.mxu0 %v2401_v48 }
 0xbf0   :  { %1941 = vmatpush1.bf16.msra.mxu0 %v2593_v54  ;;  %1972 = vmatprep.mubr.bf16.mxu0 %v2720_v0  ;;  %v2611_v0 = vld [vmem:[%s3879_s6 + $0xe8] ss:$16 sps:$4 sm:$0xff]   ;;  %s2755_s6 = smov 16   ;;  %v3730_v54 = vrot.slane %v3711_v7, %v2954_v63 }
 0xbf1   :  { %1942 = vmatprep.subr.bf16.mxu0 %v2601_v25  ;;  %v3734_v25 = vrot.slane %v3713_v46, %v2954_v63 }
 0xbf4   :  { %1943 = vmatpush1.bf16.msra.mxu0 %v2599_v49 }
 0xbf5   :  { %1944 = vmatprep.subr.bf16.mxu0 %v2607_v34  ;;  %v3740_v34 = vrot.slane %v3711_v7, %v2975_v19 }
 0xbf8   :  { %1945 = vmatpush1.bf16.msra.mxu0 %v2605_v62 }
 0xbf9   :  { %1946 = vmatprep.subr.bf16.mxu0 %v2613_v56 }
 0xbfc   :  { %1947 = vmatpush1.bf16.msra.mxu0 %v2611_v0  ;;  %v3744_v0 = vrot.slane %v3713_v46, %v2980_v24 }
 0xbfd   :  { %1948 = vmatprep.subr.bf16.mxu0 %v2619_v57 }
 0xc00   :  { %1949 = vmatpush1.bf16.msra.mxu0 %v2617_v58 }
 0xc01   :  { %1950 = vmatprep.subr.bf16.mxu0 %v2625_v2 }
 0xc04   :  { %1951 = vmatpush1.bf16.msra.mxu0 %v2623_v59 }
 0xc05   :  { %1952 = vmatprep.subr.bf16.mxu0 %v2631_v60 }
 0xc08   :  { %1953 = vmatpush1.bf16.msra.mxu0 %v2629_v61 }
 0xc09   :  { %1954 = vmatprep.subr.bf16.mxu0 %v2637_v5  ;;  %v3760_v5 = vrot.slane %v3711_v7, %v2980_v24 }
 0xc0c   :  { %1955 = vmatpush1.bf16.msra.mxu0 %v2635_v10 }
 0xcaf   :  { %v1699_v13 = vpop.f32.mrf.mxu0 }
 0xcb0   :  { %v1700_v40 = vadd.f32 %v1699_v13, %v1654_v12 }
 0xcb1   :  { %v1701_v50 = vpop.f32.mrf.mxu0 }
 0xcb2   :  { %v1705_v14 = vmax.f32 %v1700_v40, 0.0 }
 0xcb3   :  { %v1702_v15 = vpop.f32.mrf.mxu0 }
 0xcb4   :  { %v1738_v53 = vpack.c.bf16 %v1705_v14, %v1705_v14  ;;  %v3769_v15 = vrot.slane %v3713_v46, %v3008_v42 }
 0xcb5   :  { %v1703_v41 = vpop.f32.mrf.mxu0 }
 0xcb6   :  { %1932 = vmatmul.mubr.bf16.vlgmr.msra.gmra.mxu1 %v1738_v53  ;;  %1973 = vmatmul.mubr.bf16.vlgmr.msra.gmra.mxu0 %v1738_v53 }
 0xcb7   :  { %2438 = vmatprep.mubr.msk.bf16.mxu1 %vm261_vm3, %v2437_v30 }
 0xd76   :  { %v3632_v17 = vpop.f32.mrf.mxu1  ;;  %v3634_v18 = vpop.f32.mrf.mxu0 }
 0xd77   :  { %2180 = vrot.lane.b32.xlu1 %v3634_v18, %s2727_s27  ;;  %2188 = vrot.lane.b32.xlu0 %v3634_v18, %s2724_s24 }
 0xd78   :  { %v3640_v51 = vpop.f32.mrf.mxu1  ;;  %v3642_v44 = vpop.f32.mrf.mxu0 }
 0xd7a   :  { %v1937_v21 = vpop.f32.mrf.mxu1  ;;  %v1978_v8 = vpop.f32.mrf.mxu0 }
 0xd7b   :  { %2158 = vrot.lane.b32.xlu1 %v3634_v18, %s2755_s6  ;;  %2199 = vrot.lane.b32.xlu0 %v3634_v18, %s2756_s10  ;;  %v3776_v21 = vrot.slane %v3713_v46, %v3024_v1  ;;  %v3780_v8 = vrot.slane %v3711_v7, %v2997_v33 }
 0xd7c   :  { %v1938_v23 = vpop.f32.mrf.mxu1  ;;  %v1979_v26 = vpop.f32.mrf.mxu0 }
 0xd7f   :  { %2169 = vrot.lane.b32.xlu1 %v3634_v18, %s2757_s11  ;;  %2122 = vrot.lane.b32.xlu0 %v3632_v17, %s2758_s2 }
 0xd83   :  { %2147 = vrot.lane.b32.xlu1 %v3634_v18, %s2759_s23  ;;  %2082 = vrot.lane.b32.xlu0 %v3632_v17, %s2756_s10 }
 0xd87   :  { %2027 = vrot.lane.b32.xlu1 %v3632_v17, %s2757_s11  ;;  %2102 = vrot.lane.b32.xlu0 %v3632_v17, %s2760_s0 }
 0xd8b   :  { %2047 = vrot.lane.b32.xlu1 %v3632_v17, %s2727_s27  ;;  %2063 = vrot.lane.b32.xlu0 %v3632_v17, %s2724_s24 }
 0xd8f   :  { %2190 = vrot.lane.b32.xlu1 %v3642_v44, %s2724_s24  ;;  %2177 = vrot.lane.b32.xlu0 %v3642_v44, %s2727_s27 }
 0xd93   :  { %2201 = vrot.lane.b32.xlu1 %v3642_v44, %s2756_s10  ;;  %2155 = vrot.lane.b32.xlu0 %v3642_v44, %s2755_s6 }
 0xd97   :  { %1988 = vrot.lane.b32.xlu1 %v3632_v17, %s2759_s23  ;;  %2166 = vrot.lane.b32.xlu0 %v3642_v44, %s2757_s11 }
 0xd9b   :  { %2143 = vrot.lane.b32.xlu0 %v3642_v44, %s2759_s23  ;;  %2124 = vrot.lane.b32.xlu1 %v3640_v51, %s2758_s2 }
 0xd9f   :  { %2210 = vrot.lane.b32.xlu0 %v3634_v18, %s2760_s0  ;;  %2084 = vrot.lane.b32.xlu1 %v3640_v51, %s2756_s10 }
 0xda3   :  { %2024 = vrot.lane.b32.xlu0 %v3640_v51, %s2757_s11  ;;  %2104 = vrot.lane.b32.xlu1 %v3640_v51, %s2760_s0 }
 0xda7   :  { %2044 = vrot.lane.b32.xlu0 %v3640_v51, %s2727_s27  ;;  %2065 = vrot.lane.b32.xlu1 %v3640_v51, %s2724_s24 }
 0xdab   :  { %1984 = vrot.lane.b32.xlu0 %v3640_v51, %s2759_s23  ;;  %2008 = vrot.lane.b32.xlu1 %v3632_v17, %s2755_s6 }
 0xdaf   :  { %2005 = vrot.lane.b32.xlu0 %v3640_v51, %s2755_s6  ;;  %2212 = vrot.lane.b32.xlu1 %v3642_v44, %s2760_s0 }
 0xdb3   :  { %2221 = vrot.lane.b32.xlu0 %v3634_v18, %s2758_s2  ;;  %2223 = vrot.lane.b32.xlu1 %v3642_v44, %s2758_s2 }
 0xdb7   :  { %2253 = vrot.lane.b32.xlu0 %v2251_v32, %s2751_s28  ;;  %v3787_v32 = vrot.slane %v3711_v7, %v3008_v42 }
 0xde9   :  { %v2181_v22 = vpop.permute.xlu1 %2180  ;;  %v2189_v55 = vpop.permute.xlu0 %2188 }
 0xded   :  { %v2159_v6 = vpop.permute.xlu1 %2158  ;;  %v2200_v35 = vpop.permute.xlu0 %2199 }
 0xdf1   :  { %v2170_v16 = vpop.permute.xlu1 %2169  ;;  %v3697_v4 = vpop.permute.xlu0 %2122 }
 0xdf5   :  { %v3699_v37 = vpop.permute.xlu1 %2147  ;;  %v3701_v20 = vpop.permute.xlu0 %2082 }
 0xdf9   :  { %v3703_v28 = vpop.permute.xlu1 %2027  ;;  %v3705_v29 = vpop.permute.xlu0 %2102 }
 0xdfd   :  { %v3707_v38 = vpop.permute.xlu1 %2047  ;;  %v3709_v36 = vpop.permute.xlu0 %2063 }
 0xe01   :  { %v2191_v39 = vpop.permute.xlu1 %2190  ;;  %v2178_v11 = vpop.permute.xlu0 %2177 }
 0xe02   :  { %v2192_v48 = vsel %vm1599_vm0, %v2189_v55, %v2191_v39  ;;  %v2196_v49 = vsel %vm1599_vm0, %v2191_v39, %v2189_v55  ;;  %v2182_v3 = vsel %vm496_vm6, %v2181_v22, %v2178_v11  ;;  %v2185_v63 = vsel %vm496_vm6, %v2178_v11, %v2181_v22 }
 0xe03   :  { %v2197_v57 = vmul.f32 %v2192_v48, %v3717_v43  ;;  %v2198_v59 = vmul.f32 %v2196_v49, %v3721_v45  ;;  %v2187_v19 = vmul.f32 %v2182_v3, %v3725_v47  ;;  %v2186_v9 = vmul.f32 %v2185_v63, %v3740_v34 }
 0xe04   :  { %v3791_v22 = vrot.slane %v3711_v7, %v3024_v1 }
 0xe05   :  { %v2202_v62 = vpop.permute.xlu1 %2201  ;;  %v2156_v56 = vpop.permute.xlu0 %2155  ;;  %v2245_v41 = vpack.c.bf16 %v3642_v44, %v2187_v19  ;;  %v2244_v26 = vpack.c.bf16 %v3634_v18, %v2186_v9 }
 0xe06   :  { %v2203_v58 = vsel %vm2086_vm4, %v2200_v35, %v2202_v62  ;;  %v2207_v2 = vsel %vm2086_vm4, %v2202_v62, %v2200_v35  ;;  %v2160_v12 = vsel %vm261_vm3, %v2159_v6, %v2156_v56  ;;  %v2163_v30 = vsel %vm261_vm3, %v2156_v56, %v2159_v6 }
 0xe07   :  { %v2208_v60 = vmul.f32 %v2203_v58, %v3730_v54  ;;  %v2209_v61 = vmul.f32 %v2207_v2, %v3734_v25  ;;  %v2165_v23 = vmul.f32 %v2160_v12, %v3756_v31  ;;  %v2164_v11 = vmul.f32 %v2163_v30, %v3780_v8 }
 0xe09   :  { %v2246_v10 = vpack.c.bf16 %v2208_v60, %v2197_v57  ;;  %v3764_v13 = vpop.permute.xlu1 %1988  ;;  %v2167_v40 = vpop.permute.xlu0 %2166  ;;  %v2247_v50 = vpack.c.bf16 %v2209_v61, %v2198_v59 }
 0xe0a   :  { %v2171_v14 = vsel %vm2029_vm5, %v2170_v16, %v2167_v40  ;;  %v2174_v24 = vsel %vm2029_vm5, %v2167_v40, %v2170_v16 }
 0xe0b   :  { %v2176_v53 = vmul.f32 %v2171_v14, %v3744_v0  ;;  %2267 = vmatprep.subr.bf16.mxu1 %v2247_v50  ;;  %v2175_v33 = vmul.f32 %v2174_v24, %v3760_v5 }
 0xe0c   :  { %2268 = vmatpush1.bf16.msra.mxu1 %v2246_v10 }
 0xe0d   :  { %2269 = vmatprep.subr.bf16.mxu1 %v2245_v41  ;;  %v2144_v44 = vpop.permute.xlu0 %2143  ;;  %v2125_v55 = vpop.permute.xlu1 %2124  ;;  %v2243_v6 = vpack.c.bf16 %v2176_v53, %v2165_v23  ;;  %v2242_v3 = vpack.c.bf16 %v2175_v33, %v2164_v11 }
 0xe0e   :  { %v2149_v35 = vsel %vm1990_vm7, %v3699_v37, %v2144_v44  ;;  %v2131_v18 = vsel %vm2126_vm8, %v2125_v55, %v3697_v4  ;;  %v2152_v16 = vsel %vm1990_vm7, %v2144_v44, %v3699_v37  ;;  %v2127_v39 = vsel %vm2126_vm8, %v3697_v4, %v2125_v55 }
 0xe0f   :  { %v2154_v42 = vmul.f32 %v2149_v35, %v3769_v15  ;;  %v2141_v1 = vmul.f32 %v3776_v21, %v2131_v18  ;;  %v2153_v62 = vmul.f32 %v2152_v16, %v3787_v32  ;;  %v2140_v56 = vmul.f32 %v3791_v22, %v2127_v39 }
 0xe10   :  { %2270 = vmatpush1.bf16.msra.mxu1 %v2244_v26  ;;  %v3809_v37 = vrot.slane %v3711_v7, %v2941_v52  ;;  %v2119_v4 = vrot.slane %v3713_v46, %v2941_v52 }
 0xe11   :  { %2271 = vmatprep.subr.bf16.mxu1 %v2243_v6  ;;  %v2211_v48 = vpop.permute.xlu0 %2210  ;;  %v2085_v49 = vpop.permute.xlu1 %2084  ;;  %v2241_v57 = vpack.c.bf16 %v2154_v42, %v2141_v1  ;;  %v2240_v19 = vpack.c.bf16 %v2153_v62, %v2140_v56 }
 0xe12   :  { %v2087_v63 = vsel %vm2086_vm4, %v3701_v20, %v2085_v49  ;;  %v2091_v58 = vsel %vm2086_vm4, %v2085_v49, %v3701_v20 }
 0xe13   :  { %v2100_v61 = vmul.f32 %v3730_v54, %v2087_v63  ;;  %v2101_v52 = vmul.f32 %v3734_v25, %v2091_v58 }
 0xe14   :  { %2272 = vmatpush1.bf16.msra.mxu1 %v2242_v3 }
 0xe15   :  { %v2025_v2 = vpop.permute.xlu0 %2024  ;;  %2273 = vmatprep.subr.bf16.mxu1 %v2241_v57  ;;  %v2105_v59 = vpop.permute.xlu1 %2104  ;;  %v2436_v57 = vcombine.low %v3684_v27, %v3684_v27 }
 0xe16   :  { %v2107_v60 = vsel %vm2106_vm9, %v3705_v29, %v2105_v59  ;;  %v2111_v7 = vsel %vm2106_vm9, %v2105_v59, %v3705_v29  ;;  %v2030_v50 = vsel %vm2029_vm5, %v3703_v28, %v2025_v2  ;;  %v2033_v23 = vsel %vm2029_vm5, %v2025_v2, %v3703_v28 }
 0xe17   :  { %v2120_v46 = vmul.f32 %v3809_v37, %v2107_v60  ;;  %v2121_v9 = vmul.f32 %v2119_v4, %v2111_v7  ;;  %v2043_v26 = vmul.f32 %v3744_v0, %v2030_v50 }
 0xe18   :  { %2274 = vmatpush1.bf16.msra.mxu1 %v2240_v19 }
 0xe19   :  { %v2238_v20 = vpack.c.bf16 %v2120_v46, %v2100_v61  ;;  %v2045_v10 = vpop.permute.xlu0 %2044  ;;  %v2066_v12 = vpop.permute.xlu1 %2065  ;;  %v2239_v40 = vpack.c.bf16 %v2121_v9, %v2101_v52 }
 0xe1a   :  { %v2049_v14 = vsel %vm496_vm6, %v3707_v38, %v2045_v10  ;;  %v2067_v29 = vsel %vm1599_vm0, %v3709_v36, %v2066_v12  ;;  %v2071_v54 = vsel %vm1599_vm0, %v2066_v12, %v3709_v36  ;;  %v2052_v25 = vsel %vm496_vm6, %v2045_v10, %v3707_v38 }
 0xe1b   :  { %v2062_v24 = vmul.f32 %v3725_v47, %v2049_v14  ;;  %v2080_v53 = vmul.f32 %v3717_v43, %v2067_v29  ;;  %v2081_v41 = vmul.f32 %v3721_v45, %v2071_v54  ;;  %2275 = vmatprep.subr.bf16.mxu1 %v2239_v40  ;;  %v2061_v38 = vmul.f32 %v3740_v34, %v2052_v25 }
 0xe1c   :  { %2276 = vmatpush1.bf16.msra.mxu1 %v2238_v20  ;;  %v2042_v43 = vmul.f32 %v3760_v5, %v2033_v23 }
 0xe1d   :  { %v2236_v30 = vpack.c.bf16 %v2080_v53, %v3632_v17  ;;  %v1985_v44 = vpop.permute.xlu0 %1984  ;;  %v2009_v36 = vpop.permute.xlu1 %2008  ;;  %v2237_v55 = vpack.c.bf16 %v2081_v41, %v3640_v51  ;;  %v2235_v47 = vpack.c.bf16 %v2062_v24, %v2043_v26 }
 0xe1e   :  { %v1991_v45 = vsel %vm1990_vm7, %v3764_v13, %v1985_v44  ;;  %v1994_v28 = vsel %vm1990_vm7, %v1985_v44, %v3764_v13  ;;  %v2234_v33 = vpack.c.bf16 %v2061_v38, %v2042_v43 }
 0xe1f   :  { %2277 = vmatprep.subr.bf16.mxu1 %v2237_v55  ;;  %v2003_v34 = vmul.f32 %v3787_v32, %v1994_v28  ;;  %v2004_v18 = vmul.f32 %v3769_v15, %v1991_v45 }
 0xe20   :  { %2278 = vmatpush1.bf16.msra.mxu1 %v2236_v30 }
 0xe21   :  { %v2006_v0 = vpop.permute.xlu0 %2005  ;;  %2279 = vmatprep.subr.bf16.mxu1 %v2235_v47  ;;  %v2213_v17 = vpop.permute.xlu1 %2212 }
 0xe22   :  { %v2010_v35 = vsel %vm261_vm3, %v2009_v36, %v2006_v0  ;;  %v2013_v51 = vsel %vm261_vm3, %v2006_v0, %v2009_v36  ;;  %v2214_v16 = vsel %vm2106_vm9, %v2211_v48, %v2213_v17  ;;  %v2218_v13 = vsel %vm2106_vm9, %v2213_v17, %v2211_v48 }
 0xe23   :  { %v2022_v5 = vmul.f32 %v3780_v8, %v2013_v51  ;;  %v2023_v6 = vmul.f32 %v3756_v31, %v2010_v35  ;;  %v2219_v32 = vmul.f32 %v2214_v16, %v3809_v37  ;;  %v2220_v15 = vmul.f32 %v2218_v13, %v2119_v4 }
 0xe24   :  { %2280 = vmatpush1.bf16.msra.mxu1 %v2234_v33 }
 0xe25   :  { %v2232_v42 = vpack.c.bf16 %v2022_v5, %v2003_v34  ;;  %v2222_v39 = vpop.permute.xlu0 %2221  ;;  %v2224_v1 = vpop.permute.xlu1 %2223  ;;  %v2233_v11 = vpack.c.bf16 %v2023_v6, %v2004_v18 }
 0xe26   :  { %v2225_v49 = vsel %vm2126_vm8, %v2222_v39, %v2224_v1  ;;  %v2229_v3 = vsel %vm2126_vm8, %v2224_v1, %v2222_v39 }
 0xe27   :  { %v2230_v8 = vmul.f32 %v2225_v49, %v3791_v22  ;;  %v2231_v31 = vmul.f32 %v2229_v3, %v3776_v21  ;;  %2281 = vmatprep.subr.bf16.mxu1 %v2233_v11 }
 0xe28   :  { %2282 = vmatpush1.bf16.msra.mxu1 %v2232_v42 }
 0xe29   :  { %v2248_v62 = vpack.c.bf16 %v2230_v8, %v2219_v32  ;;  %v2249_v48 = vpack.c.bf16 %v2231_v31, %v2220_v15  ;;  %v2254_v56 = vpop.permute.xlu0 %2253 }
 0xe2a   :  { %2507 = vpush %v2254_v56 }
 0xe2b   :  { %2297 = vmatprep.subr.bf16.mxu1 %v2249_v48 }
 0xe2c   :  { %2298 = vmatpush2.bf16.msra.mxu1 %v2248_v62 }
 0xe2f   :  { %2300 = vmatmul.mubr.bf16.vlgmr.msra.gmra.mxu1 %v2436_v57 }
 0xe5b   :  { %s2508_s4 = spop %2507 }
 0xe5c   :  { %v2256_v63 = vstv %s2508_s4 }
 0xeef   :  { %v2301_v37 = vpop.f32.mrf.mxu1 }
 0xef0   :  { %v2302_v4 = vadd.f32 %v2301_v37, %v2256_v63 }
 0xef1   :  { %v2303_v58 = vpop.f32.mrf.mxu1 }
 0xef2   :  { %v2308_v22 = vmul.f32 1.25, %v2302_v4  ;;  %v2304_v2 = vadd.f32 %v2303_v58, %v2256_v63 }
 0xef3   :  { %v2305_v21 = vpop.f32.mrf.mxu1 }
 0xef4   :  { %v2309_v59 = vmul.f32 1.25, %v2304_v2  ;;  %v2310_v7 = vsel %vm168_vm1, %v2308_v22, -inf }
 0xef5   :  { %v2306_v19 = vpop.f32.mrf.mxu1 }
 0xef6   :  { %v2328_v60 = vcombine.low %v2308_v22, %v2309_v59  ;;  %v2311_v61 = vsel %vm168_vm1, %v2309_v59, -inf }
 0xef7   :  { %v2312_v52 = vmax.f32 %v2310_v7, %v2311_v61 }
 0xef8   :  { %2439 = vst.sshfl [vmem:[%s3880_s7] sm:$0x33 pattern:$0x76325410] %v2328_v60  ;;  %s2761_s7 = smov [#allocation7]  }
 0xef9   :  { %2313 = vmax.xlane.f32.xlu1 %v2312_v52  ;;  %s2361_s28 = sshll.u32 %s2761_s7, 4  ;;  %s2362_s28 = int_to_ptr.vmem [resolvable:$true] %s2361_s28 }
 0xefa   :  { %s2688_s15 = scalar_lea.vmem %s2362_s28, 64  ;;  %p2693_p11 = scmp.lt.s32.totalorder %s2362_s28, %s2362_s28 }
 0xefb   :  { %p2689_p10 = scmp.ne.s32.totalorder %s2362_s28, %s2688_s15  ;;  %p2694_p12 = scmp.lt.s32.totalorder %s2688_s15, %s2688_s15 }
 0xefd   :  { %p2695_p13 = por %p2694_p12, %p2693_p11 }
 0xeff   :  { %p2696_p0 = pnand %p2695_p13, %p2689_p10 }
 0xf82   :  { %v2314_v27 = vpop.xlane.xlu1 %2313 }
 0xf83   :  { %v2315_v46 = vsub.f32 %v2308_v22, %v2314_v27  ;;  %v2316_v9 = vsub.f32 %v2309_v59, %v2314_v27 }
 0xf85   :  { %v2317_v20 = vmul.f32 1.442695, %v2315_v46  ;;  %v2319_v10 = vmul.f32 1.442695, %v2316_v9 }
 0xf87   :  { %2640 = vpow2.f32 %v2317_v20 }
 0xf88   :  { %2642 = vpow2.f32 %v2319_v10 }
 0xf94   :  { %v2641_v12 = vpop.eup %2640 }
 0xf95   :  { %v2643_v40 = vpop.eup %2642  ;;  %v2321_v50 = vsel %vm168_vm1, %v2641_v12, 0.0 }
 0xf96   :  { %v2322_v14 = vsel %vm168_vm1, %v2643_v40, 0.0 }
 0xf97   :  { %v2323_v29 = vadd.f32 %v2322_v14, %v2321_v50 }
 0xf99   :  { %2324 = vadd.xlane.f32.xlu0 %v2323_v29 }
0x1022   :  { %v2325_v54 = vpop.xlane.xlu0 %2324 }
0x1023   :  { %2644 = vrcp.f32 %v2325_v54 }
0x1030   :  { %v2645_v25 = vpop.eup %2644 }
0x1031   :  { %v2339_v24 = vmul.f32 %v2645_v25, %v2641_v12  ;;  %v2340_v53 = vmul.f32 %v2645_v25, %v2643_v40 }
0x1033   :  { %v2343_v41 = vcombine.low %v2339_v24, %v2340_v53 }
0x1035   :  { %2440 = vst.sshfl [vmem:[#allocation7] sm:$0x33 pattern:$0x76325410] %v2343_v41 }
0x1036   :  { %2699 = shalt.err (!%p2696_p0)
}
0x1037   :  { %2364 = dma.vmem_to_hbm [thread:$0]  %s2362_s28, 64, %s3881_s8, [#allocation4]  }
0x1038   :  { %2712 = dma.done.wait [#allocation4], 64  }
0x1039   :  { %2713 = vsyncadd [#allocation4], 4294967232 }
0x103a   :  { %2370 = vsyncpa [#allocation3], 1 }
0x103b   :  { %2371 = vsyncpa [#allocation6], 1 }
0x103c   :  { %2372 = vsyncpa [#allocation4], 1 }

</bundles_post_ra>
